<compile_context>
chip_gen: v6e
topology: v6e:2x2x1
jax: 0.10.0
libtpu: 0.0.40
codegen_flags: <defaults>
</compile_context>

<pallas_src>
import functools

import jax
import jax.numpy as jnp
from jax import lax
from jax.experimental import pallas as pl
from jax.experimental.pallas import tpu as pltpu

_PADL = 16  # left pad of the scratch T axis: bf16-tile-aligned interior store


def _resblock_kernel(xcat_ref, w1_ref, wd_ref, w2_ref, vec_ref,
                     wsq_ref, bsq_ref, wex_ref, bex_ref,
                     o_ref, pad_ref, *, use_se: bool):
    f32 = jnp.float32
    Fp2, Ts, P = pad_ref.shape
    F = Fp2 - 2
    T = Ts - (_PADL + 1)
    N = F * T
    K1 = xcat_ref.shape[-1]          # 3 * Cin  (dx-concatenated input channels)
    K2 = w2_ref.shape[1]             # 3 * P

    # ---- conv1 + conv1pw (folded): 3 wide-K bf16 dots over dy ---------------
    # xcat_ref layout: (F+2, T, 3*Cin), channels = [dx=0 | dx=1 | dx=2] blocks.
    acc1 = jnp.dot(xcat_ref[0:F, :, :].reshape(N, K1), w1_ref[0],
                   preferred_element_type=f32)
    for dy in (1, 2):
        acc1 = acc1 + jnp.dot(xcat_ref[dy:dy + F, :, :].reshape(N, K1),
                              w1_ref[dy], preferred_element_type=f32)

    # ---- conv1pw bias + ReLU + BN1 (folded per-channel scale/bias), f32 -----
    h = jnp.maximum(acc1 + vec_ref[0:1, :], 0.0)
    h = h * vec_ref[1:2, :] + vec_ref[2:3, :]

    # ---- re-pad h through the bf16 scratch: zero borders only + aligned store
    zrow = jnp.zeros((1, Ts, P), pad_ref.dtype)
    pad_ref[0:1, :, :] = zrow
    pad_ref[F + 1:F + 2, :, :] = zrow
    zcol = jnp.zeros((F, 1, P), pad_ref.dtype)
    pad_ref[1:1 + F, _PADL - 1:_PADL, :] = zcol
    pad_ref[1:1 + F, _PADL + T:_PADL + T + 1, :] = zcol
    pad_ref[1:1 + F, _PADL:_PADL + T, :] = h.astype(pad_ref.dtype).reshape(F, T, P)

    # ---- conv2 + conv2pw + bn2 (folded): concat dx taps on lanes, 3 dots ----
    hcat = jnp.concatenate(
        [pad_ref[:, _PADL - 1:_PADL - 1 + T, :],
         pad_ref[:, _PADL:_PADL + T, :],
         pad_ref[:, _PADL + 1:_PADL + 1 + T, :]], axis=-1)       # (F+2, T, 3P)
    acc2 = jnp.dot(hcat[0:F].reshape(N, K2), w2_ref[1 - 1],
                   preferred_element_type=f32)
    for dy in (1, 2):
        acc2 = acc2 + jnp.dot(hcat[dy:dy + F].reshape(N, K2), w2_ref[dy],
                              preferred_element_type=f32)
    h2 = (acc2 + vec_ref[3:4, :]).reshape(F, T, P)

    # ---- fwSE: squeeze over (C, T), two tiny matvecs, sigmoid gate per freq -
    if use_se:
        m = jnp.sum(h2, axis=2)                                   # (F, T) lane reduce
        m = jnp.sum(m, axis=1, keepdims=True) * (1.0 / (T * P))   # (F, 1)
        z = jnp.dot(wsq_ref[...], m, preferred_element_type=f32) + bsq_ref[...]
        z = jnp.maximum(z, 0.0)                                   # (SE, 1)
        s = jnp.dot(wex_ref[...], z, preferred_element_type=f32) + bex_ref[...]
        s = 1.0 / (1.0 + jnp.exp(-s))                             # (F, 1) sigmoid (EUP)
        h2 = h2 * s[:, :, None]

    # ---- downsample residual (1x1 conv + BN folded, zero-padded to K1) ------
    res = jnp.dot(xcat_ref[1:1 + F, :, :].reshape(N, K1), wd_ref[...],
                  preferred_element_type=f32) + vec_ref[4:5, :]

    out = jnp.maximum(h2 + res.reshape(F, T, P), 0.0)
    o_ref[...] = out.reshape(F, T * P).astype(o_ref.dtype)        # lane-dense store


def _expand_grouped_3x3(w, groups):
    """PyTorch grouped weight (Cout, Cin//groups, 3, 3) -> dense (3, 3, Cin, Cout)."""
    Cout, Cpg, KH, KW = w.shape
    Cin = Cpg * groups
    Opg = Cout // groups
    dense = jnp.zeros((KH, KW, Cin, Cout), jnp.float32)
    for g in range(groups):
        blk = jnp.transpose(w[g * Opg:(g + 1) * Opg], (2, 3, 1, 0))  # (3,3,Cpg,Opg)
        dense = dense.at[:, :, g * Cpg:(g + 1) * Cpg,
                         g * Opg:(g + 1) * Opg].set(blk)
    return dense


def res_basic_block(x, params, *, eps=1e-5, use_fwse=True, stride=1):
    """Fused ResBasicBlock forward. x: (B, Cin, F, T) NCHW -> (B, planes, F, T)."""
    assert stride == 1  # TODO(synk): stride > 1 not implemented.
    B, Cin, F, T = x.shape
    f32, bf16 = jnp.float32, jnp.bfloat16

    w1 = params["conv1_w"].astype(f32)
    w2 = params["conv2_w"].astype(f32)
    g1 = Cin // w1.shape[1]
    P = w2.shape[0]
    g2 = P // w2.shape[1]

    def bn_fold(stats):
        g, b_, m, v = (s.astype(f32) for s in stats)
        sc = g / jnp.sqrt(v + eps)
        return sc, b_ - m * sc

    # Dense expansion of the grouped 3x3 convs, with the 1x1 pointwise convs
    # (and bn2) folded straight into them -> one set of wide-K dots per stage.
    W1d = _expand_grouped_3x3(w1, g1)                            # (3,3,Cin,Cmid)
    W1pw = params["conv1pw_w"][:, :, 0, 0].T.astype(f32)         # (Cmid, P)
    W1f = jnp.einsum("yxco,op->yxcp", W1d, W1pw).reshape(3, 3 * Cin, P).astype(bf16)
    b1 = params["conv1pw_b"].astype(f32)
    bn1_sc, bn1_b = bn_fold(params["bn1"])

    bn2_sc, bn2_b = bn_fold(params["bn2"])
    W2d = _expand_grouped_3x3(w2, g2)                            # (3,3,P,P)
    W2pw = params["conv2pw_w"][:, :, 0, 0].T.astype(f32) * bn2_sc[None, :]
    W2f = jnp.einsum("yxco,op->yxcp", W2d, W2pw).reshape(3, 3 * P, P).astype(bf16)
    b2 = params["conv2pw_b"].astype(f32) * bn2_sc + bn2_b

    # Downsample (1x1 conv, no bias) with its BN folded; identity if absent.
    if params.get("down_w") is None:
        assert Cin == P, "identity shortcut requires in_planes == planes"
        Wd = jnp.eye(Cin, dtype=f32)
        bd = jnp.zeros((P,), f32)
    else:
        bnd_sc, bnd_b = bn_fold(params["bnd"])
        Wd = params["down_w"][:, :, 0, 0].T.astype(f32) * bnd_sc[None, :]
        bd = bnd_b
    # Zero-padded so the residual reuses the (already needed) dy=1 cat tap.
    Wd_cat = jnp.zeros((3 * Cin, P), f32).at[Cin:2 * Cin].set(Wd).astype(bf16)

    vecs = jnp.stack([b1, bn1_sc, bn1_b, b2, bd], axis=0)        # (5, P) packed, f32

    if use_fwse:
        se = params["se"]
        SE = se["sq_w"].shape[0]
        Wsq = se["sq_w"].astype(f32)                             # (SE, F)
        bsq = se["sq_b"].astype(f32).reshape(SE, 1)
        Wex = se["ex_w"].astype(f32)                             # (F, SE)
        bex = se["ex_b"].astype(f32).reshape(F, 1)
    else:
        SE = 1
        Wsq = jnp.zeros((1, F), f32); bsq = jnp.zeros((1, 1), f32)
        Wex = jnp.zeros((F, 1), f32); bex = jnp.zeros((F, 1), f32)

    # Channels-last bf16 input, spatially zero-padded, with the three dx taps
    # pre-concatenated on the channel (lane) axis: in-kernel conv1 taps become
    # pure leading-axis ref slices + one wide-K matmul per dy.
    xb = jnp.transpose(x, (0, 2, 3, 1)).astype(bf16)             # (B, F, T, Cin)
    xp = jnp.pad(xb, ((0, 0), (1, 1), (1, 1), (0, 0)))           # (B, F+2, T+2, Cin)
    x_cat = jnp.concatenate([xp[:, :, 0:T, :], xp[:, :, 1:T + 1, :],
                             xp[:, :, 2:T + 2, :]], axis=-1)     # (B, F+2, T, 3Cin)

    out2d = pl.pallas_call(
        functools.partial(_resblock_kernel, use_se=use_fwse),
        out_shape=jax.ShapeDtypeStruct((B, F, T * P), x.dtype),
        grid=(B,),
        in_specs=[
            pl.BlockSpec((None, F + 2, T, 3 * Cin), lambda i: (i, 0, 0, 0)),
            pl.BlockSpec((3, 3 * Cin, P), lambda i: (0, 0, 0)),
            pl.BlockSpec((3 * Cin, P), lambda i: (0, 0)),
            pl.BlockSpec((3, 3 * P, P), lambda i: (0, 0, 0)),
            pl.BlockSpec((5, P), lambda i: (0, 0)),
            pl.BlockSpec((SE, F), lambda i: (0, 0)),
            pl.BlockSpec((SE, 1), lambda i: (0, 0)),
            pl.BlockSpec((F, SE), lambda i: (0, 0)),
            pl.BlockSpec((F, 1), lambda i: (0, 0)),
        ],
        out_specs=pl.BlockSpec((None, F, T * P), lambda i: (i, 0, 0)),
        scratch_shapes=[pltpu.VMEM((F + 2, _PADL + T + 1, P), jnp.bfloat16)],
        compiler_params=pltpu.CompilerParams(
            dimension_semantics=("parallel",),
            vmem_limit_bytes=48 * 1024 * 1024),
    )(x_cat, W1f, Wd_cat, W2f, vecs, Wsq, bsq, Wex, bex)

    return out2d.reshape(B, F, T, P).transpose(0, 3, 1, 2)


def _torch_reference(x, p, *, eps=1e-5, use_fwse=True):
    """Pure-JAX replica of ResBasicBlock.forward (eval-mode BatchNorm, f32)."""
    def conv3x3(v, w, groups):
        return lax.conv_general_dilated(
            v, w, window_strides=(1, 1), padding=((1, 1), (1, 1)),
            dimension_numbers=("NCHW", "OIHW", "NCHW"),
            feature_group_count=groups)

    def conv1x1(v, w, b=None):
        y = jnp.einsum("bchw,oc->bohw", v, w[:, :, 0, 0])
        return y if b is None else y + b[None, :, None, None]

    def bn(v, stats):
        g, b_, m, var = stats
        sc = g / jnp.sqrt(var + eps)
        return (v - m[None, :, None, None]) * sc[None, :, None, None] \
            + b_[None, :, None, None]

    Cin = x.shape[1]
    g1 = Cin // p["conv1_w"].shape[1]
    g2 = p["conv2_w"].shape[0] // p["conv2_w"].shape[1]

    out = conv1x1(conv3x3(x, p["conv1_w"], g1), p["conv1pw_w"], p["conv1pw_b"])
    out = jnp.maximum(out, 0.0)
    out = bn(out, p["bn1"])
    out = conv1x1(conv3x3(out, p["conv2_w"], g2), p["conv2pw_w"], p["conv2pw_b"])
    out = bn(out, p["bn2"])
    if use_fwse:
        se = p["se"]
        s = jnp.mean(out, axis=(1, 3))                            # (B, F)
        s = jnp.maximum(s @ se["sq_w"].T + se["sq_b"][None, :], 0.0)
        s = jax.nn.sigmoid(s @ se["ex_w"].T + se["ex_b"][None, :])
        out = out * s[:, None, :, None]
    if p.get("down_w") is None:
        res = x
    else:
        res = bn(conv1x1(x, p["down_w"]), p["bnd"])
    return jnp.maximum(out + res, 0.0)


if __name__ == "__main__":
    B, Cin, P, F, T = 2, 8, 16, 16, 16        # planes != in_planes -> real downsample
    SE, GD = 8, 4                              # se_channels, group_divisor
    eps = 1e-5

    kit = iter(jax.random.split(jax.random.PRNGKey(0), 24))
    nxt = lambda: next(kit)
    u = lambda k, shape, lo=-0.3, hi=0.3: jax.random.uniform(k, shape, jnp.float32, lo, hi)

    x = jax.random.normal(nxt(), (B, Cin, F, T), jnp.float32)

    params = dict(
        conv1_w=u(nxt(), (Cin, GD, 3, 3)),            # grouped: groups = Cin // GD
        conv1pw_w=u(nxt(), (P, Cin, 1, 1)),
        conv1pw_b=u(nxt(), (P,)),
        bn1=(u(nxt(), (P,), 0.8, 1.2), u(nxt(), (P,), -0.2, 0.2),
             u(nxt(), (P,), -0.3, 0.3), u(nxt(), (P,), 0.5, 1.5)),
        conv2_w=u(nxt(), (P, GD, 3, 3)),              # grouped: groups = P // GD
        conv2pw_w=u(nxt(), (P, P, 1, 1)),
        conv2pw_b=u(nxt(), (P,)),
        bn2=(u(nxt(), (P,), 0.8, 1.2), u(nxt(), (P,), -0.2, 0.2),
             u(nxt(), (P,), -0.3, 0.3), u(nxt(), (P,), 0.5, 1.5)),
        down_w=u(nxt(), (P, Cin, 1, 1)),
        bnd=(u(nxt(), (P,), 0.8, 1.2), u(nxt(), (P,), -0.2, 0.2),
             u(nxt(), (P,), -0.3, 0.3), u(nxt(), (P,), 0.5, 1.5)),
        se=dict(sq_w=u(nxt(), (SE, F)), sq_b=u(nxt(), (SE,)),
                ex_w=u(nxt(), (F, SE)), ex_b=u(nxt(), (F,))),
    )

    out = res_basic_block(x, params, eps=eps, use_fwse=True)
    out = jax.block_until_ready(out)

    ref = _torch_reference(x, params, eps=eps, use_fwse=True)
    assert out.shape == ref.shape, (out.shape, ref.shape)
    # bf16 MXU operands (f32 accumulation) -> tolerance relaxed vs pure-f32 ref.
    max_err = float(jnp.max(jnp.abs(out - ref)))
    assert jnp.allclose(out, ref, atol=5e-2, rtol=5e-2), f"mismatch, max_err={max_err}"

    print("KERNEL_OK")
</pallas_src>

<mosaic_0001>
module attributes {stable_mosaic.version = 11 : i64} {
  func.func @_resblock_kernel(%arg0: i32, %arg1: memref<1x18x16x24xbf16, #tpu.memory_space<vmem>>, %arg2: memref<3x24x16xbf16, #tpu.memory_space<vmem>>, %arg3: memref<24x16xbf16, #tpu.memory_space<vmem>>, %arg4: memref<3x48x16xbf16, #tpu.memory_space<vmem>>, %arg5: memref<5x16xf32, #tpu.memory_space<vmem>>, %arg6: memref<8x16xf32, #tpu.memory_space<vmem>>, %arg7: memref<8x1xf32, #tpu.memory_space<vmem>>, %arg8: memref<16x8xf32, #tpu.memory_space<vmem>>, %arg9: memref<16x1xf32, #tpu.memory_space<vmem>>, %arg10: memref<1x16x256xf32, #tpu.memory_space<vmem>>, %arg11: memref<18x33x16xbf16, #tpu.memory_space<vmem>>) attributes {dimension_semantics = [#tpu.dimension_semantics<parallel>], iteration_bounds = array<i64: 2>, scalar_prefetch = 0 : i64, scratch_operands = 1 : i64, tpu.core_type = #tpu.core_type<tc>, window_params = [{transform_indices = @transform_0, window_bounds = array<i64: 1, 18, 16, 24>}, {pipeline_mode = #tpu.pipeline_mode<synchronous>, transform_indices = @transform_1, window_bounds = array<i64: 3, 24, 16>}, {pipeline_mode = #tpu.pipeline_mode<synchronous>, transform_indices = @transform_2, window_bounds = array<i64: 24, 16>}, {pipeline_mode = #tpu.pipeline_mode<synchronous>, transform_indices = @transform_3, window_bounds = array<i64: 3, 48, 16>}, {pipeline_mode = #tpu.pipeline_mode<synchronous>, transform_indices = @transform_4, window_bounds = array<i64: 5, 16>}, {pipeline_mode = #tpu.pipeline_mode<synchronous>, transform_indices = @transform_5, window_bounds = array<i64: 8, 16>}, {pipeline_mode = #tpu.pipeline_mode<synchronous>, transform_indices = @transform_6, window_bounds = array<i64: 8, 1>}, {pipeline_mode = #tpu.pipeline_mode<synchronous>, transform_indices = @transform_7, window_bounds = array<i64: 16, 8>}, {pipeline_mode = #tpu.pipeline_mode<synchronous>, transform_indices = @transform_8, window_bounds = array<i64: 16, 1>}, {transform_indices = @transform_9, window_bounds = array<i64: 1, 16, 256>}]} {
    %c0 = arith.constant 0 : index
    %c0_0 = arith.constant 0 : index
    %c0_1 = arith.constant 0 : index
    %c0_2 = arith.constant 0 : index
    %0 = vector.load %arg1[%c0, %c0_0, %c0_1, %c0_2] : memref<1x18x16x24xbf16, #tpu.memory_space<vmem>>, vector<1x16x16x24xbf16>
    %1 = vector.shape_cast %0 : vector<1x16x16x24xbf16> to vector<16x16x24xbf16>
    %2 = vector.shape_cast %1 : vector<16x16x24xbf16> to vector<256x24xbf16>
    %c0_3 = arith.constant 0 : index
    %c0_4 = arith.constant 0 : index
    %c0_5 = arith.constant 0 : index
    %3 = vector.load %arg2[%c0_3, %c0_4, %c0_5] : memref<3x24x16xbf16, #tpu.memory_space<vmem>>, vector<1x24x16xbf16>
    %4 = vector.shape_cast %3 : vector<1x24x16xbf16> to vector<24x16xbf16>
    %cst = arith.constant dense<0.000000e+00> : vector<256x16xf32>
    %5 = tpu.matmul %2, %4, %cst {dimension_numbers = #tpu.dot_dimension_numbers<[1], [0], [0], [1], [0, 0, 1, 1], [], []>} : vector<256x24xbf16>, vector<24x16xbf16>, vector<256x16xf32> -> vector<256x16xf32>
    %c0_6 = arith.constant 0 : index
    %c1 = arith.constant 1 : index
    %c0_7 = arith.constant 0 : index
    %c0_8 = arith.constant 0 : index
    %6 = vector.load %arg1[%c0_6, %c1, %c0_7, %c0_8] : memref<1x18x16x24xbf16, #tpu.memory_space<vmem>>, vector<1x16x16x24xbf16>
    %7 = vector.shape_cast %6 : vector<1x16x16x24xbf16> to vector<16x16x24xbf16>
    %8 = vector.shape_cast %7 : vector<16x16x24xbf16> to vector<256x24xbf16>
    %c1_9 = arith.constant 1 : index
    %c0_10 = arith.constant 0 : index
    %c0_11 = arith.constant 0 : index
    %9 = vector.load %arg2[%c1_9, %c0_10, %c0_11] : memref<3x24x16xbf16, #tpu.memory_space<vmem>>, vector<1x24x16xbf16>
    %10 = vector.shape_cast %9 : vector<1x24x16xbf16> to vector<24x16xbf16>
    %cst_12 = arith.constant dense<0.000000e+00> : vector<256x16xf32>
    %11 = tpu.matmul %8, %10, %cst_12 {dimension_numbers = #tpu.dot_dimension_numbers<[1], [0], [0], [1], [0, 0, 1, 1], [], []>} : vector<256x24xbf16>, vector<24x16xbf16>, vector<256x16xf32> -> vector<256x16xf32>
    %12 = arith.addf %5, %11 : vector<256x16xf32>
    %c0_13 = arith.constant 0 : index
    %c2 = arith.constant 2 : index
    %c0_14 = arith.constant 0 : index
    %c0_15 = arith.constant 0 : index
    %13 = vector.load %arg1[%c0_13, %c2, %c0_14, %c0_15] : memref<1x18x16x24xbf16, #tpu.memory_space<vmem>>, vector<1x16x16x24xbf16>
    %14 = vector.shape_cast %13 : vector<1x16x16x24xbf16> to vector<16x16x24xbf16>
    %15 = vector.shape_cast %14 : vector<16x16x24xbf16> to vector<256x24xbf16>
    %c2_16 = arith.constant 2 : index
    %c0_17 = arith.constant 0 : index
    %c0_18 = arith.constant 0 : index
    %16 = vector.load %arg2[%c2_16, %c0_17, %c0_18] : memref<3x24x16xbf16, #tpu.memory_space<vmem>>, vector<1x24x16xbf16>
    %17 = vector.shape_cast %16 : vector<1x24x16xbf16> to vector<24x16xbf16>
    %cst_19 = arith.constant dense<0.000000e+00> : vector<256x16xf32>
    %18 = tpu.matmul %15, %17, %cst_19 {dimension_numbers = #tpu.dot_dimension_numbers<[1], [0], [0], [1], [0, 0, 1, 1], [], []>} : vector<256x24xbf16>, vector<24x16xbf16>, vector<256x16xf32> -> vector<256x16xf32>
    %19 = arith.addf %12, %18 : vector<256x16xf32>
    %c0_20 = arith.constant 0 : index
    %c0_21 = arith.constant 0 : index
    %20 = vector.load %arg5[%c0_20, %c0_21] : memref<5x16xf32, #tpu.memory_space<vmem>>, vector<1x16xf32>
    %21 = vector.broadcast %20 : vector<1x16xf32> to vector<256x16xf32>
    %22 = arith.addf %19, %21 : vector<256x16xf32>
    %cst_22 = arith.constant 0.000000e+00 : f32
    %23 = vector.broadcast %cst_22 : f32 to vector<256x16xf32>
    %24 = arith.maximumf %22, %23 : vector<256x16xf32>
    %c1_23 = arith.constant 1 : index
    %c0_24 = arith.constant 0 : index
    %25 = vector.load %arg5[%c1_23, %c0_24] : memref<5x16xf32, #tpu.memory_space<vmem>>, vector<1x16xf32>
    %26 = vector.broadcast %25 : vector<1x16xf32> to vector<256x16xf32>
    %27 = arith.mulf %24, %26 : vector<256x16xf32>
    %c2_25 = arith.constant 2 : index
    %c0_26 = arith.constant 0 : index
    %28 = vector.load %arg5[%c2_25, %c0_26] : memref<5x16xf32, #tpu.memory_space<vmem>>, vector<1x16xf32>
    %29 = vector.broadcast %28 : vector<1x16xf32> to vector<256x16xf32>
    %30 = arith.addf %27, %29 : vector<256x16xf32>
    %cst_27 = arith.constant 0.000000e+00 : bf16
    %31 = vector.broadcast %cst_27 : bf16 to vector<1x33x16xbf16>
    %c0_28 = arith.constant 0 : index
    %c0_29 = arith.constant 0 : index
    %c0_30 = arith.constant 0 : index
    %32 = vector.load %arg11[%c0_28, %c0_29, %c0_30] : memref<18x33x16xbf16, #tpu.memory_space<vmem>>, vector<1x33x16xbf16>
    tpu.vector_store %arg11[%c0_28, %c0_29, %c0_30], %31 {strides = array<i32>} : memref<18x33x16xbf16, #tpu.memory_space<vmem>>, vector<1x33x16xbf16>,
    %c17 = arith.constant 17 : index
    %c0_31 = arith.constant 0 : index
    %c0_32 = arith.constant 0 : index
    %33 = vector.load %arg11[%c17, %c0_31, %c0_32] : memref<18x33x16xbf16, #tpu.memory_space<vmem>>, vector<1x33x16xbf16>
    tpu.vector_store %arg11[%c17, %c0_31, %c0_32], %31 {strides = array<i32>} : memref<18x33x16xbf16, #tpu.memory_space<vmem>>, vector<1x33x16xbf16>,
    %cst_33 = arith.constant 0.000000e+00 : bf16
    %34 = vector.broadcast %cst_33 : bf16 to vector<16x1x16xbf16>
    %c1_34 = arith.constant 1 : index
    %c15 = arith.constant 15 : index
    %c0_35 = arith.constant 0 : index
    %35 = vector.load %arg11[%c1_34, %c15, %c0_35] : memref<18x33x16xbf16, #tpu.memory_space<vmem>>, vector<16x1x16xbf16>
    tpu.vector_store %arg11[%c1_34, %c15, %c0_35], %34 {strides = array<i32>} : memref<18x33x16xbf16, #tpu.memory_space<vmem>>, vector<16x1x16xbf16>,
    %c1_36 = arith.constant 1 : index
    %c32 = arith.constant 32 : index
    %c0_37 = arith.constant 0 : index
    %36 = vector.load %arg11[%c1_36, %c32, %c0_37] : memref<18x33x16xbf16, #tpu.memory_space<vmem>>, vector<16x1x16xbf16>
    tpu.vector_store %arg11[%c1_36, %c32, %c0_37], %34 {strides = array<i32>} : memref<18x33x16xbf16, #tpu.memory_space<vmem>>, vector<16x1x16xbf16>,
    %37 = arith.truncf %30 : vector<256x16xf32> to vector<256x16xbf16>
    %38 = vector.shape_cast %37 : vector<256x16xbf16> to vector<16x16x16xbf16>
    %c1_38 = arith.constant 1 : index
    %c16 = arith.constant 16 : index
    %c0_39 = arith.constant 0 : index
    %39 = vector.load %arg11[%c1_38, %c16, %c0_39] : memref<18x33x16xbf16, #tpu.memory_space<vmem>>, vector<16x16x16xbf16>
    tpu.vector_store %arg11[%c1_38, %c16, %c0_39], %38 {strides = array<i32>} : memref<18x33x16xbf16, #tpu.memory_space<vmem>>, vector<16x16x16xbf16>,
    %c0_40 = arith.constant 0 : index
    %c15_41 = arith.constant 15 : index
    %c0_42 = arith.constant 0 : index
    %40 = vector.load %arg11[%c0_40, %c15_41, %c0_42] : memref<18x33x16xbf16, #tpu.memory_space<vmem>>, vector<18x16x16xbf16>
    %c0_43 = arith.constant 0 : index
    %c16_44 = arith.constant 16 : index
    %c0_45 = arith.constant 0 : index
    %41 = vector.load %arg11[%c0_43, %c16_44, %c0_45] : memref<18x33x16xbf16, #tpu.memory_space<vmem>>, vector<18x16x16xbf16>
    %c0_46 = arith.constant 0 : index
    %c17_47 = arith.constant 17 : index
    %c0_48 = arith.constant 0 : index
    %42 = vector.load %arg11[%c0_46, %c17_47, %c0_48] : memref<18x33x16xbf16, #tpu.memory_space<vmem>>, vector<18x16x16xbf16>
    %43 = tpu.concatenate %40, %41, %42 in 2 : vector<18x16x16xbf16>, vector<18x16x16xbf16>, vector<18x16x16xbf16> -> vector<18x16x48xbf16>
    %44 = vector.extract_strided_slice %43 {offsets = [0, 0, 0], sizes = [16, 16, 48], strides = [1, 1, 1]} : vector<18x16x48xbf16> to vector<16x16x48xbf16>
    %45 = vector.shape_cast %44 : vector<16x16x48xbf16> to vector<256x48xbf16>
    %c0_49 = arith.constant 0 : index
    %c0_50 = arith.constant 0 : index
    %c0_51 = arith.constant 0 : index
    %46 = vector.load %arg4[%c0_49, %c0_50, %c0_51] : memref<3x48x16xbf16, #tpu.memory_space<vmem>>, vector<1x48x16xbf16>
    %47 = vector.shape_cast %46 : vector<1x48x16xbf16> to vector<48x16xbf16>
    %cst_52 = arith.constant dense<0.000000e+00> : vector<256x16xf32>
    %48 = tpu.matmul %45, %47, %cst_52 {dimension_numbers = #tpu.dot_dimension_numbers<[1], [0], [0], [1], [0, 0, 1, 1], [], []>} : vector<256x48xbf16>, vector<48x16xbf16>, vector<256x16xf32> -> vector<256x16xf32>
    %49 = vector.extract_strided_slice %43 {offsets = [1, 0, 0], sizes = [16, 16, 48], strides = [1, 1, 1]} : vector<18x16x48xbf16> to vector<16x16x48xbf16>
    %50 = vector.shape_cast %49 : vector<16x16x48xbf16> to vector<256x48xbf16>
    %c1_53 = arith.constant 1 : index
    %c0_54 = arith.constant 0 : index
    %c0_55 = arith.constant 0 : index
    %51 = vector.load %arg4[%c1_53, %c0_54, %c0_55] : memref<3x48x16xbf16, #tpu.memory_space<vmem>>, vector<1x48x16xbf16>
    %52 = vector.shape_cast %51 : vector<1x48x16xbf16> to vector<48x16xbf16>
    %cst_56 = arith.constant dense<0.000000e+00> : vector<256x16xf32>
    %53 = tpu.matmul %50, %52, %cst_56 {dimension_numbers = #tpu.dot_dimension_numbers<[1], [0], [0], [1], [0, 0, 1, 1], [], []>} : vector<256x48xbf16>, vector<48x16xbf16>, vector<256x16xf32> -> vector<256x16xf32>
    %54 = arith.addf %48, %53 : vector<256x16xf32>
    %55 = vector.extract_strided_slice %43 {offsets = [2, 0, 0], sizes = [16, 16, 48], strides = [1, 1, 1]} : vector<18x16x48xbf16> to vector<16x16x48xbf16>
    %56 = vector.shape_cast %55 : vector<16x16x48xbf16> to vector<256x48xbf16>
    %c2_57 = arith.constant 2 : index
    %c0_58 = arith.constant 0 : index
    %c0_59 = arith.constant 0 : index
    %57 = vector.load %arg4[%c2_57, %c0_58, %c0_59] : memref<3x48x16xbf16, #tpu.memory_space<vmem>>, vector<1x48x16xbf16>
    %58 = vector.shape_cast %57 : vector<1x48x16xbf16> to vector<48x16xbf16>
    %cst_60 = arith.constant dense<0.000000e+00> : vector<256x16xf32>
    %59 = tpu.matmul %56, %58, %cst_60 {dimension_numbers = #tpu.dot_dimension_numbers<[1], [0], [0], [1], [0, 0, 1, 1], [], []>} : vector<256x48xbf16>, vector<48x16xbf16>, vector<256x16xf32> -> vector<256x16xf32>
    %60 = arith.addf %54, %59 : vector<256x16xf32>
    %c3 = arith.constant 3 : index
    %c0_61 = arith.constant 0 : index
    %61 = vector.load %arg5[%c3, %c0_61] : memref<5x16xf32, #tpu.memory_space<vmem>>, vector<1x16xf32>
    %62 = vector.broadcast %61 : vector<1x16xf32> to vector<256x16xf32>
    %63 = arith.addf %60, %62 : vector<256x16xf32>
    %64 = vector.shape_cast %63 : vector<256x16xf32> to vector<16x16x16xf32>
    %cst_62 = arith.constant dense<0.000000e+00> : vector<16x16xf32>
    %65 = vector.multi_reduction <add>, %64, %cst_62 [2] : vector<16x16x16xf32> to vector<16x16xf32>
    %cst_63 = arith.constant dense<0.000000e+00> : vector<16xf32>
    %66 = vector.multi_reduction <add>, %65, %cst_63 [1] : vector<16x16xf32> to vector<16xf32>
    %67 = vector.shape_cast %66 : vector<16xf32> to vector<16x1xf32>
    %cst_64 = arith.constant 3.906250e-03 : f32
    %68 = vector.broadcast %cst_64 : f32 to vector<16x1xf32>
    %69 = arith.mulf %67, %68 : vector<16x1xf32>
    %c0_65 = arith.constant 0 : index
    %c0_66 = arith.constant 0 : index
    %70 = vector.load %arg6[%c0_65, %c0_66] : memref<8x16xf32, #tpu.memory_space<vmem>>, vector<8x16xf32>
    %cst_67 = arith.constant dense<0.000000e+00> : vector<8x1xf32>
    %71 = tpu.matmul %70, %69, %cst_67 {dimension_numbers = #tpu.dot_dimension_numbers<[1], [0], [0], [1], [0, 0, 1, 1], [], []>} : vector<8x16xf32>, vector<16x1xf32>, vector<8x1xf32> -> vector<8x1xf32>
    %c0_68 = arith.constant 0 : index
    %c0_69 = arith.constant 0 : index
    %72 = vector.load %arg7[%c0_68, %c0_69] : memref<8x1xf32, #tpu.memory_space<vmem>>, vector<8x1xf32>
    %73 = arith.addf %71, %72 : vector<8x1xf32>
    %cst_70 = arith.constant 0.000000e+00 : f32
    %74 = vector.broadcast %cst_70 : f32 to vector<8x1xf32>
    %75 = arith.maximumf %73, %74 : vector<8x1xf32>
    %c0_71 = arith.constant 0 : index
    %c0_72 = arith.constant 0 : index
    %76 = vector.load %arg8[%c0_71, %c0_72] : memref<16x8xf32, #tpu.memory_space<vmem>>, vector<16x8xf32>
    %cst_73 = arith.constant dense<0.000000e+00> : vector<16x1xf32>
    %77 = tpu.matmul %76, %75, %cst_73 {dimension_numbers = #tpu.dot_dimension_numbers<[1], [0], [0], [1], [0, 0, 1, 1], [], []>} : vector<16x8xf32>, vector<8x1xf32>, vector<16x1xf32> -> vector<16x1xf32>
    %c0_74 = arith.constant 0 : index
    %c0_75 = arith.constant 0 : index
    %78 = vector.load %arg9[%c0_74, %c0_75] : memref<16x1xf32, #tpu.memory_space<vmem>>, vector<16x1xf32>
    %79 = arith.addf %77, %78 : vector<16x1xf32>
    %cst_76 = arith.constant 0.000000e+00 : f32
    %80 = vector.broadcast %cst_76 : f32 to vector<16x1xf32>
    %81 = arith.subf %80, %79 : vector<16x1xf32>
    %82 = math.exp %81 : vector<16x1xf32>
    %cst_77 = arith.constant 1.000000e+00 : f32
    %83 = vector.broadcast %cst_77 : f32 to vector<16x1xf32>
    %84 = arith.addf %83, %82 : vector<16x1xf32>
    %cst_78 = arith.constant 1.000000e+00 : f32
    %85 = vector.broadcast %cst_78 : f32 to vector<16x1xf32>
    %86 = arith.divf %85, %84 : vector<16x1xf32>
    %87 = vector.shape_cast %86 : vector<16x1xf32> to vector<16x1x1xf32>
    %88 = vector.broadcast %87 : vector<16x1x1xf32> to vector<16x16x16xf32>
    %89 = arith.mulf %64, %88 : vector<16x16x16xf32>
    %c0_79 = arith.constant 0 : index
    %c1_80 = arith.constant 1 : index
    %c0_81 = arith.constant 0 : index
    %c0_82 = arith.constant 0 : index
    %90 = vector.load %arg1[%c0_79, %c1_80, %c0_81, %c0_82] : memref<1x18x16x24xbf16, #tpu.memory_space<vmem>>, vector<1x16x16x24xbf16>
    %91 = vector.shape_cast %90 : vector<1x16x16x24xbf16> to vector<16x16x24xbf16>
    %92 = vector.shape_cast %91 : vector<16x16x24xbf16> to vector<256x24xbf16>
    %c0_83 = arith.constant 0 : index
    %c0_84 = arith.constant 0 : index
    %93 = vector.load %arg3[%c0_83, %c0_84] : memref<24x16xbf16, #tpu.memory_space<vmem>>, vector<24x16xbf16>
    %cst_85 = arith.constant dense<0.000000e+00> : vector<256x16xf32>
    %94 = tpu.matmul %92, %93, %cst_85 {dimension_numbers = #tpu.dot_dimension_numbers<[1], [0], [0], [1], [0, 0, 1, 1], [], []>} : vector<256x24xbf16>, vector<24x16xbf16>, vector<256x16xf32> -> vector<256x16xf32>
    %c4 = arith.constant 4 : index
    %c0_86 = arith.constant 0 : index
    %95 = vector.load %arg5[%c4, %c0_86] : memref<5x16xf32, #tpu.memory_space<vmem>>, vector<1x16xf32>
    %96 = vector.broadcast %95 : vector<1x16xf32> to vector<256x16xf32>
    %97 = arith.addf %94, %96 : vector<256x16xf32>
    %98 = vector.shape_cast %97 : vector<256x16xf32> to vector<16x16x16xf32>
    %99 = arith.addf %89, %98 : vector<16x16x16xf32>
    %cst_87 = arith.constant 0.000000e+00 : f32
    %100 = vector.broadcast %cst_87 : f32 to vector<16x16x16xf32>
    %101 = arith.maximumf %99, %100 : vector<16x16x16xf32>
    %102 = vector.shape_cast %101 : vector<16x16x16xf32> to vector<16x256xf32>
    %c0_88 = arith.constant 0 : index
    %c0_89 = arith.constant 0 : index
    %c0_90 = arith.constant 0 : index
    %103 = vector.load %arg10[%c0_88, %c0_89, %c0_90] : memref<1x16x256xf32, #tpu.memory_space<vmem>>, vector<1x16x256xf32>
    %104 = vector.shape_cast %103 : vector<1x16x256xf32> to vector<16x256xf32>
    %105 = vector.shape_cast %102 : vector<16x256xf32> to vector<1x16x256xf32>
    tpu.vector_store %arg10[%c0_88, %c0_89, %c0_90], %105 {strides = array<i32>} : memref<1x16x256xf32, #tpu.memory_space<vmem>>, vector<1x16x256xf32>,
    return
  }
  func.func @transform_0(%arg0: i32) -> (i32, i32, i32, i32) {
    %c0_i32 = arith.constant 0 : i32
    %c0_i32_0 = arith.constant 0 : i32
    %c0_i32_1 = arith.constant 0 : i32
    %c0_i32_2 = arith.constant 0 : i32
    return %arg0, %c0_i32, %c0_i32_0, %c0_i32_1 : i32, i32, i32, i32
  }
  func.func @transform_1(%arg0: i32) -> (i32, i32, i32) {
    %c0_i32 = arith.constant 0 : i32
    %c0_i32_0 = arith.constant 0 : i32
    %c0_i32_1 = arith.constant 0 : i32
    %c0_i32_2 = arith.constant 0 : i32
    return %c0_i32, %c0_i32_0, %c0_i32_1 : i32, i32, i32
  }
  func.func @transform_2(%arg0: i32) -> (i32, i32) {
    %c0_i32 = arith.constant 0 : i32
    %c0_i32_0 = arith.constant 0 : i32
    %c0_i32_1 = arith.constant 0 : i32
    return %c0_i32, %c0_i32_0 : i32, i32
  }
  func.func @transform_3(%arg0: i32) -> (i32, i32, i32) {
    %c0_i32 = arith.constant 0 : i32
    %c0_i32_0 = arith.constant 0 : i32
    %c0_i32_1 = arith.constant 0 : i32
    %c0_i32_2 = arith.constant 0 : i32
    return %c0_i32, %c0_i32_0, %c0_i32_1 : i32, i32, i32
  }
  func.func @transform_4(%arg0: i32) -> (i32, i32) {
    %c0_i32 = arith.constant 0 : i32
    %c0_i32_0 = arith.constant 0 : i32
    %c0_i32_1 = arith.constant 0 : i32
    return %c0_i32, %c0_i32_0 : i32, i32
  }
  func.func @transform_5(%arg0: i32) -> (i32, i32) {
    %c0_i32 = arith.constant 0 : i32
    %c0_i32_0 = arith.constant 0 : i32
    %c0_i32_1 = arith.constant 0 : i32
    return %c0_i32, %c0_i32_0 : i32, i32
  }
  func.func @transform_6(%arg0: i32) -> (i32, i32) {
    %c0_i32 = arith.constant 0 : i32
    %c0_i32_0 = arith.constant 0 : i32
    %c0_i32_1 = arith.constant 0 : i32
    return %c0_i32, %c0_i32_0 : i32, i32
  }
  func.func @transform_7(%arg0: i32) -> (i32, i32) {
    %c0_i32 = arith.constant 0 : i32
    %c0_i32_0 = arith.constant 0 : i32
    %c0_i32_1 = arith.constant 0 : i32
    return %c0_i32, %c0_i32_0 : i32, i32
  }
  func.func @transform_8(%arg0: i32) -> (i32, i32) {
    %c0_i32 = arith.constant 0 : i32
    %c0_i32_0 = arith.constant 0 : i32
    %c0_i32_1 = arith.constant 0 : i32
    return %c0_i32, %c0_i32_0 : i32, i32
  }
  func.func @transform_9(%arg0: i32) -> (i32, i32, i32) {
    %c0_i32 = arith.constant 0 : i32
    %c0_i32_0 = arith.constant 0 : i32
    %c0_i32_1 = arith.constant 0 : i32
    return %arg0, %c0_i32, %c0_i32_0 : i32, i32, i32
  }
}

</mosaic_0001>

<bundles_post_ra>
// kernel: tpu_custom_call.1
= control target key start
LH: loop header
LB: loop body
LE: loop exit
PB: predicated region body
PF: predicated region fallthrough
CT: control target
= control target key end

     0   :  { %14 = vsyncpa [#allocation4], 0  ;;  %s8801_s0 = inlined_call_operand.hbm [shape: bf16[2,18,16,24], index: 0, kind: input, shape index: {}]   ;;  %s8802_s1 = inlined_call_operand.vmem [shape: bf16[3,24,16], index: 1, kind: input, shape index: {}]   ;;  %s8803_s2 = inlined_call_operand.vmem [shape: bf16[24,16], index: 2, kind: input, shape index: {}]   ;;  %s8804_s3 = inlined_call_operand.vmem [shape: bf16[3,48,16], index: 3, kind: input, shape index: {}]   ;;  %s8805_s4 = inlined_call_operand.vmem [shape: f32[5,16], index: 4, kind: input, shape index: {}]   ;;  %s8806_s5 = inlined_call_operand.vmem [shape: f32[8,16], index: 5, kind: input, shape index: {}]   ;;  %s8807_s6 = inlined_call_operand.vmem [shape: f32[8,1], index: 6, kind: input, shape index: {}]   ;;  %s8808_s7 = inlined_call_operand.vmem [shape: f32[16,8], index: 7, kind: input, shape index: {}]   ;;  %s8809_s8 = inlined_call_operand.vmem [shape: f32[16,1], index: 8, kind: input, shape index: {}]   ;;  %s8810_s9 = inlined_call_operand.hbm [shape: f32[2,16,256], index: 9, kind: output, shape index: {}]  }
   0x1   :  { %16 = vsyncpa [#allocation4 + $0x1], 0 }
   0x2   :  { %17 = vsyncpa [#allocation5], 0 }
   0x3   :  { %19 = vsyncpa [#allocation5 + $0x1], 0  ;;  %s6688_s30 = smov 0   ;;  %s6690_s10 = smov 0  }
   0x4   :  { %s6692_s11 = smov 0   ;;  %s6694_s12 = smov 0  }
   0x5 LB: > { %8863 = sst [smem:[#allocation9_spill]] %s6614_s11  ;;  %s6709_s13 = sadd.s32 4294967295, %s6618_s12   ;;  %s6618_s12 = sphi %s6694_s12, %s8961_s12   ;;  %s6614_s11 = sphi %s6692_s11, %s8958_s11   ;;  %s6610_s10 = sphi %s6690_s10, %s8960_s10   ;;  %s6606_s30 = sphi %s6688_s30, %s8959_s30  }
   0x6   : > { %s5456_s14 = sadd.s32 4294967294, %s6618_s12   ;;  %s6713_s15 = sadd.s32 1, %s6618_s12  }
   0x7   : > { %s32_s16 = sadd.s32 1, %s6614_s11  ;;  %s29_s17 = ssub.s32 %s6618_s12, %s6713_s15 }
   0x8   : > { %p39_p0 = scmp.ne.s32.totalorder %s6614_s11, %s6610_s10  ;;  %p30_p1 = scmp.eq.s32.totalorder %s29_s17, 0 }
   0x9   : > { %p40_p2 = scmp.eq.s32.totalorder %s6618_s12, 0  ;;  %p45_p3 = scmp.ne.s32.totalorder %s6610_s10, %s6606_s30 }
   0xa   : > { %p46_p4 = scmp.eq.s32.totalorder %s6709_s13, 0  ;;  %p237_p7 = scmp.eq.s32.totalorder %s6709_s13, 1 }
   0xb   : > { %s6725_s18 = scalar_select %p30_p1, %s6614_s11, %s32_s16  }
   0xc   : > { %p41_p5 = por %p40_p2, %p39_p0  ;;  %p6727_p6 = por %p46_p4, %p45_p3 }
   0xd   : > { %8864 = sst [smem:[#allocation10_spill]] %s6725_s18  ;;  %p243_p8 = scmp.eq.s32.totalorder %s5456_s14, 1 }
   0xe   : > { %s8865_s19 = scalar_select %p6727_p6, 1, 0 }
   0xf   : > { %p6348_p10 = scmp.lt.s32.totalorder %s6618_s12, 2  ;;  %p6734_p11 = por %p237_p7, %p39_p0 }
  0x10   : > { %p6738_p12 = por %p243_p8, %p45_p3  ;;  %s287_s22 = sand.u32 1, %s6614_s11  }
  0x11   : > { %s8866_s20 = scalar_select %p6734_p11, 1, 0 }
  0x12   : > { %s8867_s21 = scalar_select %p6738_p12, 1, 0 }
  0x13   : > { %s6334_s23 = smul.u32 2304, %s6618_s12  ;;  %p6749_p13 = pnand %p6348_p10, %p41_p5 }
  0x14   : > { %s6333_s24 = smul.u32 144, %s287_s22  ;;  %s6755_s16 = scalar_lea.sflag [#allocation4], %s287_s22 }
  0x15   : > { %s6747_s27 = scalar_lea.hbm %s8801_s0, %s6334_s23  ;;  %p6528_p1 = pneg %p6749_p13 }
  0x16   : > { %s291_s29 = scalar_lea.vmem [#allocation3], %s6333_s24  ;;  %s6526_s17 = scalar_lea.hbm %s6747_s27, 2304 }
  0x17   : > { %s298_s14 = sshll.u32 %s291_s29, 4  ;;  %p6527_p0 = scmp.ne.s32.totalorder %s6747_s27, %s6526_s17  ;;  %s6753_s14 = int_to_ptr.vmem [resolvable:$true] %s298_s14 }
  0x18   : > { %s6531_s26 = scalar_lea.hbm %s8801_s0, 4608  ;;  %p6532_p4 = scmp.lt.s32.totalorder %s6747_s27, %s8801_s0 }
  0x19   : > { %p6529_p2 = pnand %p6528_p1, %p6527_p0  ;;  %p6533_p5 = scmp.lt.s32.totalorder %s6531_s26, %s6526_s17 }
  0x1b   : > { %p6530_p3 = pneg %p6529_p2  ;;  %p6534_p7 = por %p6533_p5, %p6532_p4 }
  0x1d   : > { %p6535_p8 = pnand %p6534_p7, %p6530_p3 }
  0x1f   : > { %6538 = shalt.err (!%p6535_p8)
}
  0x20   : > { %s6539_s22 = scalar_lea.vmem %s6753_s14, 2304  ;;  %s6620_s24 = smov [#allocation3]  }
  0x21   : > { %p6540_p10 = scmp.ne.s32.totalorder %s6753_s14, %s6539_s22  ;;  %s6544_s29 = sshll.u32 %s6620_s24, 4  ;;  %s6545_s29 = int_to_ptr.vmem [resolvable:$false] %s6544_s29 }
  0x22   : > { %s6546_s23 = scalar_lea.vmem %s6545_s29, 4608  ;;  %p6547_p2 = scmp.lt.s32.totalorder %s6753_s14, %s6545_s29 }
  0x23   : > { %p6542_p9 = pnand %p6540_p10, %p6528_p1  ;;  %p6548_p12 = scmp.lt.s32.totalorder %s6546_s23, %s6539_s22 }
  0x25   : > { %p6543_p0 = pneg %p6542_p9  ;;  %p6549_p11 = por %p6548_p12, %p6547_p2 }
  0x27   : > { %p6550_p6 = pnand %p6549_p11, %p6543_p0 }
  0x29   : > { %6553 = shalt.err (!%p6550_p6)
}
  0x2a   : > { %s6621_s11 = smov 64   ;;  %s6622_s18 = smov 4  }
  0x2b   : > { %6343 = dma.hbm_to_vmem [thread:$0]  (!%p6749_p13), %s6747_s27, 2304, %s6753_s14, %s6755_s16, %s6621_s11, %s6621_s11, %s6622_s18  }
  0x2c   : > { %p5460_p9 = scmp.ge.s32.totalorder %s6618_s12, 1  ;;  %p306_p1 = scmp.lt.s32.totalorder %s6618_s12, 3 }
  0x2e   : > { %p307_p3 = pnand %p5460_p9, %p306_p1 }
  0x30   : > { %310 = sbr.rel (%p307_p3) target bundleno = 1920 (0x780), region = 56 }
  0x35   : > { %s6779_s17 = sand.u32 1, %s6610_s10   ;;  %p8869_p6 = scmp.ne.s32.totalorder %s8865_s19, 0 }
  0x36   : > { %s6335_s25 = smul.u32 144, %s6779_s17  ;;  %s313_s26 = scalar_lea.sflag [#allocation4], %s6779_s17 }
  0x38   : > { %s6783_s22 = scalar_lea.vmem [#allocation3], %s6335_s25 }
  0x39   : > { %6597 = dma.done.wait (%p8869_p6), %s313_s26, 2304  }
  0x3a   : > { %6599 = vsyncadd (%p8869_p6), %s313_s26, 4294964992  ;;  %vm562_vm0 = vcmask 1043456   ;;  %v6400_v0 = vld [vmem:[%s8802_s1 + $0x14] ss:$0 sps:$4 sm:$0xff]   ;;  %v6401_v1 = vld [vmem:[%s8802_s1 + $0xc] sm:$0xff]   ;;  %vm513_vm1 = vcmask 195584  }
  0x3b   : > { %6328 = vmatprep.subr.msk.bf16.mxu0 %vm562_vm0, %v6400_v0  ;;  %6329 = vmatprep.subr.msk.bf16.mxu1 %vm562_vm0, %v6400_v0  ;;  %v564_v2 = vsel %vm562_vm0, %v6400_v0, 0  ;;  %v6402_v3 = vld [vmem:[%s6783_s22 + $0x8] sm:$0xff]   ;;  %v6404_v5 = vld [vmem:[%s6783_s22 + $0x10] sm:$0xff]   ;;  %v6406_v7 = vld [vmem:[%s6783_s22 + $0x18] sm:$0xff]   ;;  %vm1546_vm2 = vcmask 122880   ;;  %vm1561_vm5 = vcmask 125955  }
  0x3c   : > { %6055 = vmatpush3.bf16.msra.mxu0 %v564_v2  ;;  %6326 = vmatpush3.bf16.msra.mxu1 %v564_v2  ;;  %v6403_v4 = vld [vmem:[%s6783_s22 + $0x48] sm:$0xff]   ;;  %v6405_v6 = vld [vmem:[%s6783_s22 + $0x50] sm:$0xff]   ;;  %v6407_v8 = vld [vmem:[%s6783_s22 + $0x58] sm:$0xff]   ;;  %vm1547_vm3 = vsmask.f32 256  ;;  %vm1541_vm8 = vcmask 125952  }
  0x3d   : > { %6056 = vmatprep.subr.bf16.mxu0 %v6401_v1  ;;  %6325 = vmatprep.subr.bf16.mxu1 %v6401_v1  ;;  %v6408_v9 = vld [vmem:[%s6783_s22 + $0x20] sm:$0xff]   ;;  %v6410_v11 = vld [vmem:[%s6783_s22 + $0x28] sm:$0xff]   ;;  %v6412_v16 = vld [vmem:[%s6783_s22 + $0x30] sm:$0xff]   ;;  %vm1562_vm6 = vsmask.f32 7950  ;;  %vm2288_vm9 = vcmask 1042432  }
  0x3e   : > { %6058 = vmatprep.mubr.msk.bf16.mxu0 %vm513_vm1, %v6402_v3  ;;  %6074 = vmatprep.mubr.msk.bf16.mxu1 %vm513_vm1, %v6403_v4  ;;  %v6409_v10 = vld [vmem:[%s6783_s22 + $0x60] sm:$0xff]   ;;  %v6411_v12 = vld [vmem:[%s6783_s22 + $0x68] sm:$0xff]   ;;  %v6413_v17 = vld [vmem:[%s6783_s22 + $0x70] sm:$0xff]   ;;  %s6624_s29 = smov 32   ;;  %s6625_s28 = smov 16   ;;  %vm2415_vm10 = vcmask 130048  }
  0x3f   : > { %v6418_v13 = vld [vmem:[%s8802_s1 + $0x8] ss:$0 sps:$4 sm:$0xff]   ;;  %v6419_v14 = vld [vmem:[%s8802_s1 + $0x20] ss:$0 sps:$4 sm:$0xff]   ;;  %v6421_v20 = vld [vmem:[%s8802_s1 + $0x18] sm:$0xff]   ;;  %vm2506_vm11 = vcmask 261120  }
  0x40   : > { %6057 = vmatpush3.bf16.msra.mxu0 %v6401_v1  ;;  %6327 = vmatpush3.bf16.msra.mxu1 %v6401_v1  ;;  %v6420_v15 = vld [vmem:[%s8802_s1] sm:$0xff]   ;;  %v865_v18 = vsel %vm562_vm0, %v6418_v13, 0  ;;  %v1203_v19 = vsel %vm562_vm0, %v6419_v14, 0  ;;  %v6416_v23 = vld [vmem:[%s6783_s22 + $0x40] sm:$0xff]   ;;  %v6423_v26 = vld [vmem:[%s6783_s22 + $0x10] sm:$0xff]   ;;  %vm2866_vm13 = vcmask 392192  }
  0x41   : > { %6330 = vmatprep.subr.msk.bf16.mxu1 %vm562_vm0, %v6418_v13  ;;  %6331 = vmatprep.subr.msk.bf16.mxu0 %vm562_vm0, %v6419_v14  ;;  %v6414_v21 = vld [vmem:[%s6783_s22 + $0x38] sm:$0xff]   ;;  %v6417_v24 = vld [vmem:[%s6783_s22 + $0x80] sm:$0xff]   ;;  %v6424_v27 = vld [vmem:[%s6783_s22 + $0x8] sm:$0xff]   ;;  %vm2579_vm12 = vsmask.f32 4352  ;;  %vm3670_vm14 = vcmask 130112  }
  0x42   : > { %v6415_v22 = vld [vmem:[%s6783_s22 + $0x78] sm:$0xff]   ;;  %v6422_v25 = vld [vmem:[%s6783_s22] sm:$0xff]   ;;  %v6426_v29 = vld [vmem:[%s6783_s22 + $0x10] sm:$0xff]   ;;  %vm3807_vm15 = vcmask 1041409   ;;  %s6632_s16 = smov 64   ;;  %s6633_s19 = smov 80  }
  0x43   : > { %6059 = vmatmul.mubr.msk.bf16.vlgmr.msra.gmra.mxu0 %vm513_vm1, %v6404_v5  ;;  %6075 = vmatmul.mubr.msk.bf16.vlgmr.msra.gmra.mxu1 %vm513_vm1, %v6405_v6  ;;  %v6425_v28 = vld [vmem:[%s6783_s22 + $0x18] sm:$0xff]   ;;  %v6427_v30 = vld [vmem:[%s6783_s22 + $0x20] sm:$0xff]   ;;  %v6429_v32 = vld [vmem:[%s6783_s22 + $0x28] sm:$0xff]   ;;  %s6634_s24 = smov 96   ;;  %s6635_s23 = smov 112  }
  0x44   : > { %6062 = vmatprep.mubr.msk.bf16.mxu0 %vm513_vm1, %v6406_v7  ;;  %6078 = vmatprep.mubr.msk.bf16.mxu1 %vm513_vm1, %v6407_v8  ;;  %v6428_v31 = vld [vmem:[%s6783_s22 + $0x18] sm:$0xff]   ;;  %v6430_v33 = vld [vmem:[%s6783_s22 + $0x20] sm:$0xff]   ;;  %v6432_v34 = vld [vmem:[%s6783_s22 + $0x30] sm:$0xff]   ;;  %s5461_s11 = sshll.u32 %s6779_s17, 5  ;;  %s5918_s25 = sshll.u32 %s6709_s13, 9 }
  0x45   : > { %6091 = vmatpush3.bf16.msra.mxu1 %v865_v18  ;;  %6127 = vmatpush3.bf16.msra.mxu0 %v1203_v19  ;;  %v6431_v35 = vld [vmem:[%s6783_s22 + $0x28] sm:$0xff]   ;;  %v6433_v36 = vld [vmem:[%s6783_s22 + $0x38] sm:$0xff]   ;;  %v6434_v37 = vld [vmem:[%s6783_s22 + $0x30] sm:$0xff]   ;;  %s350_s18 = scalar_lea.vmem [#allocation6], %s5461_s11  ;;  %s8756_s27 = scalar_lea.hbm %s8810_s9, %s5918_s25 }
  0x46   : > { %6092 = vmatprep.subr.bf16.mxu1 %v6420_v15  ;;  %6128 = vmatprep.subr.bf16.mxu0 %v6421_v20  ;;  %v6436_v38 = vld [vmem:[%s6783_s22 + $0x40] sm:$0xff]   ;;  %v6435_v39 = vld [vmem:[%s6783_s22 + $0x38] sm:$0xff]   ;;  %v6437_v40 = vld [vmem:[%s6783_s22 + $0x48] sm:$0xff]   ;;  %s5370_s14 = scalar_lea.sflag [#allocation5], %s6779_s17  ;;  %p8954_p12 = scmp.ne.s32.totalorder %s8866_s20, 0 }
  0x47   : > { %v6438_v41 = vld [vmem:[%s6783_s22 + $0x40] sm:$0xff]   ;;  %v6440_v42 = vld [vmem:[%s6783_s22 + $0x50] sm:$0xff]   ;;  %v6439_v43 = vld [vmem:[%s6783_s22 + $0x48] sm:$0xff]  }
  0x48   : > { %v6441_v44 = vld [vmem:[%s6783_s22 + $0x58] sm:$0xff]   ;;  %v6442_v45 = vld [vmem:[%s6783_s22 + $0x50] sm:$0xff]   ;;  %v6444_v46 = vld [vmem:[%s6783_s22 + $0x60] sm:$0xff]  }
  0x49   : > { %6093 = vmatpush3.bf16.msra.mxu1 %v6420_v15  ;;  %6129 = vmatpush3.bf16.msra.mxu0 %v6421_v20  ;;  %v6443_v47 = vld [vmem:[%s6783_s22 + $0x58] sm:$0xff]   ;;  %v6445_v48 = vld [vmem:[%s6783_s22 + $0x68] sm:$0xff]   ;;  %v6446_v49 = vld [vmem:[%s6783_s22 + $0x60] sm:$0xff]  }
  0x4a   : > { %v6448_v50 = vld [vmem:[%s6783_s22 + $0x70] sm:$0xff]   ;;  %v6447_v51 = vld [vmem:[%s6783_s22 + $0x68] sm:$0xff]   ;;  %v6449_v52 = vld [vmem:[%s6783_s22 + $0x78] sm:$0xff]  }
  0x4b   : > { %6063 = vmatmul.mubr.msk.bf16.gmra.mxu0 %vm513_vm1, %v6408_v9  ;;  %6079 = vmatmul.mubr.msk.bf16.gmra.mxu1 %vm513_vm1, %v6409_v10  ;;  %v6450_v53 = vld [vmem:[%s6783_s22 + $0x70] sm:$0xff]   ;;  %v6452_v54 = vld [vmem:[%s6783_s22 + $0x80] sm:$0xff]   ;;  %v6451_v55 = vld [vmem:[%s6783_s22 + $0x78] sm:$0xff]  }
  0x4c   : > { %6066 = vmatprep.mubr.msk.bf16.mxu0 %vm513_vm1, %v6410_v11  ;;  %6082 = vmatprep.mubr.msk.bf16.mxu1 %vm513_vm1, %v6411_v12  ;;  %v6453_v56 = vld [vmem:[%s6783_s22 + $0x88] sm:$0xff]   ;;  %vm6910_vm4 = vmand %vm1546_vm2, %vm1547_vm3  ;;  %v1615_v58 = vld [vmem:[#allocation2 + $0x38] sm:$0x1]  ;;  %vm3809_vm2 = vcmask 1042434   ;;  %vm3811_vm3 = vcmask 1043459  }
  0x4d   : > { %v1616_v59 = vsel %vm6910_vm4, 0, %v1615_v58  ;;  %v1612_v60 = vld [vmem:[#allocation2 + $0x24] sm:$0x1]  ;;  %v1621_v62 = vld [vmem:[#allocation2 + $0x60] sm:$0x1]  ;;  %vm6920_vm7 = vmand %vm1561_vm5, %vm1562_vm6  ;;  %vm3815_vm5 = vcmask 1045509  }
  0x4e   : > { %1617 = vst [vmem:[#allocation2 + $0x38] sm:$0x1] %v1616_v59  ;;  %v1613_v61 = vsel %vm6910_vm4, 0, %v1612_v60  ;;  %v1622_v63 = vsel %vm6910_vm4, 0, %v1621_v62  ;;  %v1618_v1 = vld [vmem:[#allocation2 + $0x4c] sm:$0x1] }
  0x4f   : > { %1614 = vst [vmem:[#allocation2 + $0x24] sm:$0x1] %v1613_v61  ;;  %1623 = vst [vmem:[#allocation2 + $0x60] sm:$0x1] %v1622_v63  ;;  %v1567_v2 = vld [vmem:[#allocation2 + $0x2c] sm:$0x8] }
  0x50   : > { %v1619_v3 = vsel %vm6910_vm4, 0, %v1618_v1  ;;  %v1568_v4 = vsel %vm6920_vm7, 0, %v1567_v2  ;;  %v1627_v5 = vld [vmem:[#allocation2 + $0x88] sm:$0x1]  ;;  %v1624_v7 = vld [vmem:[#allocation2 + $0x74] sm:$0x1] }
  0x51   : > { %1620 = vst [vmem:[#allocation2 + $0x4c] sm:$0x1] %v1619_v3  ;;  %1569 = vst [vmem:[#allocation2 + $0x2c] sm:$0x8] %v1568_v4  ;;  %v1628_v6 = vsel %vm6910_vm4, 0, %v1627_v5  ;;  %v1625_v8 = vsel %vm6910_vm4, 0, %v1624_v7 }
  0x52   : > { %1629 = vst [vmem:[#allocation2 + $0x88] sm:$0x1] %v1628_v6  ;;  %1626 = vst [vmem:[#allocation2 + $0x74] sm:$0x1] %v1625_v8  ;;  %v1633_v9 = vld [vmem:[#allocation2 + $0xb0] sm:$0x1] }
  0x53   : > { %6067 = vmatmul.mubr.msk.bf16.gmra.mxu0 %vm513_vm1, %v6412_v16  ;;  %6083 = vmatmul.mubr.msk.bf16.gmra.mxu1 %vm513_vm1, %v6413_v17  ;;  %v1634_v10 = vsel %vm6910_vm4, 0, %v1633_v9  ;;  %v1630_v11 = vld [vmem:[#allocation2 + $0x9c] sm:$0x1]  ;;  %v1639_v13 = vld [vmem:[#allocation2 + $0xd8] sm:$0x1]  ;;  %vm3817_vm6 = vcmask 1046534  }
  0x54   : > { %6070 = vmatprep.mubr.msk.bf16.mxu0 %vm513_vm1, %v6414_v21  ;;  %6086 = vmatprep.mubr.msk.bf16.mxu1 %vm513_vm1, %v6415_v22  ;;  %1635 = vst [vmem:[#allocation2 + $0xb0] sm:$0x1] %v1634_v10  ;;  %v1631_v12 = vsel %vm6910_vm4, 0, %v1630_v11  ;;  %v1640_v14 = vsel %vm6910_vm4, 0, %v1639_v13  ;;  %v1636_v15 = vld [vmem:[#allocation2 + $0xc4] sm:$0x1] }
  0x55   : > { %1632 = vst [vmem:[#allocation2 + $0x9c] sm:$0x1] %v1631_v12  ;;  %1641 = vst [vmem:[#allocation2 + $0xd8] sm:$0x1] %v1640_v14  ;;  %v1637_v16 = vsel %vm6910_vm4, 0, %v1636_v15 }
  0x56   : > { %1638 = vst [vmem:[#allocation2 + $0xc4] sm:$0x1] %v1637_v16  ;;  %v1645_v17 = vld [vmem:[#allocation2 + $0x100] sm:$0x1]  ;;  %v1642_v19 = vld [vmem:[#allocation2 + $0xec] sm:$0x1] }
  0x57   : > { %v1646_v18 = vsel %vm6910_vm4, 0, %v1645_v17  ;;  %v1643_v20 = vsel %vm6910_vm4, 0, %v1642_v19  ;;  %v1564_v21 = vld [vmem:[#allocation2 + $0x18] sm:$0x8]  ;;  %v1585_v58 = vld [vmem:[#allocation2 + $0xa4] sm:$0x8] }
  0x58   : > { %1647 = vst [vmem:[#allocation2 + $0x100] sm:$0x1] %v1646_v18  ;;  %1644 = vst [vmem:[#allocation2 + $0xec] sm:$0x1] %v1643_v20  ;;  %v1565_v22 = vsel %vm6920_vm7, 0, %v1564_v21  ;;  %v1586_v62 = vsel %vm6920_vm7, 0, %v1585_v58 }
  0x59   : > { %1566 = vst [vmem:[#allocation2 + $0x18] sm:$0x8] %v1565_v22  ;;  %v1582_v61 = vld [vmem:[#allocation2 + $0x90] sm:$0x8]  ;;  %1587 = vst [vmem:[#allocation2 + $0xa4] sm:$0x8] %v1586_v62 }
  0x5a   : > { %v1583_v63 = vsel %vm6920_vm7, 0, %v1582_v61  ;;  %v1591_v7 = vld [vmem:[#allocation2 + $0xcc] sm:$0x8]  ;;  %v1588_v11 = vld [vmem:[#allocation2 + $0xb8] sm:$0x8] }
  0x5b   : > { %6071 = vmatmul.mubr.msk.bf16.gmra.mxu0 %vm513_vm1, %v6416_v23  ;;  %6087 = vmatmul.mubr.msk.bf16.gmra.mxu1 %vm513_vm1, %v6417_v24  ;;  %v1651_v23 = vld [vmem:[#allocation2 + $0x128] sm:$0x1]  ;;  %1584 = vst [vmem:[#allocation2 + $0x90] sm:$0x8] %v1583_v63  ;;  %v1592_v8 = vsel %vm6920_vm7, 0, %v1591_v7  ;;  %v1589_v12 = vsel %vm6920_vm7, 0, %v1588_v11 }
  0x5c   : > { %6094 = vmatprep.mubr.msk.bf16.mxu1 %vm513_vm1, %v6422_v25  ;;  %6130 = vmatprep.mubr.msk.bf16.mxu0 %vm513_vm1, %v6423_v26  ;;  %v1652_v24 = vsel %vm6910_vm4, 0, %v1651_v23  ;;  %1593 = vst [vmem:[#allocation2 + $0xcc] sm:$0x8] %v1592_v8  ;;  %1590 = vst [vmem:[#allocation2 + $0xb8] sm:$0x8] %v1589_v12 }
  0x5d   : > { %1653 = vst [vmem:[#allocation2 + $0x128] sm:$0x1] %v1652_v24  ;;  %v1597_v19 = vld [vmem:[#allocation2 + $0xf4] sm:$0x8]  ;;  %v7040_v22 = vld [vmem:[%s8805_s4] ss:$0 sm:$0xff] }
  0x5e   : > { %v1598_v21 = vsel %vm6920_vm7, 0, %v1597_v19  ;;  %v7059_v62 = vld [vmem:[#allocation2 + $0x38] ss:$0 sps:$4 sm:$0x11]   ;;  %v1603_v63 = vld [vmem:[#allocation2 + $0x11c] sm:$0x8] }
  0x5f   : > { %1599 = vst [vmem:[#allocation2 + $0xf4] sm:$0x8] %v1598_v21  ;;  %v1600_v21 = vld [vmem:[#allocation2 + $0x108] sm:$0x8] }
  0x63   : > { %6095 = vmatmul.mubr.msk.bf16.vlgmr.msra.gmra.mxu1 %vm513_vm1, %v6424_v27  ;;  %6131 = vmatmul.mubr.msk.bf16.vlgmr.msra.gmra.mxu0 %vm513_vm1, %v6425_v28  ;;  %v1648_v27 = vld [vmem:[#allocation2 + $0x114] sm:$0x1]  ;;  %v1573_v28 = vld [vmem:[#allocation2 + $0x54] sm:$0x8] }
  0x64   : > { %6098 = vmatprep.mubr.msk.bf16.mxu1 %vm513_vm1, %v6426_v29  ;;  %6134 = vmatprep.mubr.msk.bf16.mxu0 %vm513_vm1, %v6427_v30 }
  0x6b   : > { %6099 = vmatmul.mubr.msk.bf16.gmra.mxu1 %vm513_vm1, %v6428_v31  ;;  %6135 = vmatmul.mubr.msk.bf16.gmra.mxu0 %vm513_vm1, %v6429_v32  ;;  %v1649_v31 = vsel %vm6910_vm4, 0, %v1648_v27  ;;  %v1570_v32 = vld [vmem:[#allocation2 + $0x40] sm:$0x8] }
  0x6c   : > { %6102 = vmatprep.mubr.msk.bf16.mxu1 %vm513_vm1, %v6430_v33  ;;  %6138 = vmatprep.mubr.msk.bf16.mxu0 %vm513_vm1, %v6432_v34  ;;  %v1574_v33 = vsel %vm6920_vm7, 0, %v1573_v28  ;;  %1650 = vst [vmem:[#allocation2 + $0x114] sm:$0x1] %v1649_v31  ;;  %v1571_v34 = vsel %vm6920_vm7, 0, %v1570_v32  ;;  %v1594_v27 = vld [vmem:[#allocation2 + $0xe0] sm:$0x8] }
  0x6d   : > { %1575 = vst [vmem:[#allocation2 + $0x54] sm:$0x8] %v1574_v33  ;;  %1572 = vst [vmem:[#allocation2 + $0x40] sm:$0x8] %v1571_v34  ;;  %v1595_v32 = vsel %vm6920_vm7, 0, %v1594_v27 }
  0x6e   : > { %1596 = vst [vmem:[#allocation2 + $0xe0] sm:$0x8] %v1595_v32 }
  0x73   : > { %6103 = vmatmul.mubr.msk.bf16.gmra.mxu1 %vm513_vm1, %v6431_v35  ;;  %6139 = vmatmul.mubr.msk.bf16.gmra.mxu0 %vm513_vm1, %v6433_v36 }
  0x74   : > { %6106 = vmatprep.mubr.msk.bf16.mxu1 %vm513_vm1, %v6434_v37  ;;  %6142 = vmatprep.mubr.msk.bf16.mxu0 %vm513_vm1, %v6436_v38 }
  0x7b   : > { %6107 = vmatmul.mubr.msk.bf16.gmra.mxu1 %vm513_vm1, %v6435_v39  ;;  %6143 = vmatmul.mubr.msk.bf16.gmra.mxu0 %vm513_vm1, %v6437_v40  ;;  %v1657_v39 = vld [vmem:[#allocation2 + $0x150] sm:$0x1] }
  0x7c   : > { %6110 = vmatprep.mubr.msk.bf16.mxu1 %vm513_vm1, %v6438_v41  ;;  %6146 = vmatprep.mubr.msk.bf16.mxu0 %vm513_vm1, %v6440_v42  ;;  %v1658_v40 = vsel %vm6910_vm4, 0, %v1657_v39 }
  0x7d   : > { %1659 = vst [vmem:[#allocation2 + $0x150] sm:$0x1] %v1658_v40 }
  0x83   : > { %6111 = vmatmul.mubr.msk.bf16.gmra.mxu1 %vm513_vm1, %v6439_v43  ;;  %6147 = vmatmul.mubr.msk.bf16.gmra.mxu0 %vm513_vm1, %v6441_v44  ;;  %v1654_v43 = vld [vmem:[#allocation2 + $0x13c] sm:$0x1]  ;;  %v1579_v44 = vld [vmem:[#allocation2 + $0x7c] sm:$0x8] }
  0x84   : > { %6114 = vmatprep.mubr.msk.bf16.mxu1 %vm513_vm1, %v6442_v45  ;;  %6150 = vmatprep.mubr.msk.bf16.mxu0 %vm513_vm1, %v6444_v46  ;;  %v1655_v45 = vsel %vm6910_vm4, 0, %v1654_v43  ;;  %v1580_v46 = vsel %vm6920_vm7, 0, %v1579_v44  ;;  %v7050_v43 = vld [vmem:[%s8805_s4 + $0x1] ss:$0 sm:$0xff] }
  0x85   : > { %1656 = vst [vmem:[#allocation2 + $0x13c] sm:$0x1] %v1655_v45  ;;  %1581 = vst [vmem:[#allocation2 + $0x7c] sm:$0x8] %v1580_v46 }
  0x8b   : > { %6115 = vmatmul.mubr.msk.bf16.gmra.mxu1 %vm513_vm1, %v6443_v47  ;;  %6151 = vmatmul.mubr.msk.bf16.gmra.mxu0 %vm513_vm1, %v6445_v48 }
  0x8c   : > { %6118 = vmatprep.mubr.msk.bf16.mxu1 %vm513_vm1, %v6446_v49  ;;  %6154 = vmatprep.mubr.msk.bf16.mxu0 %vm513_vm1, %v6448_v50  ;;  %v1576_v49 = vld [vmem:[#allocation2 + $0x68] sm:$0x8] }
  0x93   : > { %6119 = vmatmul.mubr.msk.bf16.gmra.mxu1 %vm513_vm1, %v6447_v51  ;;  %6155 = vmatmul.mubr.msk.bf16.gmra.mxu0 %vm513_vm1, %v6449_v52  ;;  %v1577_v52 = vsel %vm6920_vm7, 0, %v1576_v49 }
  0x94   : > { %6122 = vmatprep.mubr.msk.bf16.mxu1 %vm513_vm1, %v6450_v53  ;;  %6158 = vmatprep.mubr.msk.bf16.mxu0 %vm513_vm1, %v6452_v54  ;;  %1578 = vst [vmem:[#allocation2 + $0x68] sm:$0x8] %v1577_v52 }
  0x9b   : > { %6123 = vmatmul.mubr.msk.bf16.gmra.mxu1 %vm513_vm1, %v6451_v55  ;;  %6159 = vmatmul.mubr.msk.bf16.gmra.mxu0 %vm513_vm1, %v6453_v56 }
 0x103   : > { %v6948_v25 = vpop.f32.mrf.mxu0  ;;  %v6950_v26 = vpop.f32.mrf.mxu1 }
 0x105   : > { %v6952_v29 = vpop.f32.mrf.mxu0  ;;  %v6954_v30 = vpop.f32.mrf.mxu1 }
 0x107   : > { %v6962_v35 = vpop.f32.mrf.mxu0  ;;  %v6964_v36 = vpop.f32.mrf.mxu1 }
 0x109   : > { %v6966_v37 = vpop.f32.mrf.mxu0  ;;  %v6968_v38 = vpop.f32.mrf.mxu1 }
 0x10b   : > { %v6972_v41 = vpop.f32.mrf.mxu0  ;;  %v6974_v42 = vpop.f32.mrf.mxu1 }
 0x10d   : > { %v6980_v47 = vpop.f32.mrf.mxu0  ;;  %v6982_v48 = vpop.f32.mrf.mxu1 }
 0x10f   : > { %v6984_v50 = vpop.f32.mrf.mxu0  ;;  %v6986_v51 = vpop.f32.mrf.mxu1 }
 0x111   : > { %v6990_v53 = vpop.f32.mrf.mxu0  ;;  %v6992_v54 = vpop.f32.mrf.mxu1 }
 0x113   : > { %v6994_v55 = vpop.f32.mrf.mxu0  ;;  %v6996_v56 = vpop.f32.mrf.mxu1 }
 0x115   : > { %v6998_v59 = vpop.f32.mrf.mxu0  ;;  %v7000_v60 = vpop.f32.mrf.mxu1 }
 0x117   : > { %v7006_v1 = vpop.f32.mrf.mxu0  ;;  %v7008_v2 = vpop.f32.mrf.mxu1 }
 0x119   : > { %v7010_v3 = vpop.f32.mrf.mxu0  ;;  %v7012_v4 = vpop.f32.mrf.mxu1 }
 0x11b   : > { %v7014_v5 = vpop.f32.mrf.mxu0  ;;  %v7016_v6 = vpop.f32.mrf.mxu1 }
 0x11d   : > { %v7020_v9 = vpop.f32.mrf.mxu0  ;;  %v7022_v10 = vpop.f32.mrf.mxu1 }
 0x11f   : > { %v7026_v13 = vpop.f32.mrf.mxu0  ;;  %v7028_v14 = vpop.f32.mrf.mxu1 }
 0x121   : > { %v7030_v15 = vpop.f32.mrf.mxu0  ;;  %v7032_v16 = vpop.f32.mrf.mxu1 }
 0x123   : > { %v6096_v17 = vpop.f32.mrf.mxu1  ;;  %v6132_v18 = vpop.f32.mrf.mxu0 }
 0x124   : > { %v910_v20 = vadd.f32 %v6096_v17, %v6948_v25  ;;  %v7063_v17 = vld [vmem:[#allocation2 + $0x24] ss:$0 sps:$4 sm:$0x11]  }
 0x125   : > { %v901_v23 = vpop.f32.mrf.mxu1  ;;  %v1239_v24 = vpop.f32.mrf.mxu0 }
 0x126   : > { %v1368_v28 = vadd.f32 %v6132_v18, %v910_v20  ;;  %v902_v31 = vadd.f32 %v901_v23, %v6952_v29  ;;  %v7055_v29 = vld [vmem:[%s8805_s4 + $0x2] ss:$0 sm:$0xff] }
 0x127   : > { %v6097_v33 = vpop.f32.mrf.mxu1  ;;  %v6133_v25 = vpop.f32.mrf.mxu0 }
 0x128   : > { %v1405_v34 = vadd.f32 %v7040_v22, %v1368_v28  ;;  %v1366_v39 = vadd.f32 %v1239_v24, %v902_v31  ;;  %v913_v40 = vadd.f32 %v6097_v33, %v6962_v35  ;;  %v6623_v31 = vmov 0  }
 0x129   : > { %v904_v44 = vpop.f32.mrf.mxu1  ;;  %v1242_v45 = vpop.f32.mrf.mxu0  ;;  %1544 = vst.msk [vmem:[#allocation2 + $0x8] sm:$0xf] %vm1541_vm8, %v6623_v31  ;;  %1545 = vst.msk [vmem:[#allocation2 + $0xc] sm:$0xf] %vm1541_vm8, %v6623_v31  ;;  %6398 = vset.pattern.permute.xlu1 %v6623_v31  ;;  %6399 = vset.pattern.permute.xlu0 %v6623_v31 }
 0x12a   : > { %v1437_v46 = vmax.f32 %v1405_v34, 0.0  ;;  %v1403_v49 = vadd.f32 %v7040_v22, %v1366_v39  ;;  %v1369_v52 = vadd.f32 %v6133_v25, %v913_v40  ;;  %v905_v58 = vadd.f32 %v904_v44, %v6966_v37  ;;  %1543 = vst.msk [vmem:[#allocation2 + $0x4] sm:$0xf] %vm1541_vm8, %v6623_v31  ;;  %1554 = vst.msk [vmem:[#allocation2 + $0x158] sm:$0xf] %vm1541_vm8, %v6623_v31 }
 0x12b   : > { %v6100_v61 = vpop.f32.mrf.mxu1  ;;  %v6136_v35 = vpop.f32.mrf.mxu0  ;;  %v1604_v37 = vsel %vm6920_vm7, 0, %v1603_v63  ;;  %1555 = vst.msk [vmem:[#allocation2 + $0x15c] sm:$0xf] %vm1541_vm8, %v6623_v31  ;;  %1556 = vst.msk [vmem:[#allocation2 + $0x160] sm:$0xf] %vm1541_vm8, %v6623_v31  ;;  %v2296_v34 = vrot.slane %v7059_v62, 5 }
 0x12c   : > { %v1474_v7 = vmul.f32 %v7050_v43, %v1437_v46  ;;  %v1435_v8 = vmax.f32 %v1403_v49, 0.0  ;;  %v1406_v11 = vadd.f32 %v7040_v22, %v1369_v52  ;;  %v1367_v12 = vadd.f32 %v1242_v45, %v905_v58  ;;  %1605 = vst [vmem:[#allocation2 + $0x11c] sm:$0x8] %v1604_v37 }
 0x12d   : > { %v926_v18 = vadd.f32 %v6100_v61, %v6972_v41  ;;  %v917_v19 = vpop.f32.mrf.mxu1  ;;  %v1255_v20 = vpop.f32.mrf.mxu0  ;;  %v1601_v39 = vsel %vm6920_vm7, 0, %v1600_v21 }
 0x12e   : > { %v1511_v23 = vadd.f32 %v7055_v29, %v1474_v7  ;;  %v1472_v24 = vmul.f32 %v7050_v43, %v1435_v8  ;;  %v1438_v27 = vmax.f32 %v1406_v11, 0.0  ;;  %v1404_v28 = vadd.f32 %v7040_v22, %v1367_v12  ;;  %1602 = vst [vmem:[#allocation2 + $0x108] sm:$0x8] %v1601_v39  ;;  %v7090_v12 = vld [vmem:[#allocation2 + $0x60] ss:$0 sps:$4 sm:$0x11]  }
 0x12f   : > { %v1372_v41 = vadd.f32 %v6136_v35, %v926_v18  ;;  %v918_v32 = vadd.f32 %v917_v19, %v6980_v47  ;;  %v6101_v33 = vpop.f32.mrf.mxu1  ;;  %v6137_v25 = vpop.f32.mrf.mxu0  ;;  %v2293_v35 = vrot.slane %v7063_v17, 5  ;;  %v1549_v18 = vld [vmem:[#allocation2 + $0x10] sm:$0x1] }
 0x130   : > { %v5888_v40 = vpack.c.bf16 %v1511_v23, %v1511_v23  ;;  %v1509_v44 = vadd.f32 %v7055_v29, %v1472_v24  ;;  %v1475_v45 = vmul.f32 %v7050_v43, %v1438_v27  ;;  %v1436_v46 = vmax.f32 %v1404_v28, 0.0  ;;  %v1609_v24 = vld [vmem:[#allocation2 + $0x144] sm:$0x8] }
 0x131   : > { %v1409_v49 = vadd.f32 %v7040_v22, %v1372_v41  ;;  %v1370_v52 = vadd.f32 %v1255_v20, %v918_v32  ;;  %v929_v58 = vadd.f32 %v6101_v33, %v6984_v50  ;;  %v920_v47 = vpop.f32.mrf.mxu1  ;;  %v1258_v61 = vpop.f32.mrf.mxu0  ;;  %v1550_v23 = vsel %vm6910_vm4, 0, %v1549_v18 }
 0x132   : > { %1790 = vst.msk [vmem:[#allocation2 + $0x30] sm:$0xf] %vm1541_vm8, %v5888_v40  ;;  %v5886_v63 = vpack.c.bf16 %v1509_v44, %v1509_v44  ;;  %v1512_v7 = vadd.f32 %v7055_v29, %v1475_v45  ;;  %v1473_v8 = vmul.f32 %v7050_v43, %v1436_v46  ;;  %v921_v11 = vadd.f32 %v920_v47, %v6990_v53  ;;  %v7100_v40 = vld [vmem:[#allocation2 + $0x4c] ss:$0 sps:$4 sm:$0x11]  }
 0x133   : > { %v1441_v19 = vmax.f32 %v1409_v49, 0.0  ;;  %v1407_v20 = vadd.f32 %v7040_v22, %v1370_v52  ;;  %v1373_v50 = vadd.f32 %v6137_v25, %v929_v58  ;;  %v6104_v21 = vpop.f32.mrf.mxu1  ;;  %v6140_v37 = vpop.f32.mrf.mxu0  ;;  %1551 = vst [vmem:[#allocation2 + $0x10] sm:$0x1] %v1550_v23  ;;  %v1610_v44 = vsel %vm6920_vm7, 0, %v1609_v24 }
 0x134   : > { %1788 = vst.msk [vmem:[#allocation2 + $0x1c] sm:$0xf] %vm1541_vm8, %v5886_v63  ;;  %v5889_v27 = vpack.c.bf16 %v1512_v7, %v1512_v7  ;;  %v1510_v28 = vadd.f32 %v7055_v29, %v1473_v8  ;;  %v1371_v31 = vadd.f32 %v1258_v61, %v921_v11  ;;  %v942_v53 = vadd.f32 %v6104_v21, %v6994_v55  ;;  %v7110_v8 = vld [vmem:[#allocation2 + $0x88] ss:$0 sps:$4 sm:$0x11]  }
 0x135   : > { %v1478_v41 = vmul.f32 %v7050_v43, %v1441_v19  ;;  %v1439_v32 = vmax.f32 %v1407_v20, 0.0  ;;  %v1410_v33 = vadd.f32 %v7040_v22, %v1373_v50  ;;  %v933_v25 = vpop.f32.mrf.mxu1  ;;  %v1271_v39 = vpop.f32.mrf.mxu0  ;;  %1611 = vst [vmem:[#allocation2 + $0x144] sm:$0x8] %v1610_v44  ;;  %v2302_v7 = vrot.slane %v7090_v12, 5 }
 0x136   : > { %1791 = vst.msk [vmem:[#allocation2 + $0x34] sm:$0xf] %vm1541_vm8, %v5889_v27  ;;  %v5887_v45 = vpack.c.bf16 %v1510_v28, %v1510_v28  ;;  %v1408_v46 = vadd.f32 %v7040_v22, %v1371_v31  ;;  %v934_v55 = vadd.f32 %v933_v25, %v6998_v59  ;;  %v1376_v49 = vadd.f32 %v6140_v37, %v942_v53  ;;  %v7118_v27 = vld [vmem:[#allocation2 + $0x74] ss:$0 sps:$4 sm:$0x11]  }
 0x137   : > { %v1515_v52 = vadd.f32 %v7055_v29, %v1478_v41  ;;  %v1476_v58 = vmul.f32 %v7050_v43, %v1439_v32  ;;  %v1442_v47 = vmax.f32 %v1410_v33, 0.0  ;;  %v6105_v61 = vpop.f32.mrf.mxu1  ;;  %v6141_v63 = vpop.f32.mrf.mxu0  ;;  %v2299_v24 = vrot.slane %v7100_v40, 5 }
 0x138   : > { %1789 = vst.msk [vmem:[#allocation2 + $0x20] sm:$0xf] %vm1541_vm8, %v5887_v45  ;;  %v1440_v11 = vmax.f32 %v1408_v46, 0.0  ;;  %v1413_v18 = vadd.f32 %v7040_v22, %v1376_v49  ;;  %v945_v59 = vadd.f32 %v6105_v61, %v7006_v1  ;;  %v1374_v19 = vadd.f32 %v1271_v39, %v934_v55 }
 0x139   : > { %v5892_v20 = vpack.c.bf16 %v1515_v52, %v1515_v52  ;;  %v1513_v50 = vadd.f32 %v7055_v29, %v1476_v58  ;;  %v1479_v21 = vmul.f32 %v7050_v43, %v1442_v47  ;;  %v936_v37 = vpop.f32.mrf.mxu1  ;;  %v1274_v23 = vpop.f32.mrf.mxu0  ;;  %v2308_v44 = vrot.slane %v7110_v8, 5 }
 0x13a   : > { %v1477_v28 = vmul.f32 %v7050_v43, %v1440_v11  ;;  %v1445_v31 = vmax.f32 %v1413_v18, 0.0  ;;  %v1411_v53 = vadd.f32 %v7040_v22, %v1374_v19  ;;  %v937_v1 = vadd.f32 %v936_v37, %v7010_v3 }
 0x13b   : > { %1794 = vst.msk [vmem:[#allocation2 + $0x58] sm:$0xf] %vm1541_vm8, %v5892_v20  ;;  %v5890_v41 = vpack.c.bf16 %v1513_v50, %v1513_v50  ;;  %v1516_v32 = vadd.f32 %v7055_v29, %v1479_v21  ;;  %v1377_v33 = vadd.f32 %v6141_v63, %v945_v59  ;;  %v6108_v25 = vpop.f32.mrf.mxu1  ;;  %v6144_v39 = vpop.f32.mrf.mxu0  ;;  %v2305_v11 = vrot.slane %v7118_v27, 5 }
 0x13c   : > { %v1514_v45 = vadd.f32 %v7055_v29, %v1477_v28  ;;  %v1482_v46 = vmul.f32 %v7050_v43, %v1445_v31  ;;  %v1443_v55 = vmax.f32 %v1411_v53, 0.0  ;;  %v958_v49 = vadd.f32 %v6108_v25, %v7014_v5  ;;  %v7137_v5 = vld [vmem:[#allocation2 + $0x30] sm:$0xf] }
 0x13d   : > { %1792 = vst.msk [vmem:[#allocation2 + $0x44] sm:$0xf] %vm1541_vm8, %v5890_v41  ;;  %v5893_v3 = vpack.c.bf16 %v1516_v32, %v1516_v32  ;;  %v1414_v52 = vadd.f32 %v7040_v22, %v1377_v33  ;;  %v1375_v58 = vadd.f32 %v1274_v23, %v937_v1  ;;  %v949_v47 = vpop.f32.mrf.mxu1  ;;  %v1287_v61 = vpop.f32.mrf.mxu0  ;;  %v7131_v63 = vld [vmem:[#allocation2 + $0x34] sm:$0xf] }
 0x13e   : > { %v5891_v18 = vpack.c.bf16 %v1514_v45, %v1514_v45  ;;  %v1519_v59 = vadd.f32 %v7055_v29, %v1482_v46  ;;  %v1480_v19 = vmul.f32 %v7050_v43, %v1443_v55  ;;  %v950_v20 = vadd.f32 %v949_v47, %v7020_v9 }
 0x13f   : > { %1795 = vst.msk [vmem:[#allocation2 + $0x5c] sm:$0xf] %vm1541_vm8, %v5893_v3  ;;  %v1446_v50 = vmax.f32 %v1414_v52, 0.0  ;;  %v1412_v21 = vadd.f32 %v7040_v22, %v1375_v58  ;;  %v1380_v37 = vadd.f32 %v6144_v39, %v958_v49  ;;  %v6109_v23 = vpop.f32.mrf.mxu1  ;;  %v6145_v28 = vpop.f32.mrf.mxu0  ;;  %v7143_v31 = vcombine.low %v7137_v5, %v7131_v63 }
 0x140   : > { %1793 = vst.msk [vmem:[#allocation2 + $0x48] sm:$0xf] %vm1541_vm8, %v5891_v18  ;;  %v5896_v53 = vpack.c.bf16 %v1519_v59, %v1519_v59  ;;  %v1517_v1 = vadd.f32 %v7055_v29, %v1480_v19  ;;  %v961_v9 = vadd.f32 %v6109_v23, %v7026_v13  ;;  %v1378_v41 = vadd.f32 %v1287_v61, %v950_v20 }
 0x141   : > { %v1483_v32 = vmul.f32 %v7050_v43, %v1446_v50  ;;  %v1444_v33 = vmax.f32 %v1412_v21, 0.0  ;;  %v1417_v25 = vadd.f32 %v7040_v22, %v1380_v37  ;;  %v952_v39 = vpop.f32.mrf.mxu1  ;;  %v2295_v45 = vrot.slane %v7143_v31, 5  ;;  %v1290_v46 = vpop.f32.mrf.mxu0 }
 0x142   : > { %1798 = vst.msk [vmem:[#allocation2 + $0x80] sm:$0xf] %vm1541_vm8, %v5896_v53  ;;  %v5894_v55 = vpack.c.bf16 %v1517_v1, %v1517_v1  ;;  %v1415_v49 = vadd.f32 %v7040_v22, %v1378_v41  ;;  %v953_v3 = vadd.f32 %v952_v39, %v7030_v15  ;;  %v1381_v52 = vadd.f32 %v6145_v28, %v961_v9 }
 0x143   : > { %v1520_v13 = vadd.f32 %v7055_v29, %v1483_v32  ;;  %v1481_v58 = vmul.f32 %v7050_v43, %v1444_v33  ;;  %v1449_v47 = vmax.f32 %v1417_v25, 0.0  ;;  %2351 = vrot.lane.b32.xlu0 %v2295_v45, %s6624_s29  ;;  %v2297_v61 = vsel %vm2288_vm9, %v2295_v45, %v2296_v34  ;;  %v6112_v18 = vpop.f32.mrf.mxu1  ;;  %v6148_v59 = vpop.f32.mrf.mxu0 }
 0x144   : > { %1796 = vst.msk [vmem:[#allocation2 + $0x6c] sm:$0xf] %vm1541_vm8, %v5894_v55  ;;  %v1447_v19 = vmax.f32 %v1415_v49, 0.0  ;;  %v1418_v15 = vadd.f32 %v7040_v22, %v1381_v52  ;;  %v1379_v20 = vadd.f32 %v1290_v46, %v953_v3  ;;  %2353 = vrot.lane.b32.xlu1 %v2297_v61, %s6624_s29  ;;  %v974_v50 = vadd.f32 %v6112_v18, %v6950_v26  ;;  %v6488_v46 = vld [vmem:[%s8804_s3 + $0x28] sm:$0xff]   ;;  %v7178_v52 = vld [vmem:[#allocation2 + $0x20] sm:$0xf] }
 0x145   : > { %v5897_v21 = vpack.c.bf16 %v1520_v13, %v1520_v13  ;;  %v1518_v37 = vadd.f32 %v7055_v29, %v1481_v58  ;;  %v1486_v23 = vmul.f32 %v7050_v43, %v1449_v47  ;;  %v965_v62 = vpop.f32.mrf.mxu1  ;;  %v2071_v34 = vshrl.u32 %v7143_v31, 16  ;;  %v1303_v28 = vpop.f32.mrf.mxu0  ;;  %6162 = vmatprep.subr.bf16.mxu1 %v6488_v46 }
 0x146   : > { %v1484_v53 = vmul.f32 %v7050_v43, %v1447_v19  ;;  %v1450_v1 = vmax.f32 %v1418_v15, 0.0  ;;  %v1416_v9 = vadd.f32 %v7040_v22, %v1379_v20  ;;  %v966_v41 = vadd.f32 %v965_v62, %v6954_v30  ;;  %6163 = vmatpush3.bf16.msra.mxu1 %v6488_v46 }
 0x147   : > { %1799 = vst.msk [vmem:[#allocation2 + $0x84] sm:$0xf] %vm1541_vm8, %v5897_v21  ;;  %v5895_v32 = vpack.c.bf16 %v1518_v37, %v1518_v37  ;;  %v1523_v26 = vadd.f32 %v7055_v29, %v1486_v23  ;;  %v1384_v33 = vadd.f32 %v6148_v59, %v974_v50  ;;  %v2073_v25 = vrot.slane %v2071_v34, 4  ;;  %v6113_v39 = vpop.f32.mrf.mxu1  ;;  %v6149_v45 = vpop.f32.mrf.mxu0 }
 0x148   : > { %v1521_v55 = vadd.f32 %v7055_v29, %v1484_v53  ;;  %v1487_v49 = vmul.f32 %v7050_v43, %v1450_v1  ;;  %v1448_v3 = vmax.f32 %v1416_v9, 0.0  ;;  %v2074_v30 = vshll.u32 %v7143_v31, 16  ;;  %v7185_v31 = vld [vmem:[#allocation2 + $0x1c] sm:$0xf] }
 0x149   : > { %1797 = vst.msk [vmem:[#allocation2 + $0x70] sm:$0xf] %vm1541_vm8, %v5895_v32  ;;  %v5900_v13 = vpack.c.bf16 %v1523_v26, %v1523_v26  ;;  %v1421_v58 = vadd.f32 %v7040_v22, %v1384_v33  ;;  %v977_v47 = vadd.f32 %v6113_v39, %v6964_v36  ;;  %v1382_v61 = vadd.f32 %v1303_v28, %v966_v41  ;;  %v968_v18 = vpop.f32.mrf.mxu1  ;;  %v1306_v59 = vpop.f32.mrf.mxu0 }
 0x14a   : > { %v5898_v19 = vpack.c.bf16 %v1521_v55, %v1521_v55  ;;  %v1524_v15 = vadd.f32 %v7055_v29, %v1487_v49  ;;  %v1485_v20 = vmul.f32 %v7050_v43, %v1448_v3  ;;  %v2076_v50 = vrot.slane %v2074_v30, 5  ;;  %v6490_v55 = vld [vmem:[%s8804_s3 + $0x18] sm:$0xff]  }
 0x14b   : > { %1802 = vst.msk [vmem:[#allocation2 + $0xa8] sm:$0xf] %vm1541_vm8, %v5900_v13  ;;  %v1453_v21 = vmax.f32 %v1421_v58, 0.0  ;;  %v1419_v37 = vadd.f32 %v7040_v22, %v1382_v61  ;;  %v5706_v36 = vcombine.low %v7185_v31, %v7178_v52  ;;  %v969_v23 = vadd.f32 %v968_v18, %v6968_v38  ;;  %v6116_v62 = vpop.f32.mrf.mxu1  ;;  %v6152_v34 = vpop.f32.mrf.mxu0  ;;  %v6489_v38 = vld [vmem:[%s8804_s3 + $0x20] sm:$0xff]   ;;  %v7208_v61 = vld [vmem:[#allocation2 + $0x5c] sm:$0xf] }
 0x14c   : > { %1800 = vst.msk [vmem:[#allocation2 + $0x94] sm:$0xf] %vm1541_vm8, %v5898_v19  ;;  %v5901_v28 = vpack.c.bf16 %v1524_v15, %v1524_v15  ;;  %v1522_v53 = vadd.f32 %v7055_v29, %v1485_v20  ;;  %v2077_v1 = vor.u32 %v2076_v50, %v2073_v25  ;;  %v1385_v9 = vadd.f32 %v6149_v45, %v977_v47 }
 0x14d   : > { %v1490_v41 = vmul.f32 %v7050_v43, %v1453_v21  ;;  %v1451_v32 = vmax.f32 %v1419_v37, 0.0  ;;  %v2292_v26 = vrot.slane %v5706_v36, 5  ;;  %v2063_v33 = vshrl.u32 %v5706_v36, 16  ;;  %v981_v39 = vpop.f32.mrf.mxu1  ;;  %v1319_v46 = vpop.f32.mrf.mxu0  ;;  %6164 = vmatprep.subr.bf16.mxu1 %v6489_v38 }
 0x14e   : > { %1803 = vst.msk [vmem:[#allocation2 + $0xac] sm:$0xf] %vm1541_vm8, %v5901_v28  ;;  %v5899_v49 = vpack.c.bf16 %v1522_v53, %v1522_v53  ;;  %2202 = vrot.lane.b32.xlu0 %v2077_v1, %s6625_s28  ;;  %v1422_v25 = vadd.f32 %v7040_v22, %v1385_v9  ;;  %v2066_v45 = vshll.u32 %v5706_v36, 16  ;;  %v990_v3 = vadd.f32 %v6116_v62, %v6974_v42 }
 0x14f   : > { %v1527_v30 = vadd.f32 %v7055_v29, %v1490_v41  ;;  %v1488_v13 = vmul.f32 %v7050_v43, %v1451_v32  ;;  %2347 = vrot.lane.b32.xlu1 %v2292_v26, %s6624_s29  ;;  %v2065_v58 = vrot.slane %v2063_v33, 4  ;;  %v1383_v47 = vadd.f32 %v1306_v59, %v969_v23  ;;  %v6117_v18 = vpop.f32.mrf.mxu1  ;;  %v6153_v19 = vpop.f32.mrf.mxu0  ;;  %6165 = vmatpush3.bf16.msra.mxu1 %v6489_v38  ;;  %v7217_v23 = vld [vmem:[#allocation2 + $0x58] sm:$0xf] }
 0x150   : > { %1801 = vst.msk [vmem:[#allocation2 + $0x98] sm:$0xf] %vm1541_vm8, %v5899_v49  ;;  %v1454_v15 = vmax.f32 %v1422_v25, 0.0  ;;  %v2068_v20 = vrot.slane %v2066_v45, 5  ;;  %v2294_v42 = vsel %vm2288_vm9, %v2292_v26, %v2293_v35  ;;  %v982_v50 = vadd.f32 %v981_v39, %v6982_v48  ;;  %6166 = vmatprep.subr.bf16.mxu1 %v6490_v55  ;;  %v7225_v35 = vld [vmem:[#allocation2 + $0x48] sm:$0xf] }
 0x151   : > { %v5904_v21 = vpack.c.bf16 %v1527_v30, %v1527_v30  ;;  %v1525_v37 = vadd.f32 %v7055_v29, %v1488_v13  ;;  %v1420_v59 = vadd.f32 %v7040_v22, %v1383_v47  ;;  %v1388_v36 = vadd.f32 %v6152_v34, %v990_v3  ;;  %v984_v62 = vpop.f32.mrf.mxu1  ;;  %v1322_v28 = vpop.f32.mrf.mxu0  ;;  %v7234_v25 = vld [vmem:[#allocation2 + $0x44] sm:$0xf] }
 0x152   : > { %v1491_v53 = vmul.f32 %v7050_v43, %v1454_v15  ;;  %v2069_v1 = vor.u32 %v2068_v20, %v2065_v58  ;;  %v7222_v17 = vcombine.low %v7217_v23, %v7208_v61  ;;  %v993_v48 = vadd.f32 %v6117_v18, %v6986_v51 }
 0x153   : > { %1806 = vst.msk [vmem:[#allocation2 + $0xd0] sm:$0xf] %vm1541_vm8, %v5904_v21  ;;  %v5902_v9 = vpack.c.bf16 %v1525_v37, %v1525_v37  ;;  %v1452_v34 = vmax.f32 %v1420_v59, 0.0  ;;  %2349 = vrot.lane.b32.xlu1 %v2294_v42, %s6624_s29  ;;  %v1425_v41 = vadd.f32 %v7040_v22, %v1388_v36  ;;  %v1386_v32 = vadd.f32 %v1319_v46, %v982_v50  ;;  %v6120_v26 = vpop.f32.mrf.mxu1  ;;  %v6156_v33 = vpop.f32.mrf.mxu0 }
 0x154   : > { %v1528_v39 = vadd.f32 %v7055_v29, %v1491_v53  ;;  %2200 = vrot.lane.b32.xlu0 %v2069_v1, %s6625_s28  ;;  %v2301_v38 = vrot.slane %v7222_v17, 5  ;;  %v985_v51 = vadd.f32 %v984_v62, %v6992_v54  ;;  %v1389_v49 = vadd.f32 %v6153_v19, %v993_v48  ;;  %6167 = vmatpush3.bf16.msra.mxu1 %v6490_v55 }
 0x155   : > { %1804 = vst.msk [vmem:[#allocation2 + $0xbc] sm:$0xf] %vm1541_vm8, %v5902_v9  ;;  %v1489_v45 = vmul.f32 %v7050_v43, %v1452_v34  ;;  %v1457_v3 = vmax.f32 %v1425_v41, 0.0  ;;  %v1423_v46 = vadd.f32 %v7040_v22, %v1386_v32  ;;  %v5708_v30 = vcombine.low %v7234_v25, %v7225_v35  ;;  %v997_v13 = vpop.f32.mrf.mxu1  ;;  %v1335_v58 = vpop.f32.mrf.mxu0 }
 0x156   : > { %v5905_v47 = vpack.c.bf16 %v1528_v39, %v1528_v39  ;;  %v2303_v54 = vsel %vm2288_vm9, %v2301_v38, %v2302_v7  ;;  %v1426_v18 = vadd.f32 %v7040_v22, %v1389_v49  ;;  %v1006_v55 = vadd.f32 %v6120_v26, %v6996_v56 }
 0x157   : > { %v1526_v19 = vadd.f32 %v7055_v29, %v1489_v45  ;;  %v1494_v15 = vmul.f32 %v7050_v43, %v1457_v3  ;;  %v1455_v20 = vmax.f32 %v1423_v46, 0.0  ;;  %2361 = vrot.lane.b32.xlu1 %v2303_v54, %s6624_s29  ;;  %v2298_v42 = vrot.slane %v5708_v30, 5  ;;  %v6121_v50 = vpop.f32.mrf.mxu1  ;;  %v6157_v21 = vpop.f32.mrf.mxu0 }
 0x158   : > { %1807 = vst.msk [vmem:[#allocation2 + $0xd4] sm:$0xf] %vm1541_vm8, %v5905_v47  ;;  %2359 = vrot.lane.b32.xlu0 %v2301_v38, %s6624_s29  ;;  %v1458_v12 = vmax.f32 %v1426_v18, 0.0  ;;  %v1387_v7 = vadd.f32 %v1322_v28, %v985_v51  ;;  %v998_v37 = vadd.f32 %v997_v13, %v7000_v60  ;;  %v1392_v59 = vadd.f32 %v6156_v33, %v1006_v55  ;;  %v7271_v55 = vld [vmem:[#allocation2 + $0x84] sm:$0xf] }
 0x159   : > { %v5903_v56 = vpack.c.bf16 %v1526_v19, %v1526_v19  ;;  %v1531_v36 = vadd.f32 %v7055_v29, %v1494_v15  ;;  %v1492_v62 = vmul.f32 %v7050_v43, %v1455_v20  ;;  %v2300_v53 = vsel %vm2288_vm9, %v2298_v42, %v2299_v24  ;;  %v1000_v1 = vpop.f32.mrf.mxu1  ;;  %v1338_v48 = vpop.f32.mrf.mxu0 }
 0x15a   : > { %v1495_v9 = vmul.f32 %v7050_v43, %v1458_v12  ;;  %v1424_v34 = vadd.f32 %v7040_v22, %v1387_v7  ;;  %v1429_v28 = vadd.f32 %v7040_v22, %v1392_v59  ;;  %v2079_v41 = vshrl.u32 %v5708_v30, 16  ;;  %v7279_v59 = vld [vmem:[#allocation2 + $0x80] sm:$0xf] }
 0x15b   : > { %1805 = vst.msk [vmem:[#allocation2 + $0xc0] sm:$0xf] %vm1541_vm8, %v5903_v56  ;;  %v5908_v60 = vpack.c.bf16 %v1531_v36, %v1531_v36  ;;  %v1529_v32 = vadd.f32 %v7055_v29, %v1492_v62  ;;  %2357 = vrot.lane.b32.xlu1 %v2300_v53, %s6624_s29  ;;  %v2082_v26 = vshll.u32 %v5708_v30, 16  ;;  %v1009_v40 = vadd.f32 %v6121_v50, %v7008_v2  ;;  %v6124_v24 = vpop.f32.mrf.mxu1  ;;  %v6160_v33 = vpop.f32.mrf.mxu0  ;;  %v7287_v53 = vld [vmem:[#allocation2 + $0x70] sm:$0xf] }
 0x15c   : > { %v1532_v39 = vadd.f32 %v7055_v29, %v1495_v9  ;;  %2355 = vrot.lane.b32.xlu0 %v2298_v42, %s6624_s29  ;;  %v1456_v38 = vmax.f32 %v1424_v34, 0.0  ;;  %v1461_v51 = vmax.f32 %v1429_v28, 0.0  ;;  %v2081_v49 = vrot.slane %v2079_v41, 4 }
 0x15d   : > { %1810 = vst.msk [vmem:[#allocation2 + $0xf8] sm:$0xf] %vm1541_vm8, %v5908_v60  ;;  %v5906_v45 = vpack.c.bf16 %v1529_v32, %v1529_v32  ;;  %v2084_v3 = vrot.slane %v2082_v26, 5  ;;  %v1390_v46 = vadd.f32 %v1335_v58, %v998_v37  ;;  %v2087_v13 = vshrl.u32 %v7222_v17, 16  ;;  %v1013_v47 = vpop.f32.mrf.mxu1  ;;  %v1351_v50 = vpop.f32.mrf.mxu0  ;;  %v7294_v26 = vld [vmem:[#allocation2 + $0x6c] sm:$0xf] }
 0x15e   : > { %v5909_v30 = vpack.c.bf16 %v1532_v39, %v1532_v39  ;;  %v1493_v2 = vmul.f32 %v7050_v43, %v1456_v38  ;;  %v1498_v54 = vmul.f32 %v7050_v43, %v1461_v51  ;;  %v2090_v18 = vshll.u32 %v7222_v17, 16 }
 0x15f   : > { %1808 = vst.msk [vmem:[#allocation2 + $0xe4] sm:$0xf] %vm1541_vm8, %v5906_v45  ;;  %v2085_v19 = vor.u32 %v2084_v3, %v2081_v49  ;;  %v1427_v15 = vadd.f32 %v7040_v22, %v1390_v46  ;;  %v2089_v20 = vrot.slane %v2087_v13, 4  ;;  %v1001_v58 = vadd.f32 %v1000_v1, %v7012_v4  ;;  %v6125_v42 = vpop.f32.mrf.mxu1 }
 0x160   : > { %1811 = vst.msk [vmem:[#allocation2 + $0xfc] sm:$0xf] %vm1541_vm8, %v5909_v30  ;;  %v1530_v12 = vadd.f32 %v7055_v29, %v1493_v2  ;;  %v1535_v7 = vadd.f32 %v7055_v29, %v1498_v54  ;;  %v2092_v37 = vrot.slane %v2090_v18, 5  ;;  %v1393_v17 = vadd.f32 %v6157_v21, %v1009_v40 }
 0x161   : > { %2204 = vrot.lane.b32.xlu0 %v2085_v19, %s6625_s28  ;;  %v1459_v56 = vmax.f32 %v1427_v15, 0.0  ;;  %v7284_v36 = vcombine.low %v7279_v59, %v7271_v55  ;;  %v1022_v4 = vadd.f32 %v6124_v24, %v7016_v6  ;;  %v1391_v62 = vadd.f32 %v1338_v48, %v1001_v58  ;;  %v1016_v40 = vpop.f32.mrf.mxu1  ;;  %v6161_v6 = vpop.f32.mrf.mxu0 }
 0x162   : > { %v5907_v1 = vpack.c.bf16 %v1530_v12, %v1530_v12  ;;  %v5912_v9 = vpack.c.bf16 %v1535_v7, %v1535_v7  ;;  %v2093_v34 = vor.u32 %v2092_v37, %v2089_v20  ;;  %v1430_v28 = vadd.f32 %v7040_v22, %v1393_v17  ;;  %v7322_v37 = vld [vmem:[#allocation2 + $0xac] sm:$0xf] }
 0x163   : > { %v1496_v21 = vmul.f32 %v7050_v43, %v1459_v56  ;;  %v2307_v41 = vrot.slane %v7284_v36, 5  ;;  %v1428_v60 = vadd.f32 %v7040_v22, %v1391_v62  ;;  %v1014_v32 = vadd.f32 %v1013_v47, %v7022_v10  ;;  %v1354_v54 = vpop.f32.mrf.mxu0 }
 0x164   : > { %1809 = vst.msk [vmem:[#allocation2 + $0xe8] sm:$0xf] %vm1541_vm8, %v5907_v1  ;;  %1814 = vst.msk [vmem:[#allocation2 + $0x120] sm:$0xf] %vm1541_vm8, %v5912_v9  ;;  %2206 = vrot.lane.b32.xlu1 %v2093_v34, %s6625_s28  ;;  %v1462_v48 = vmax.f32 %v1430_v28, 0.0  ;;  %v1396_v24 = vadd.f32 %v6160_v33, %v1022_v4  ;;  %v5710_v39 = vcombine.low %v7294_v26, %v7287_v53  ;;  %v2103_v1 = vshrl.u32 %v7284_v36, 16 }
 0x165   : > { %v1025_v38 = vadd.f32 %v6125_v42, %v7028_v14  ;;  %v1533_v51 = vadd.f32 %v7055_v29, %v1496_v21  ;;  %2367 = vrot.lane.b32.xlu0 %v2307_v41, %s6624_s29  ;;  %v1460_v10 = vmax.f32 %v1428_v60, 0.0  ;;  %v2309_v49 = vsel %vm2288_vm9, %v2307_v41, %v2308_v44  ;;  %v7331_v34 = vld [vmem:[#allocation2 + $0xa8] sm:$0xf]  ;;  %v7333_v28 = vld [vmem:[#allocation2 + $0x98] sm:$0xf] }
 0x166   : > { %v1394_v45 = vadd.f32 %v1351_v50, %v1014_v32  ;;  %v1499_v3 = vmul.f32 %v7050_v43, %v1462_v48  ;;  %v1433_v46 = vadd.f32 %v7040_v22, %v1396_v24  ;;  %v2304_v33 = vrot.slane %v5710_v39, 5 }
 0x167   : > { %v1017_v13 = vadd.f32 %v1016_v40, %v7032_v16  ;;  %v5910_v47 = vpack.c.bf16 %v1533_v51, %v1533_v51  ;;  %v1497_v14 = vmul.f32 %v7050_v43, %v1460_v10  ;;  %v1397_v2 = vadd.f32 %v6161_v6, %v1025_v38  ;;  %v6467_v40 = vld [vmem:[#allocation2 + $0xb0] ss:$0 sps:$4 sm:$0x11]  }
 0x168   : > { %v1431_v30 = vadd.f32 %v7040_v22, %v1394_v45  ;;  %v1536_v18 = vadd.f32 %v7055_v29, %v1499_v3  ;;  %2369 = vrot.lane.b32.xlu1 %v2309_v49, %s6624_s29  ;;  %v1465_v8 = vmax.f32 %v1433_v46, 0.0  ;;  %v2306_v44 = vsel %vm2288_vm9, %v2304_v33, %v2305_v11  ;;  %v6469_v45 = vld [vmem:[#allocation2 + $0x9c] ss:$0 sps:$4 sm:$0x11]  }
 0x169   : > { %v2095_v19 = vshrl.u32 %v5710_v39, 16  ;;  %1812 = vst.msk [vmem:[#allocation2 + $0x10c] sm:$0xf] %vm1541_vm8, %v5910_v47  ;;  %v1534_v16 = vadd.f32 %v7055_v29, %v1497_v14  ;;  %2363 = vrot.lane.b32.xlu0 %v2304_v33, %s6624_s29  ;;  %v1434_v20 = vadd.f32 %v7040_v22, %v1397_v2  ;;  %v2098_v58 = vshll.u32 %v5710_v39, 16 }
 0x16a   : > { %v1463_v15 = vmax.f32 %v1431_v30, 0.0  ;;  %v5913_v42 = vpack.c.bf16 %v1536_v18, %v1536_v18  ;;  %v1502_v50 = vmul.f32 %v7050_v43, %v1465_v8  ;;  %v1395_v7 = vadd.f32 %v1354_v54, %v1017_v13 }
 0x16b   : > { %v2097_v12 = vrot.slane %v2095_v19, 4  ;;  %v5911_v27 = vpack.c.bf16 %v1534_v16, %v1534_v16  ;;  %v1466_v17 = vmax.f32 %v1434_v20, 0.0  ;;  %v2100_v56 = vrot.slane %v2098_v58, 5  ;;  %v7358_v16 = vld [vmem:[#allocation2 + $0xc0] sm:$0xf] }
 0x16c   : > { %v1500_v11 = vmul.f32 %v7050_v43, %v1463_v15  ;;  %1815 = vst.msk [vmem:[#allocation2 + $0x124] sm:$0xf] %vm1541_vm8, %v5913_v42  ;;  %v1539_v4 = vadd.f32 %v7055_v29, %v1502_v50  ;;  %2365 = vrot.lane.b32.xlu1 %v2306_v44, %s6624_s29  ;;  %v1432_v62 = vadd.f32 %v7040_v22, %v1395_v7  ;;  %v2106_v9 = vshll.u32 %v7284_v36, 16  ;;  %v7340_v36 = vld [vmem:[#allocation2 + $0x94] sm:$0xf] }
 0x16d   : > { %1813 = vst.msk [vmem:[#allocation2 + $0x110] sm:$0xf] %vm1541_vm8, %v5911_v27  ;;  %v1503_v41 = vmul.f32 %v7050_v43, %v1466_v17  ;;  %v2101_v60 = vor.u32 %v2100_v56, %v2097_v12  ;;  %v5713_v32 = vcombine.low %v7331_v34, %v7322_v37  ;;  %v2105_v48 = vrot.slane %v2103_v1, 4  ;;  %v7361_v58 = vld [vmem:[#allocation2 + $0xd0] sm:$0xf] }
 0x16e   : > { %v1537_v21 = vadd.f32 %v7055_v29, %v1500_v11  ;;  %v5916_v22 = vpack.c.bf16 %v1539_v4, %v1539_v4  ;;  %v1464_v6 = vmax.f32 %v1432_v62, 0.0  ;;  %v2108_v24 = vrot.slane %v2106_v9, 5  ;;  %v7363_v42 = vld [vmem:[#allocation2 + $0xbc] sm:$0xf]  ;;  %v7403_v57 = vld [vmem:[#allocation2 + $0x120] sm:$0xf] }
 0x16f   : > { %v1540_v38 = vadd.f32 %v7055_v29, %v1503_v41  ;;  %2208 = vrot.lane.b32.xlu0 %v2101_v60, %s6625_s28  ;;  %v5712_v51 = vcombine.low %v7340_v36, %v7333_v28  ;;  %v2313_v46 = vrot.slane %v5713_v32, 5  ;;  %v2314_v33 = vrot.slane %v6467_v40, 5  ;;  %v6471_v27 = vld [vmem:[#allocation2 + $0xd8] ss:$0 sps:$4 sm:$0x11]  }
 0x170   : > { %v5914_v39 = vpack.c.bf16 %v1537_v21, %v1537_v21  ;;  %1818 = vst.msk [vmem:[#allocation2 + $0x148] sm:$0xf] %vm1541_vm8, %v5916_v22  ;;  %v1501_v10 = vmul.f32 %v7050_v43, %v1464_v6  ;;  %v2109_v49 = vor.u32 %v2108_v24, %v2105_v48  ;;  %v2311_v2 = vrot.slane %v6469_v45, 5  ;;  %v6473_v56 = vld [vmem:[#allocation2 + $0xc4] ss:$0 sps:$4 sm:$0x11]  }
 0x171   : > { %v5917_v3 = vpack.c.bf16 %v1540_v38, %v1540_v38  ;;  %v2111_v13 = vshrl.u32 %v5712_v51, 16  ;;  %v2114_v14 = vshll.u32 %v5712_v51, 16  ;;  %v2119_v43 = vshrl.u32 %v5713_v32, 16  ;;  %v7376_v48 = vld [vmem:[#allocation2 + $0xfc] sm:$0xf] }
 0x172   : > { %1816 = vst.msk [vmem:[#allocation2 + $0x134] sm:$0xf] %vm1541_vm8, %v5914_v39  ;;  %v1538_v47 = vadd.f32 %v7055_v29, %v1501_v10  ;;  %2210 = vrot.lane.b32.xlu1 %v2109_v49, %s6625_s28  ;;  %v2122_v54 = vshll.u32 %v5713_v32, 16  ;;  %v2315_v18 = vsel %vm2288_vm9, %v2313_v46, %v2314_v33  ;;  %v2310_v8 = vrot.slane %v5712_v51, 5  ;;  %v7356_v29 = vld [vmem:[#allocation2 + $0xd4] sm:$0xf] }
 0x173   : > { %1819 = vst.msk [vmem:[#allocation2 + $0x14c] sm:$0xf] %vm1541_vm8, %v5917_v3  ;;  %2375 = vrot.lane.b32.xlu0 %v2313_v46, %s6624_s29  ;;  %v2113_v44 = vrot.slane %v2111_v13, 4  ;;  %v2116_v19 = vrot.slane %v2114_v14, 5  ;;  %v2121_v15 = vrot.slane %v2119_v43, 4  ;;  %v5715_v7 = vcombine.low %v7361_v58, %v7356_v29 }
 0x174   : > { %v5915_v30 = vpack.c.bf16 %v1538_v47, %v1538_v47  ;;  %v2124_v20 = vrot.slane %v2122_v54, 5  ;;  %v2312_v50 = vsel %vm2288_vm9, %v2310_v8, %v2311_v2  ;;  %v5714_v11 = vcombine.low %v7363_v42, %v7358_v16  ;;  %v7378_v24 = vld [vmem:[#allocation2 + $0xe8] sm:$0xf]  ;;  %v7381_v51 = vld [vmem:[#allocation2 + $0xf8] sm:$0xf] }
 0x175   : > { %v2117_v12 = vor.u32 %v2116_v19, %v2113_v44  ;;  %v2319_v4 = vrot.slane %v5715_v7, 5  ;;  %v2320_v62 = vrot.slane %v6471_v27, 5  ;;  %v2317_v21 = vrot.slane %v6473_v56, 5  ;;  %v7383_v10 = vld [vmem:[#allocation2 + $0xe4] sm:$0xf] }
 0x176   : > { %1817 = vst.msk [vmem:[#allocation2 + $0x138] sm:$0xf] %vm1541_vm8, %v5915_v30  ;;  %2377 = vrot.lane.b32.xlu1 %v2315_v18, %s6624_s29  ;;  %v2125_v17 = vor.u32 %v2124_v20, %v2121_v15  ;;  %v2127_v1 = vshrl.u32 %v5714_v11, 16  ;;  %v2130_v9 = vshll.u32 %v5714_v11, 16  ;;  %v2135_v41 = vshrl.u32 %v5715_v7, 16 }
 0x177   : > { %2371 = vrot.lane.b32.xlu0 %v2310_v8, %s6624_s29  ;;  %v2138_v60 = vshll.u32 %v5715_v7, 16  ;;  %v2321_v32 = vsel %vm2288_vm9, %v2319_v4, %v2320_v62  ;;  %v2316_v40 = vrot.slane %v5714_v11, 5  ;;  %v5717_v3 = vcombine.low %v7381_v51, %v7376_v48  ;;  %v6475_v46 = vld [vmem:[#allocation2 + $0x100] ss:$0 sps:$4 sm:$0x11]  }
 0x178   : > { %v2129_v22 = vrot.slane %v2127_v1, 4  ;;  %v2132_v6 = vrot.slane %v2130_v9, 5  ;;  %v2137_v39 = vrot.slane %v2135_v41, 4  ;;  %v5716_v33 = vcombine.low %v7383_v10, %v7378_v24  ;;  %v1557_v13 = vld [vmem:[#allocation2 + $0x164] sm:$0x1] }
 0x179   : > { %v2140_v38 = vrot.slane %v2138_v60, 5  ;;  %v2318_v49 = vsel %vm2288_vm9, %v2316_v40, %v2317_v21  ;;  %v6477_v14 = vld [vmem:[#allocation2 + $0xec] ss:$0 sps:$4 sm:$0x11]   ;;  %v2325_v30 = vrot.slane %v5717_v3, 5  ;;  %v2326_v2 = vrot.slane %v6475_v46, 5 }
 0x17a   : > { %2373 = vrot.lane.b32.xlu1 %v2312_v50, %s6624_s29  ;;  %v2133_v45 = vor.u32 %v2132_v6, %v2129_v22  ;;  %v2143_v43 = vshrl.u32 %v5716_v33, 16  ;;  %v2146_v54 = vshll.u32 %v5716_v33, 16  ;;  %v1558_v18 = vsel %vm6910_vm4, 0, %v1557_v13  ;;  %v1606_v7 = vld [vmem:[#allocation2 + $0x130] sm:$0x8] }
 0x17b   : > { %2212 = vrot.lane.b32.xlu0 %v2117_v12, %s6625_s28  ;;  %v2141_v47 = vor.u32 %v2140_v38, %v2137_v39  ;;  %1559 = vst [vmem:[#allocation2 + $0x164] sm:$0x1] %v1558_v18  ;;  %v2323_v8 = vrot.slane %v6477_v14, 5  ;;  %v2151_v44 = vshrl.u32 %v5717_v3, 16  ;;  %v2154_v19 = vshll.u32 %v5717_v3, 16 }
 0x17c   : > { %v2327_v15 = vsel %vm2288_vm9, %v2325_v30, %v2326_v2  ;;  %v2322_v20 = vrot.slane %v5716_v33, 5  ;;  %v2145_v50 = vrot.slane %v2143_v43, 4  ;;  %v2148_v12 = vrot.slane %v2146_v54, 5  ;;  %v7398_v27 = vld [vmem:[#allocation2 + $0x124] sm:$0xf] }
 0x17d   : > { %v7400_v11 = vld [vmem:[#allocation2 + $0x110] sm:$0xf]  ;;  %v2156_v56 = vrot.slane %v2154_v19, 5  ;;  %v1607_v62 = vsel %vm6920_vm7, 0, %v1606_v7  ;;  %v5719_v21 = vcombine.low %v7403_v57, %v7398_v27  ;;  %v7422_v14 = vld [vmem:[#allocation2 + $0x138] sm:$0xf] }
 0x17e   : > { %2214 = vrot.lane.b32.xlu1 %v2125_v17, %s6625_s28  ;;  %v2153_v17 = vrot.slane %v2151_v44, 4  ;;  %v2324_v1 = vsel %vm2288_vm9, %v2322_v20, %v2323_v8  ;;  %v2149_v9 = vor.u32 %v2148_v12, %v2145_v50  ;;  %v6479_v41 = vld [vmem:[#allocation2 + $0x128] ss:$0 sps:$4 sm:$0x11]   ;;  %1608 = vst [vmem:[#allocation2 + $0x130] sm:$0x8] %v1607_v62 }
 0x17f   : > { %2383 = vrot.lane.b32.xlu0 %v2319_v4, %s6624_s29  ;;  %v7405_v4 = vld [vmem:[#allocation2 + $0x10c] sm:$0xf]  ;;  %v2331_v22 = vrot.slane %v5719_v21, 5  ;;  %v2332_v0 = vrot.slane %v6479_v41, 5  ;;  %v7425_v2 = vld [vmem:[#allocation2 + $0x148] sm:$0xf] }
 0x180   : > { %v5718_v60 = vcombine.low %v7405_v4, %v7400_v11  ;;  %v7427_v43 = vld [vmem:[#allocation2 + $0x8] sm:$0xf]  ;;  %v7431_v44 = vld [vmem:[#allocation2 + $0x134] sm:$0xf]  ;;  %v7433_v19 = vld [vmem:[#allocation2 + $0xc] sm:$0xf] }
 0x181   : > { %v2333_v3 = vsel %vm2288_vm9, %v2331_v22, %v2332_v0  ;;  %v5720_v50 = vcombine.low %v7431_v44, %v7422_v14  ;;  %v5705_v12 = vcombine.low %v7427_v43, %v7433_v19  ;;  %vm3813_vm4 = vcmask 1044484  }
 0x182   : > { %2385 = vrot.lane.b32.xlu1 %v2321_v32, %s6624_s29  ;;  %v2157_v32 = vor.u32 %v2156_v56, %v2153_v17  ;;  %v2159_v6 = vshrl.u32 %v5718_v60, 16  ;;  %v2162_v39 = vshll.u32 %v5718_v60, 16  ;;  %v2328_v46 = vrot.slane %v5718_v60, 5 }
 0x183   : > { %2379 = vrot.lane.b32.xlu0 %v2316_v40, %s6624_s29  ;;  %v6481_v40 = vld [vmem:[#allocation2 + $0x114] ss:$0 sps:$4 sm:$0x11]   ;;  %v2178_v41 = vshll.u32 %v5720_v50, 16  ;;  %v2055_v60 = vshrl.u32 %v5705_v12, 16  ;;  %vm3819_vm7 = vcmask 1047559  }
 0x184   : > { %v2329_v38 = vrot.slane %v6481_v40, 5  ;;  %v2161_v33 = vrot.slane %v2159_v6, 4  ;;  %v2164_v13 = vrot.slane %v2162_v39, 5  ;;  %v7444_v40 = vld [vmem:[#allocation2 + $0x15c] sm:$0xf]  ;;  %vm6627_vm8 = vmmov 0  }
 0x186   : > { %2381 = vrot.lane.b32.xlu1 %v2318_v49, %s6624_s29  ;;  %v2167_v49 = vshrl.u32 %v5719_v21, 16 }
 0x187   : > { %2216 = vrot.lane.b32.xlu0 %v2133_v45, %s6625_s28  ;;  %v2170_v45 = vshll.u32 %v5719_v21, 16  ;;  %v2175_v21 = vshrl.u32 %v5720_v50, 16 }
 0x188   : > { %v2169_v54 = vrot.slane %v2167_v49, 4  ;;  %v2180_v49 = vrot.slane %v2178_v41, 5 }
 0x189   : > { %v2172_v18 = vrot.slane %v2170_v45, 5  ;;  %v6485_v45 = vld [vmem:[#allocation2 + $0x150] ss:$0 sps:$4 sm:$0x11]  }
 0x18a   : > { %2218 = vrot.lane.b32.xlu1 %v2141_v47, %s6625_s28  ;;  %v7419_v47 = vld [vmem:[#allocation2 + $0x14c] sm:$0xf] }
 0x18b   : > { %2391 = vrot.lane.b32.xlu0 %v2325_v30, %s6624_s29  ;;  %v6484_v30 = vld [vmem:[#allocation2 + $0x13c] ss:$0 sps:$4 sm:$0x11]   ;;  %v5721_v8 = vcombine.low %v7425_v2, %v7419_v47  ;;  %v2173_v7 = vor.u32 %v2172_v18, %v2169_v54  ;;  %v2338_v18 = vrot.slane %v6485_v45, 5  ;;  %v1826_v45 = vld [vmem:[#allocation2 + $0x2c] sm:$0x8] }
 0x18c   : > { %v2335_v17 = vrot.slane %v6484_v30, 5  ;;  %v6487_v30 = vld [vmem:[#allocation2 + $0x10] ss:$0 sps:$4 sm:$0x11]  }
 0x18d   : > { %v2183_v56 = vshrl.u32 %v5721_v8, 16  ;;  %v2186_v62 = vshll.u32 %v5721_v8, 16 }
 0x18e   : > { %2393 = vrot.lane.b32.xlu1 %v2327_v15, %s6624_s29  ;;  %v2330_v15 = vsel %vm2288_vm9, %v2328_v46, %v2329_v38  ;;  %v2177_v38 = vrot.slane %v2175_v21, 4 }
 0x18f   : > { %2387 = vrot.lane.b32.xlu0 %v2322_v20, %s6624_s29  ;;  %v2165_v20 = vor.u32 %v2164_v13, %v2161_v33  ;;  %v2185_v0 = vrot.slane %v2183_v56, 4  ;;  %v2188_v6 = vrot.slane %v2186_v62, 5  ;;  %v2290_v56 = vrot.slane %v6487_v30, 5 }
 0x190   : > { %v2181_v54 = vor.u32 %v2180_v49, %v2177_v38 }
 0x191   : > { %v2189_v13 = vor.u32 %v2188_v6, %v2185_v0 }
 0x192   : > { %2389 = vrot.lane.b32.xlu1 %v2324_v1, %s6624_s29  ;;  %v2337_v1 = vrot.slane %v5721_v8, 5 }
 0x193   : > { %2220 = vrot.lane.b32.xlu0 %v2149_v9, %s6625_s28  ;;  %v2334_v9 = vrot.slane %v5720_v50, 5  ;;  %v7460_v50 = vld [vmem:[%s8804_s3 + $0x40] sm:$0xff]  }
 0x194   : > { %6238 = vmatprep.subr.bf16.mxu1 %v7460_v50  ;;  %v2339_v62 = vsel %vm2288_vm9, %v2337_v1, %v2338_v18 }
 0x195   : > { %v2336_v39 = vsel %vm2288_vm9, %v2334_v9, %v2335_v17  ;;  %v6495_v17 = vld [vmem:[%s8804_s3 + $0x8] sm:$0xff]  }
 0x196   : > { %2222 = vrot.lane.b32.xlu1 %v2157_v32, %s6625_s28  ;;  %v2058_v32 = vshll.u32 %v5705_v12, 16 }
 0x197   : > { %2399 = vrot.lane.b32.xlu0 %v2331_v22, %s6624_s29  ;;  %v7446_v22 = vld [vmem:[#allocation2 + $0x160] sm:$0xf] }
 0x198   : > { %v2060_v33 = vrot.slane %v2058_v32, 5  ;;  %v6492_v32 = vld [vmem:[#allocation2 + $0x164] ss:$0 sps:$4 sm:$0x11]  }
 0x199   : > { %v2341_v6 = vrot.slane %v6492_v32, 5 }
 0x19a   : > { %2401 = vrot.lane.b32.xlu1 %v2333_v3, %s6624_s29  ;;  %v5722_v3 = vcombine.low %v7444_v40, %v7446_v22 }
 0x19b   : > { %2395 = vrot.lane.b32.xlu0 %v2328_v46, %s6624_s29  ;;  %v2057_v46 = vrot.slane %v2055_v60, 4  ;;  %v6497_v60 = vld [vmem:[%s8804_s3] sm:$0xff]  }
 0x19c   : > { %v2191_v8 = vshrl.u32 %v5722_v3, 16 }
 0x19e   : > { %2397 = vrot.lane.b32.xlu1 %v2330_v15, %s6624_s29  ;;  %v2194_v15 = vshll.u32 %v5722_v3, 16  ;;  %v2193_v21 = vrot.slane %v2191_v8, 4 }
 0x19f   : > { %2224 = vrot.lane.b32.xlu0 %v2165_v20, %s6625_s28  ;;  %v6493_v20 = vld [vmem:[%s8804_s3 + $0x10] sm:$0xff]  }
 0x1a0   : > { %6200 = vmatprep.subr.bf16.mxu0 %v6493_v20  ;;  %v2196_v41 = vrot.slane %v2194_v15, 5  ;;  %v1823_v15 = vld [vmem:[#allocation2 + $0x18] sm:$0x8] }
 0x1a1   : > { %6201 = vmatpush3.bf16.msra.mxu0 %v6493_v20 }
 0x1a2   : > { %2226 = vrot.lane.b32.xlu1 %v2173_v7, %s6625_s28  ;;  %v2061_v7 = vor.u32 %v2060_v33, %v2057_v46  ;;  %6202 = vmatprep.subr.bf16.mxu0 %v6495_v17  ;;  %v5673_v46 = vcombine.low %v1826_v45, %v7137_v5  ;;  %v5672_v5 = vcombine.low %v7178_v52, %v7178_v52 }
 0x1a3   : > { %2407 = vrot.lane.b32.xlu0 %v2337_v1, %s6624_s29  ;;  %v2197_v1 = vor.u32 %v2196_v41, %v2193_v21 }
 0x1a5   : > { %6203 = vmatpush3.bf16.msra.mxu0 %v6495_v17 }
 0x1a6   : > { %2405 = vrot.lane.b32.xlu1 %v2336_v39, %s6624_s29  ;;  %6204 = vmatprep.subr.bf16.mxu0 %v6497_v60 }
 0x1a7   : > { %2403 = vrot.lane.b32.xlu0 %v2334_v9, %s6624_s29  ;;  %v2289_v9 = vrot.slane %v5705_v12, 5  ;;  %v2340_v12 = vrot.slane %v5722_v3, 5  ;;  %v5674_v3 = vcombine.low %v7131_v63, %v7131_v63  ;;  %v5671_v63 = vcombine.low %v1823_v15, %v7185_v31 }
 0x1a9   : > { %v2291_v0 = vsel %vm2288_vm9, %v2289_v9, %v2290_v56  ;;  %6205 = vmatpush3.bf16.msra.mxu0 %v6497_v60  ;;  %v2342_v39 = vsel %vm2288_vm9, %v2340_v12, %v2341_v6  ;;  %vm3918_vm9 = vcmask 64512  }
 0x1aa   : > { %2230 = vrot.lane.b32.xlu1 %v2189_v13, %s6625_s28 }
 0x1ab   : > { %2228 = vrot.lane.b32.xlu0 %v2181_v54, %s6625_s28 }
 0x1ae   : > { %2409 = vrot.lane.b32.xlu1 %v2339_v62, %s6624_s29 }
 0x1af   : > { %2198 = vrot.lane.b32.xlu0 %v2061_v7, %s6625_s28 }
 0x1b2   : > { %2343 = vrot.lane.b32.xlu1 %v2289_v9, %s6624_s29 }
 0x1b3   : > { %2345 = vrot.lane.b32.xlu0 %v2291_v0, %s6624_s29 }
 0x1b5   : > { %v2352_v38 = vpop.permute.xlu0 %2351 }
 0x1b6   : > { %2232 = vrot.lane.b32.xlu1 %v2197_v1, %s6625_s28  ;;  %v2354_v49 = vpop.permute.xlu1 %2353 }
 0x1b7   : > { %2411 = vrot.lane.b32.xlu0 %v2340_v12, %s6624_s29 }
 0x1ba   : > { %2413 = vrot.lane.b32.xlu1 %v2342_v39, %s6624_s29 }
 0x1c0   : > { %v2203_v33 = vpop.permute.xlu0 %2202 }
 0x1c1   : > { %v2428_v13 = vsel %vm2415_vm10, %v5673_v46, %v2203_v33  ;;  %v2430_v30 = vsel %vm2415_vm10, %v5674_v3, %v2203_v33  ;;  %v2348_v54 = vpop.permute.xlu1 %2347 }
 0x1c2   : > { %v2516_v18 = vsel %vm2506_vm11, %v2428_v13, %v2352_v38  ;;  %v2518_v8 = vsel %vm2506_vm11, %v2430_v30, %v2354_v49 }
 0x1c3   : > { %v2610_v20 = vshrl.u32 %v2516_v18, 16  ;;  %v2613_v7 = vshll.u32 %v2516_v18, 16  ;;  %v2617_v17 = vshrl.u32 %v2518_v8, 16  ;;  %v2620_v56 = vshll.u32 %v2518_v8, 16 }
 0x1c5   : > { %v2350_v62 = vpop.permute.xlu1 %2349  ;;  %v2612_v21 = vrot.slane %v2610_v20, 3  ;;  %v2615_v41 = vrot.slane %v2613_v7, 4  ;;  %v2619_v0 = vrot.slane %v2617_v17, 3  ;;  %v2622_v1 = vrot.slane %v2620_v56, 4  ;;  %v1829_v7 = vld [vmem:[#allocation2 + $0x40] sm:$0x8] }
 0x1c6   : > { %v2201_v9 = vpop.permute.xlu0 %2200  ;;  %v6496_v17 = vld [vmem:[%s8804_s3 + $0x38] sm:$0xff]  }
 0x1c7   : > { %v2423_v60 = vsel %vm2415_vm10, %v5671_v63, %v2201_v9  ;;  %v2425_v32 = vsel %vm2415_vm10, %v5672_v5, %v2201_v9  ;;  %v2616_v30 = vor.u32 %v2615_v41, %v2612_v21  ;;  %v2623_v18 = vor.u32 %v2622_v1, %v2619_v0  ;;  %v1832_v9 = vld [vmem:[#allocation2 + $0x54] sm:$0x8] }
 0x1c8   : > { %v2512_v12 = vsel %vm2506_vm11, %v2423_v60, %v2348_v54  ;;  %v2514_v6 = vsel %vm2506_vm11, %v2425_v32, %v2350_v62  ;;  %v5675_v63 = vcombine.low %v1829_v7, %v7234_v25  ;;  %v5676_v62 = vcombine.low %v7225_v35, %v7225_v35  ;;  %v6498_v41 = vld [vmem:[%s8804_s3 + $0x30] sm:$0xff]  }
 0x1c9   : > { %v2595_v39 = vshrl.u32 %v2512_v12, 16  ;;  %v2598_v38 = vshll.u32 %v2512_v12, 16  ;;  %v2602_v49 = vshrl.u32 %v2514_v6, 16  ;;  %v2605_v52 = vshll.u32 %v2514_v6, 16  ;;  %v2362_v31 = vpop.permute.xlu1 %2361 }
 0x1ca   : > { %v2360_v45 = vpop.permute.xlu0 %2359  ;;  %v7503_v5 = vsel %vm2579_vm12, %v2616_v30, %v2623_v18  ;;  %v5677_v1 = vcombine.low %v1832_v9, %v7217_v23  ;;  %v5678_v35 = vcombine.low %v7208_v61, %v7208_v61 }
 0x1cb   : > { %v2597_v46 = vrot.slane %v2595_v39, 3  ;;  %v2600_v3 = vrot.slane %v2598_v38, 4  ;;  %v2604_v33 = vrot.slane %v2602_v49, 3  ;;  %v2607_v13 = vrot.slane %v2605_v52, 4 }
 0x1cd   : > { %v2608_v8 = vor.u32 %v2607_v13, %v2604_v33  ;;  %v2601_v15 = vor.u32 %v2600_v3, %v2597_v46  ;;  %v2358_v56 = vpop.permute.xlu1 %2357 }
 0x1ce   : > { %v2356_v20 = vpop.permute.xlu0 %2355 }
 0x1cf   : > { %v7495_v54 = vsel %vm2579_vm12, %v2601_v15, %v2608_v8 }
 0x1d0   : > { %6168 = vmatprep.mubr.msk.bf16.mxu1 %vm2866_vm13, %v7495_v54 }
 0x1d1   : > { %6169 = vmatmul.mubr.msk.bf16.vlgmr.msra.gmra.mxu1 %vm2866_vm13, %v7503_v5 }
 0x1d2   : > { %6239 = vmatpush3.bf16.msra.mxu1 %v7460_v50 }
 0x1d3   : > { %v2205_v21 = vpop.permute.xlu0 %2204  ;;  %6240 = vmatprep.subr.bf16.mxu1 %v6496_v17 }
 0x1d4   : > { %v2433_v60 = vsel %vm2415_vm10, %v5675_v63, %v2205_v21  ;;  %v2435_v32 = vsel %vm2415_vm10, %v5676_v62, %v2205_v21 }
 0x1d5   : > { %v2520_v0 = vsel %vm2506_vm11, %v2433_v60, %v2356_v20  ;;  %v2522_v25 = vsel %vm2506_vm11, %v2435_v32, %v2358_v56 }
 0x1d6   : > { %v2625_v50 = vshrl.u32 %v2520_v0, 16  ;;  %v2628_v12 = vshll.u32 %v2520_v0, 16  ;;  %v2632_v6 = vshrl.u32 %v2522_v25, 16  ;;  %v2635_v39 = vshll.u32 %v2522_v25, 16  ;;  %v2207_v38 = vpop.permute.xlu1 %2206  ;;  %6241 = vmatpush3.bf16.msra.mxu1 %v6496_v17  ;;  %v1835_v0 = vld [vmem:[#allocation2 + $0x68] sm:$0x8] }
 0x1d7   : > { %v2438_v49 = vsel %vm2415_vm10, %v5677_v1, %v2207_v38  ;;  %v2440_v52 = vsel %vm2415_vm10, %v5678_v35, %v2207_v38  ;;  %v2368_v46 = vpop.permute.xlu0 %2367  ;;  %6242 = vmatprep.subr.bf16.mxu1 %v6498_v41  ;;  %v5680_v35 = vcombine.low %v7287_v53, %v7287_v53 }
 0x1d8   : > { %v2627_v3 = vrot.slane %v2625_v50, 3  ;;  %v2630_v33 = vrot.slane %v2628_v12, 4  ;;  %v2634_v13 = vrot.slane %v2632_v6, 3  ;;  %v2637_v30 = vrot.slane %v2635_v39, 4  ;;  %v1838_v50 = vld [vmem:[#allocation2 + $0x7c] sm:$0x8] }
 0x1d9   : > { %v2524_v23 = vsel %vm2506_vm11, %v2438_v49, %v2360_v45  ;;  %v2526_v61 = vsel %vm2506_vm11, %v2440_v52, %v2362_v31  ;;  %v5681_v52 = vcombine.low %v1838_v50, %v7279_v59 }
 0x1da   : > { %v2640_v18 = vshrl.u32 %v2524_v23, 16  ;;  %v2643_v8 = vshll.u32 %v2524_v23, 16  ;;  %v2647_v15 = vshrl.u32 %v2526_v61, 16  ;;  %v2650_v20 = vshll.u32 %v2526_v61, 16  ;;  %v2370_v7 = vpop.permute.xlu1 %2369  ;;  %6243 = vmatpush3.bf16.msra.mxu1 %v6498_v41 }
 0x1db   : > { %v2364_v17 = vpop.permute.xlu0 %2363  ;;  %v2631_v56 = vor.u32 %v2630_v33, %v2627_v3  ;;  %v2638_v63 = vor.u32 %v2637_v30, %v2634_v13  ;;  %v5679_v41 = vcombine.low %v1835_v0, %v7294_v26  ;;  %v5682_v26 = vcombine.low %v7271_v55, %v7271_v55 }
 0x1dc   : > { %v2642_v62 = vrot.slane %v2640_v18, 3  ;;  %v2645_v9 = vrot.slane %v2643_v8, 4  ;;  %v2649_v21 = vrot.slane %v2647_v15, 3  ;;  %v2652_v60 = vrot.slane %v2650_v20, 4 }
 0x1dd   : > { %v7526_v32 = vsel %vm2579_vm12, %v2631_v56, %v2638_v63 }
 0x1de   : > { %v2366_v45 = vpop.permute.xlu1 %2365  ;;  %6172 = vmatprep.mubr.msk.bf16.mxu1 %vm2866_vm13, %v7526_v32  ;;  %v2646_v31 = vor.u32 %v2645_v9, %v2642_v62  ;;  %v2653_v25 = vor.u32 %v2652_v60, %v2649_v21 }
 0x1e0   : > { %v7531_v1 = vsel %vm2579_vm12, %v2646_v31, %v2653_v25  ;;  %v1841_v31 = vld [vmem:[#allocation2 + $0x90] sm:$0x8] }
 0x1e1   : > { %6173 = vmatmul.mubr.msk.bf16.gmra.mxu1 %vm2866_vm13, %v7531_v1  ;;  %v2209_v12 = vpop.permute.xlu0 %2208 }
 0x1e2   : > { %v2443_v6 = vsel %vm2415_vm10, %v5679_v41, %v2209_v12  ;;  %v2445_v39 = vsel %vm2415_vm10, %v5680_v35, %v2209_v12 }
 0x1e3   : > { %v2528_v38 = vsel %vm2506_vm11, %v2443_v6, %v2364_v17  ;;  %v2530_v49 = vsel %vm2506_vm11, %v2445_v39, %v2366_v45  ;;  %v5683_v39 = vcombine.low %v1841_v31, %v7340_v36 }
 0x1e4   : > { %v2655_v3 = vshrl.u32 %v2528_v38, 16  ;;  %v2658_v53 = vshll.u32 %v2528_v38, 16  ;;  %v2662_v33 = vshrl.u32 %v2530_v49, 16  ;;  %v2665_v13 = vshll.u32 %v2530_v49, 16  ;;  %v2211_v30 = vpop.permute.xlu1 %2210  ;;  %v1844_v49 = vld [vmem:[#allocation2 + $0xa4] sm:$0x8] }
 0x1e5   : > { %v2448_v23 = vsel %vm2415_vm10, %v5681_v52, %v2211_v30  ;;  %v2450_v61 = vsel %vm2415_vm10, %v5682_v26, %v2211_v30  ;;  %v2376_v18 = vpop.permute.xlu0 %2375  ;;  %v5684_v38 = vcombine.low %v7333_v28, %v7333_v28  ;;  %v5685_v36 = vcombine.low %v1844_v49, %v7331_v34 }
 0x1e6   : > { %v2657_v8 = vrot.slane %v2655_v3, 3  ;;  %v2660_v15 = vrot.slane %v2658_v53, 4  ;;  %v2664_v20 = vrot.slane %v2662_v33, 3  ;;  %v2667_v17 = vrot.slane %v2665_v13, 4 }
 0x1e7   : > { %v2532_v56 = vsel %vm2506_vm11, %v2448_v23, %v2368_v46  ;;  %v2534_v59 = vsel %vm2506_vm11, %v2450_v61, %v2370_v7  ;;  %v5686_v28 = vcombine.low %v7322_v37, %v7322_v37 }
 0x1e8   : > { %v2670_v63 = vshrl.u32 %v2532_v56, 16  ;;  %v2673_v55 = vshll.u32 %v2532_v56, 16  ;;  %v2677_v62 = vshrl.u32 %v2534_v59, 16  ;;  %v2680_v9 = vshll.u32 %v2534_v59, 16  ;;  %v2378_v21 = vpop.permute.xlu1 %2377 }
 0x1e9   : > { %v2372_v60 = vpop.permute.xlu0 %2371  ;;  %v2661_v0 = vor.u32 %v2660_v15, %v2657_v8  ;;  %v2668_v45 = vor.u32 %v2667_v17, %v2664_v20 }
 0x1ea   : > { %v2672_v25 = vrot.slane %v2670_v63, 3  ;;  %v2675_v41 = vrot.slane %v2673_v55, 4  ;;  %v2679_v35 = vrot.slane %v2677_v62, 3  ;;  %v2682_v50 = vrot.slane %v2680_v9, 4 }
 0x1eb   : > { %v7550_v12 = vsel %vm2579_vm12, %v2661_v0, %v2668_v45 }
 0x1ec   : > { %v2374_v6 = vpop.permute.xlu1 %2373  ;;  %6176 = vmatprep.mubr.msk.bf16.mxu1 %vm2866_vm13, %v7550_v12  ;;  %v2676_v46 = vor.u32 %v2675_v41, %v2672_v25  ;;  %v2683_v7 = vor.u32 %v2682_v50, %v2679_v35  ;;  %v1847_v50 = vld [vmem:[#allocation2 + $0xb8] sm:$0x8] }
 0x1ed   : > { %v2213_v52 = vpop.permute.xlu0 %2212 }
 0x1ee   : > { %v7558_v26 = vsel %vm2579_vm12, %v2676_v46, %v2683_v7  ;;  %v2453_v3 = vsel %vm2415_vm10, %v5683_v39, %v2213_v52  ;;  %v2455_v53 = vsel %vm2415_vm10, %v5684_v38, %v2213_v52  ;;  %v5687_v52 = vcombine.low %v1847_v50, %v7363_v42 }
 0x1ef   : > { %6177 = vmatmul.mubr.msk.bf16.gmra.mxu1 %vm2866_vm13, %v7558_v26  ;;  %v2536_v33 = vsel %vm2506_vm11, %v2453_v3, %v2372_v60  ;;  %v2538_v13 = vsel %vm2506_vm11, %v2455_v53, %v2374_v6  ;;  %v5688_v3 = vcombine.low %v7358_v16, %v7358_v16  ;;  %v1850_v53 = vld [vmem:[#allocation2 + $0xcc] sm:$0x8]  ;;  %v5690_v16 = vcombine.low %v7356_v29, %v7356_v29 }
 0x1f0   : > { %v2685_v30 = vshrl.u32 %v2536_v33, 16  ;;  %v2688_v23 = vshll.u32 %v2536_v33, 16  ;;  %v2692_v61 = vshrl.u32 %v2538_v13, 16  ;;  %v2695_v8 = vshll.u32 %v2538_v13, 16  ;;  %v2215_v15 = vpop.permute.xlu1 %2214 }
 0x1f1   : > { %v2458_v20 = vsel %vm2415_vm10, %v5685_v36, %v2215_v15  ;;  %v2460_v17 = vsel %vm2415_vm10, %v5686_v28, %v2215_v15  ;;  %v2384_v56 = vpop.permute.xlu0 %2383  ;;  %v5689_v42 = vcombine.low %v1850_v53, %v7361_v58  ;;  %v5692_v53 = vcombine.low %v7378_v24, %v7378_v24 }
 0x1f2   : > { %v2687_v59 = vrot.slane %v2685_v30, 3  ;;  %v2690_v63 = vrot.slane %v2688_v23, 4  ;;  %v2694_v55 = vrot.slane %v2692_v61, 3  ;;  %v2697_v62 = vrot.slane %v2695_v8, 4 }
 0x1f3   : > { %v2540_v9 = vsel %vm2506_vm11, %v2458_v20, %v2376_v18  ;;  %v2542_v34 = vsel %vm2506_vm11, %v2460_v17, %v2378_v21 }
 0x1f4   : > { %v2700_v60 = vshrl.u32 %v2540_v9, 16  ;;  %v2703_v37 = vshll.u32 %v2540_v9, 16  ;;  %v2707_v0 = vshrl.u32 %v2542_v34, 16  ;;  %v2710_v45 = vshll.u32 %v2542_v34, 16  ;;  %v2386_v31 = vpop.permute.xlu1 %2385 }
 0x1f5   : > { %v2380_v25 = vpop.permute.xlu0 %2379  ;;  %v2691_v41 = vor.u32 %v2690_v63, %v2687_v59  ;;  %v2698_v35 = vor.u32 %v2697_v62, %v2694_v55 }
 0x1f6   : > { %v2702_v6 = vrot.slane %v2700_v60, 3  ;;  %v2705_v46 = vrot.slane %v2703_v37, 4  ;;  %v2709_v7 = vrot.slane %v2707_v0, 3  ;;  %v2712_v39 = vrot.slane %v2710_v45, 4 }
 0x1f7   : > { %v7574_v38 = vsel %vm2579_vm12, %v2691_v41, %v2698_v35 }
 0x1f8   : > { %v2382_v49 = vpop.permute.xlu1 %2381  ;;  %6180 = vmatprep.mubr.msk.bf16.mxu1 %vm2866_vm13, %v7574_v38  ;;  %v2706_v18 = vor.u32 %v2705_v46, %v2702_v6  ;;  %v2713_v21 = vor.u32 %v2712_v39, %v2709_v7  ;;  %v1853_v46 = vld [vmem:[#allocation2 + $0xe0] sm:$0x8] }
 0x1f9   : > { %v2217_v33 = vpop.permute.xlu0 %2216 }
 0x1fa   : > { %v7582_v13 = vsel %vm2579_vm12, %v2706_v18, %v2713_v21  ;;  %v2463_v36 = vsel %vm2415_vm10, %v5687_v52, %v2217_v33  ;;  %v2465_v28 = vsel %vm2415_vm10, %v5688_v3, %v2217_v33  ;;  %v5691_v3 = vcombine.low %v1853_v46, %v7383_v10  ;;  %v1859_v46 = vld [vmem:[#allocation2 + $0x108] sm:$0x8] }
 0x1fb   : > { %6181 = vmatmul.mubr.msk.bf16.gmra.mxu1 %vm2866_vm13, %v7582_v13  ;;  %v2544_v30 = vsel %vm2506_vm11, %v2463_v36, %v2380_v25  ;;  %v2546_v23 = vsel %vm2506_vm11, %v2465_v28, %v2382_v49  ;;  %v5694_v10 = vcombine.low %v7376_v48, %v7376_v48 }
 0x1fc   : > { %v2715_v61 = vshrl.u32 %v2544_v30, 16  ;;  %v2718_v8 = vshll.u32 %v2544_v30, 16  ;;  %v2722_v15 = vshrl.u32 %v2546_v23, 16  ;;  %v2725_v20 = vshll.u32 %v2546_v23, 16  ;;  %v2219_v17 = vpop.permute.xlu1 %2218 }
 0x1fd   : > { %v2468_v59 = vsel %vm2415_vm10, %v5689_v42, %v2219_v17  ;;  %v2470_v63 = vsel %vm2415_vm10, %v5690_v16, %v2219_v17  ;;  %v2392_v55 = vpop.permute.xlu0 %2391 }
 0x1fe   : > { %v2717_v62 = vrot.slane %v2715_v61, 3  ;;  %v2720_v9 = vrot.slane %v2718_v8, 4  ;;  %v2724_v34 = vrot.slane %v2722_v15, 3  ;;  %v2727_v60 = vrot.slane %v2725_v20, 4 }
 0x1ff   : > { %v2548_v37 = vsel %vm2506_vm11, %v2468_v59, %v2384_v56  ;;  %v2550_v58 = vsel %vm2506_vm11, %v2470_v63, %v2386_v31  ;;  %v1856_v56 = vld [vmem:[#allocation2 + $0xf4] sm:$0x8] }
 0x200   : > { %v2721_v0 = vor.u32 %v2720_v9, %v2717_v62  ;;  %v2728_v29 = vor.u32 %v2727_v60, %v2724_v34  ;;  %v2730_v45 = vshrl.u32 %v2548_v37, 16  ;;  %v2733_v25 = vshll.u32 %v2548_v37, 16  ;;  %v2394_v41 = vpop.permute.xlu1 %2393 }
 0x201   : > { %v2737_v35 = vshrl.u32 %v2550_v58, 16  ;;  %v2740_v50 = vshll.u32 %v2550_v58, 16  ;;  %v2388_v6 = vpop.permute.xlu0 %2387  ;;  %v5693_v23 = vcombine.low %v1856_v56, %v7381_v51 }
 0x202   : > { %v2732_v7 = vrot.slane %v2730_v45, 3  ;;  %v2735_v39 = vrot.slane %v2733_v25, 4  ;;  %v7598_v49 = vsel %vm2579_vm12, %v2721_v0, %v2728_v29 }
 0x203   : > { %v2739_v18 = vrot.slane %v2737_v35, 3  ;;  %v2742_v21 = vrot.slane %v2740_v50, 4  ;;  %6184 = vmatprep.mubr.msk.bf16.mxu1 %vm2866_vm13, %v7598_v49 }
 0x204   : > { %v2390_v31 = vpop.permute.xlu1 %2389  ;;  %v2736_v52 = vor.u32 %v2735_v39, %v2732_v7 }
 0x205   : > { %v2743_v33 = vor.u32 %v2742_v21, %v2739_v18  ;;  %v2221_v36 = vpop.permute.xlu0 %2220 }
 0x206   : > { %v2473_v28 = vsel %vm2415_vm10, %v5691_v3, %v2221_v36  ;;  %v2475_v30 = vsel %vm2415_vm10, %v5692_v53, %v2221_v36  ;;  %v5696_v3 = vcombine.low %v7400_v11, %v7400_v11 }
 0x207   : > { %v7609_v42 = vsel %vm2579_vm12, %v2736_v52, %v2743_v33  ;;  %v2552_v16 = vsel %vm2506_vm11, %v2473_v28, %v2388_v6  ;;  %v2554_v61 = vsel %vm2506_vm11, %v2475_v30, %v2390_v31  ;;  %v5695_v52 = vcombine.low %v1859_v46, %v7405_v4 }
 0x208   : > { %6185 = vmatmul.mubr.msk.bf16.gmra.mxu1 %vm2866_vm13, %v7609_v42  ;;  %v2745_v24 = vshrl.u32 %v2552_v16, 16  ;;  %v2748_v8 = vshll.u32 %v2552_v16, 16  ;;  %v2752_v15 = vshrl.u32 %v2554_v61, 16  ;;  %v2755_v20 = vshll.u32 %v2554_v61, 16  ;;  %v2223_v17 = vpop.permute.xlu1 %2222 }
 0x209   : > { %v2478_v51 = vsel %vm2415_vm10, %v5693_v23, %v2223_v17  ;;  %v2480_v59 = vsel %vm2415_vm10, %v5694_v10, %v2223_v17  ;;  %v2400_v63 = vpop.permute.xlu0 %2399  ;;  %v5698_v4 = vcombine.low %v7398_v27, %v7398_v27 }
 0x20a   : > { %v2747_v62 = vrot.slane %v2745_v24, 3  ;;  %v2750_v9 = vrot.slane %v2748_v8, 4  ;;  %v2754_v34 = vrot.slane %v2752_v15, 3  ;;  %v2757_v60 = vrot.slane %v2755_v20, 4 }
 0x20b   : > { %v2556_v37 = vsel %vm2506_vm11, %v2478_v51, %v2392_v55  ;;  %v2558_v48 = vsel %vm2506_vm11, %v2480_v59, %v2394_v41  ;;  %v1862_v55 = vld [vmem:[#allocation2 + $0x11c] sm:$0x8] }
 0x20c   : > { %v2751_v58 = vor.u32 %v2750_v9, %v2747_v62  ;;  %v2758_v0 = vor.u32 %v2757_v60, %v2754_v34  ;;  %v2760_v29 = vshrl.u32 %v2556_v37, 16  ;;  %v2763_v45 = vshll.u32 %v2556_v37, 16  ;;  %v2402_v25 = vpop.permute.xlu1 %2401 }
 0x20d   : > { %v2767_v35 = vshrl.u32 %v2558_v48, 16  ;;  %v2770_v50 = vshll.u32 %v2558_v48, 16  ;;  %v2396_v6 = vpop.permute.xlu0 %2395  ;;  %v5697_v30 = vcombine.low %v1862_v55, %v7403_v57 }
 0x20e   : > { %v2762_v7 = vrot.slane %v2760_v29, 3  ;;  %v2765_v39 = vrot.slane %v2763_v45, 4  ;;  %v7622_v18 = vsel %vm2579_vm12, %v2751_v58, %v2758_v0  ;;  %v1868_v29 = vld [vmem:[#allocation2 + $0x144] sm:$0x8] }
 0x20f   : > { %v2769_v21 = vrot.slane %v2767_v35, 3  ;;  %v2772_v56 = vrot.slane %v2770_v50, 4  ;;  %6188 = vmatprep.mubr.msk.bf16.mxu1 %vm2866_vm13, %v7622_v18 }
 0x210   : > { %v2398_v41 = vpop.permute.xlu1 %2397  ;;  %v2766_v31 = vor.u32 %v2765_v39, %v2762_v7 }
 0x211   : > { %v2773_v53 = vor.u32 %v2772_v56, %v2769_v21  ;;  %v2225_v33 = vpop.permute.xlu0 %2224 }
 0x212   : > { %v2483_v36 = vsel %vm2415_vm10, %v5695_v52, %v2225_v33  ;;  %v2485_v28 = vsel %vm2415_vm10, %v5696_v3, %v2225_v33  ;;  %v5700_v52 = vcombine.low %v7422_v14, %v7422_v14 }
 0x213   : > { %v7633_v23 = vsel %vm2579_vm12, %v2766_v31, %v2773_v53  ;;  %v2560_v16 = vsel %vm2506_vm11, %v2483_v36, %v2396_v6  ;;  %v2562_v61 = vsel %vm2506_vm11, %v2485_v28, %v2398_v41  ;;  %v1865_v6 = vld [vmem:[#allocation2 + $0x130] sm:$0x8] }
 0x214   : > { %6189 = vmatmul.mubr.msk.bf16.gmra.mxu1 %vm2866_vm13, %v7633_v23  ;;  %v2775_v11 = vshrl.u32 %v2560_v16, 16  ;;  %v2778_v10 = vshll.u32 %v2560_v16, 16  ;;  %v2782_v24 = vshrl.u32 %v2562_v61, 16  ;;  %v2785_v8 = vshll.u32 %v2562_v61, 16  ;;  %v2227_v15 = vpop.permute.xlu1 %2226 }
 0x215   : > { %v2488_v57 = vsel %vm2415_vm10, %v5697_v30, %v2227_v15  ;;  %v2490_v20 = vsel %vm2415_vm10, %v5698_v4, %v2227_v15  ;;  %v2408_v17 = vpop.permute.xlu0 %2407  ;;  %v5699_v31 = vcombine.low %v1865_v6, %v7431_v44  ;;  %v5702_v16 = vcombine.low %v7419_v47, %v7419_v47 }
 0x216   : > { %v2777_v51 = vrot.slane %v2775_v11, 3  ;;  %v2780_v59 = vrot.slane %v2778_v10, 4  ;;  %v2784_v62 = vrot.slane %v2782_v24, 3  ;;  %v2787_v9 = vrot.slane %v2785_v8, 4 }
 0x217   : > { %v2564_v34 = vsel %vm2506_vm11, %v2488_v57, %v2400_v63  ;;  %v2566_v27 = vsel %vm2506_vm11, %v2490_v20, %v2402_v25  ;;  %v5701_v63 = vcombine.low %v1868_v29, %v7425_v2  ;;  %v1820_v25 = vld [vmem:[#allocation2 + $0x4] sm:$0x8]  ;;  %v5670_v47 = vcombine.low %v7433_v19, %v7433_v19 }
 0x218   : > { %v2781_v60 = vor.u32 %v2780_v59, %v2777_v51  ;;  %v2788_v37 = vor.u32 %v2787_v9, %v2784_v62  ;;  %v2790_v48 = vshrl.u32 %v2564_v34, 16  ;;  %v2793_v58 = vshll.u32 %v2564_v34, 16  ;;  %v2406_v0 = vpop.permute.xlu1 %2405 }
 0x219   : > { %v2797_v45 = vshrl.u32 %v2566_v27, 16  ;;  %v2800_v35 = vshll.u32 %v2566_v27, 16  ;;  %v2404_v50 = vpop.permute.xlu0 %2403  ;;  %v5669_v30 = vcombine.low %v1820_v25, %v7427_v43 }
 0x21a   : > { %v2792_v46 = vrot.slane %v2790_v48, 3  ;;  %v2795_v7 = vrot.slane %v2793_v58, 4  ;;  %v7646_v39 = vsel %vm2579_vm12, %v2781_v60, %v2788_v37 }
 0x21b   : > { %v2799_v21 = vrot.slane %v2797_v45, 3  ;;  %v2802_v56 = vrot.slane %v2800_v35, 4  ;;  %6192 = vmatprep.mubr.msk.bf16.mxu1 %vm2866_vm13, %v7646_v39 }
 0x21c   : > { %v2796_v55 = vor.u32 %v2795_v7, %v2792_v46  ;;  %v2231_v41 = vpop.permute.xlu1 %2230 }
 0x21d   : > { %v2803_v3 = vor.u32 %v2802_v56, %v2799_v21  ;;  %v2498_v53 = vsel %vm2415_vm10, %v5701_v63, %v2231_v41  ;;  %v2229_v33 = vpop.permute.xlu0 %2228  ;;  %v2500_v43 = vsel %vm2415_vm10, %v5702_v16, %v2231_v41 }
 0x21e   : > { %v2572_v36 = vsel %vm2506_vm11, %v2498_v53, %v2408_v17  ;;  %v2493_v28 = vsel %vm2415_vm10, %v5699_v31, %v2229_v33  ;;  %v2495_v2 = vsel %vm2415_vm10, %v5700_v52, %v2229_v33 }
 0x21f   : > { %v2826_v61 = vshrl.u32 %v2572_v36, 16  ;;  %v7662_v44 = vsel %vm2579_vm12, %v2796_v55, %v2803_v3  ;;  %v2568_v14 = vsel %vm2506_vm11, %v2493_v28, %v2404_v50  ;;  %v2829_v4 = vshll.u32 %v2572_v36, 16 }
 0x220   : > { %6193 = vmatmul.mubr.msk.bf16.gmra.mxu1 %vm2866_vm13, %v7662_v44  ;;  %v2570_v11 = vsel %vm2506_vm11, %v2495_v2, %v2406_v0  ;;  %v2805_v10 = vshrl.u32 %v2568_v14, 16  ;;  %v2808_v24 = vshll.u32 %v2568_v14, 16  ;;  %v2410_v8 = vpop.permute.xlu1 %2409 }
 0x221   : > { %v2812_v15 = vshrl.u32 %v2570_v11, 16  ;;  %v2815_v57 = vshll.u32 %v2570_v11, 16  ;;  %v2199_v20 = vpop.permute.xlu0 %2198  ;;  %v2574_v59 = vsel %vm2506_vm11, %v2500_v43, %v2410_v8  ;;  %v2828_v60 = vrot.slane %v2826_v61, 3 }
 0x222   : > { %v2807_v17 = vrot.slane %v2805_v10, 3  ;;  %v2810_v51 = vrot.slane %v2808_v24, 4  ;;  %v2418_v62 = vsel %vm2415_vm10, %v5669_v30, %v2199_v20  ;;  %v2833_v27 = vshrl.u32 %v2574_v59, 16 }
 0x223   : > { %v2814_v9 = vrot.slane %v2812_v15, 3  ;;  %v2817_v34 = vrot.slane %v2815_v57, 4  ;;  %v2831_v37 = vrot.slane %v2829_v4, 4  ;;  %v2836_v58 = vshll.u32 %v2574_v59, 16 }
 0x224   : > { %v2811_v48 = vor.u32 %v2810_v51, %v2807_v17  ;;  %v2344_v0 = vpop.permute.xlu1 %2343  ;;  %v2835_v45 = vrot.slane %v2833_v27, 3  ;;  %v2420_v35 = vsel %vm2415_vm10, %v5670_v47, %v2199_v20 }
 0x225   : > { %v2818_v29 = vor.u32 %v2817_v34, %v2814_v9  ;;  %v2508_v19 = vsel %vm2506_vm11, %v2418_v62, %v2344_v0  ;;  %v2346_v50 = vpop.permute.xlu0 %2345  ;;  %v2838_v6 = vrot.slane %v2836_v58, 4  ;;  %v2832_v55 = vor.u32 %v2831_v37, %v2828_v60 }
 0x226   : > { %v2580_v46 = vshrl.u32 %v2508_v19, 16  ;;  %v2583_v7 = vshll.u32 %v2508_v19, 16  ;;  %v2510_v21 = vsel %vm2506_vm11, %v2420_v35, %v2346_v50 }
 0x227   : > { %v2587_v56 = vshrl.u32 %v2510_v21, 16  ;;  %v2590_v63 = vshll.u32 %v2510_v21, 16  ;;  %v7677_v25 = vsel %vm2579_vm12, %v2811_v48, %v2818_v29  ;;  %v2839_v41 = vor.u32 %v2838_v6, %v2835_v45 }
 0x228   : > { %v2582_v31 = vrot.slane %v2580_v46, 3  ;;  %v2585_v52 = vrot.slane %v2583_v7, 4  ;;  %6196 = vmatprep.mubr.msk.bf16.mxu1 %vm2866_vm13, %v7677_v25 }
 0x229   : > { %v2589_v3 = vrot.slane %v2587_v56, 3  ;;  %v2592_v53 = vrot.slane %v2590_v63, 4  ;;  %v2840_v33 = vsel %vm2579_vm12, %v2832_v55, %v2839_v41 }
 0x22a   : > { %v2586_v36 = vor.u32 %v2585_v52, %v2582_v31  ;;  %6197 = vmatmul.mubr.msk.bf16.gmra.mxu1 %vm2866_vm13, %v2840_v33 }
 0x22b   : > { %v2593_v28 = vor.u32 %v2592_v53, %v2589_v3  ;;  %6244 = vmatprep.mubr.msk.bf16.mxu1 %vm2866_vm13, %v7503_v5  ;;  %v7806_v53 = vld [vmem:[%s8805_s4 + $0x3] ss:$0 sm:$0xff] }
 0x22d   : > { %v2594_v2 = vsel %vm2579_vm12, %v2586_v36, %v2593_v28 }
 0x22e   : > { %6206 = vmatprep.mubr.msk.bf16.mxu0 %vm2866_vm13, %v2594_v2 }
 0x22f   : > { %6207 = vmatmul.mubr.msk.bf16.vlgmr.msra.gmra.mxu0 %vm2866_vm13, %v7495_v54  ;;  %v1871_v54 = vld [vmem:[#allocation2 + $0x158] sm:$0x8] }
 0x230   : > { %6210 = vmatprep.mubr.msk.bf16.mxu0 %vm2866_vm13, %v7503_v5  ;;  %v2233_v5 = vpop.permute.xlu1 %2232 }
 0x232   : > { %6245 = vmatmul.mubr.msk.bf16.vlgmr.msra.gmra.mxu1 %vm2866_vm13, %v7526_v32 }
 0x233   : > { %6248 = vmatprep.mubr.msk.bf16.mxu1 %vm2866_vm13, %v7531_v1 }
 0x237   : > { %6211 = vmatmul.mubr.msk.bf16.gmra.mxu0 %vm2866_vm13, %v7526_v32  ;;  %v5703_v32 = vcombine.low %v1871_v54, %v7444_v40 }
 0x238   : > { %6214 = vmatprep.mubr.msk.bf16.mxu0 %vm2866_vm13, %v7531_v1  ;;  %v5704_v1 = vcombine.low %v7446_v22, %v7446_v22 }
 0x23a   : > { %6249 = vmatmul.mubr.msk.bf16.gmra.mxu1 %vm2866_vm13, %v7550_v12 }
 0x23b   : > { %6252 = vmatprep.mubr.msk.bf16.mxu1 %vm2866_vm13, %v7558_v26 }
 0x23f   : > { %6215 = vmatmul.mubr.msk.bf16.gmra.mxu0 %vm2866_vm13, %v7550_v12  ;;  %v2503_v12 = vsel %vm2415_vm10, %v5703_v32, %v2233_v5 }
 0x240   : > { %6218 = vmatprep.mubr.msk.bf16.mxu0 %vm2866_vm13, %v7558_v26  ;;  %v2505_v26 = vsel %vm2415_vm10, %v5704_v1, %v2233_v5 }
 0x242   : > { %6253 = vmatmul.mubr.msk.bf16.gmra.mxu1 %vm2866_vm13, %v7574_v38 }
 0x243   : > { %6256 = vmatprep.mubr.msk.bf16.mxu1 %vm2866_vm13, %v7582_v13 }
 0x247   : > { %6219 = vmatmul.mubr.msk.bf16.gmra.mxu0 %vm2866_vm13, %v7574_v38  ;;  %v2414_v38 = vpop.permute.xlu1 %2413 }
 0x248   : > { %6222 = vmatprep.mubr.msk.bf16.mxu0 %vm2866_vm13, %v7582_v13  ;;  %v2412_v13 = vpop.permute.xlu0 %2411  ;;  %v2578_v40 = vsel %vm2506_vm11, %v2505_v26, %v2414_v38 }
 0x249   : > { %v2576_v22 = vsel %vm2506_vm11, %v2503_v12, %v2412_v13 }
 0x24a   : > { %6257 = vmatmul.mubr.msk.bf16.gmra.mxu1 %vm2866_vm13, %v7598_v49  ;;  %v3258_v30 = vshrl.u32 %v2576_v22, 16  ;;  %v3261_v16 = vshll.u32 %v2576_v22, 16 }
 0x24b   : > { %6260 = vmatprep.mubr.msk.bf16.mxu1 %vm2866_vm13, %v7609_v42 }
 0x24c   : > { %v3263_v14 = vrot.slane %v3261_v16, 4 }
 0x24f   : > { %6223 = vmatmul.mubr.msk.bf16.gmra.mxu0 %vm2866_vm13, %v7598_v49  ;;  %v3265_v49 = vshrl.u32 %v2578_v40, 16 }
 0x250   : > { %6226 = vmatprep.mubr.msk.bf16.mxu0 %vm2866_vm13, %v7609_v42  ;;  %v3268_v42 = vshll.u32 %v2578_v40, 16 }
 0x252   : > { %6261 = vmatmul.mubr.msk.bf16.gmra.mxu1 %vm2866_vm13, %v7622_v18  ;;  %v3270_v61 = vrot.slane %v3268_v42, 4 }
 0x253   : > { %6264 = vmatprep.mubr.msk.bf16.mxu1 %vm2866_vm13, %v7633_v23 }
 0x257   : > { %6227 = vmatmul.mubr.msk.bf16.gmra.mxu0 %vm2866_vm13, %v7622_v18  ;;  %v3267_v18 = vrot.slane %v3265_v49, 3 }
 0x258   : > { %6230 = vmatprep.mubr.msk.bf16.mxu0 %vm2866_vm13, %v7633_v23  ;;  %v3260_v23 = vrot.slane %v3258_v30, 3 }
 0x259   : > { %v3271_v4 = vor.u32 %v3270_v61, %v3267_v18 }
 0x25a   : > { %6265 = vmatmul.mubr.msk.bf16.gmra.mxu1 %vm2866_vm13, %v7646_v39  ;;  %v3264_v11 = vor.u32 %v3263_v14, %v3260_v23 }
 0x25b   : > { %6268 = vmatprep.mubr.msk.bf16.mxu1 %vm2866_vm13, %v7662_v44 }
 0x25c   : > { %v3272_v10 = vsel %vm2579_vm12, %v3264_v11, %v3271_v4  ;;  %vm5345_vm12 = vcmask 785408  }
 0x25f   : > { %6231 = vmatmul.mubr.msk.bf16.gmra.mxu0 %vm2866_vm13, %v7646_v39 }
 0x260   : > { %6234 = vmatprep.mubr.msk.bf16.mxu0 %vm2866_vm13, %v7662_v44 }
 0x262   : > { %6269 = vmatmul.mubr.msk.bf16.gmra.mxu1 %vm2866_vm13, %v7677_v25 }
 0x263   : > { %6272 = vmatprep.mubr.msk.bf16.mxu1 %vm2866_vm13, %v2840_v33 }
 0x267   : > { %6235 = vmatmul.mubr.msk.bf16.gmra.mxu0 %vm2866_vm13, %v7677_v25 }
 0x26a   : > { %6273 = vmatmul.mubr.msk.bf16.gmra.mxu1 %vm2866_vm13, %v3272_v10 }
 0x291   : > { %v6170_v39 = vpop.f32.mrf.mxu1 }
 0x293   : > { %v2949_v24 = vpop.f32.mrf.mxu1 }
 0x295   : > { %v6171_v8 = vpop.f32.mrf.mxu1 }
 0x297   : > { %v2952_v43 = vpop.f32.mrf.mxu1 }
 0x2a1   : > { %v6174_v15 = vpop.f32.mrf.mxu1 }
 0x2a3   : > { %v2965_v44 = vpop.f32.mrf.mxu1 }
 0x2a5   : > { %v6175_v57 = vpop.f32.mrf.mxu1 }
 0x2a7   : > { %v7753_v47 = vpop.f32.mrf.mxu1 }
 0x2af   : > { %v7755_v20 = vpop.f32.mrf.mxu1 }
 0x2b1   : > { %v7757_v17 = vpop.f32.mrf.mxu1 }
 0x2b3   : > { %v7759_v51 = vpop.f32.mrf.mxu1 }
 0x2b5   : > { %v7761_v59 = vpop.f32.mrf.mxu1 }
 0x2bb   : > { %v7763_v62 = vpop.f32.mrf.mxu1 }
 0x2bd   : > { %v7765_v9 = vpop.f32.mrf.mxu1 }
 0x2bf   : > { %v7767_v34 = vpop.f32.mrf.mxu1 }
 0x2c1   : > { %v7769_v27 = vpop.f32.mrf.mxu1 }
 0x2c8   : > { %v7771_v60 = vpop.f32.mrf.mxu1 }
 0x2ca   : > { %v7773_v37 = vpop.f32.mrf.mxu1 }
 0x2cc   : > { %v7775_v48 = vpop.f32.mrf.mxu1 }
 0x2ce   : > { %v7777_v58 = vpop.f32.mrf.mxu1 }
 0x2d4   : > { %v7779_v0 = vpop.f32.mrf.mxu1 }
 0x2d6   : > { %v7781_v29 = vpop.f32.mrf.mxu1 }
 0x2d8   : > { %v7783_v45 = vpop.f32.mrf.mxu1 }
 0x2da   : > { %v7785_v35 = vpop.f32.mrf.mxu1 }
 0x2e0   : > { %v7787_v19 = vpop.f32.mrf.mxu1 }
 0x2e2   : > { %v7789_v50 = vpop.f32.mrf.mxu1 }
 0x2e4   : > { %v7791_v6 = vpop.f32.mrf.mxu1 }
 0x2e6   : > { %v7793_v46 = vpop.f32.mrf.mxu1 }
 0x2ea   : > { %v7795_v7 = vpop.f32.mrf.mxu1 }
 0x2ec   : > { %v7797_v21 = vpop.f32.mrf.mxu1 }
 0x2ee   : > { %v7799_v56 = vpop.f32.mrf.mxu1 }
 0x2ef   : > { %v6208_v63 = vpop.f32.mrf.mxu0 }
 0x2f0   : > { %v3140_v25 = vadd.f32 %v6208_v63, %v6170_v39  ;;  %v7801_v55 = vpop.f32.mrf.mxu1 }
 0x2f1   : > { %v3131_v41 = vpop.f32.mrf.mxu0 }
 0x2f2   : > { %v3132_v31 = vadd.f32 %v3131_v41, %v2949_v24  ;;  %v6246_v52 = vpop.f32.mrf.mxu1 }
 0x2f3   : > { %v6209_v3 = vpop.f32.mrf.mxu0  ;;  %v3464_v33 = vadd.f32 %v6246_v52, %v3140_v25 }
 0x2f4   : > { %v3143_v36 = vadd.f32 %v6209_v3, %v6171_v8  ;;  %v3335_v28 = vpop.f32.mrf.mxu1 }
 0x2f5   : > { %v3134_v2 = vpop.f32.mrf.mxu0  ;;  %v3462_v54 = vadd.f32 %v3335_v28, %v3132_v31  ;;  %v7809_v32 = vadd.f32 %v7806_v53, %v3464_v33 }
 0x2f6   : > { %v3135_v5 = vadd.f32 %v3134_v2, %v2952_v43  ;;  %v6247_v1 = vpop.f32.mrf.mxu1 }
 0x2f7   : > { %v6212_v12 = vpop.f32.mrf.mxu0  ;;  %v3465_v26 = vadd.f32 %v6247_v1, %v3143_v36  ;;  %v3537_v13 = vsel %vm2415_vm10, %v7809_v32, 0.0  ;;  %v7814_v40 = vadd.f32 %v7806_v53, %v3462_v54 }
 0x2f8   : > { %v3156_v38 = vadd.f32 %v6212_v12, %v6174_v15  ;;  %v3338_v22 = vpop.f32.mrf.mxu1  ;;  %3538 = vadd.xlane.f32.xlu1 %v3537_v13 }
 0x2f9   : > { %v3147_v49 = vpop.f32.mrf.mxu0  ;;  %v3463_v42 = vadd.f32 %v3338_v22, %v3135_v5  ;;  %v7817_v16 = vadd.f32 %v7806_v53, %v3465_v26  ;;  %v3531_v23 = vsel %vm2415_vm10, %v7814_v40, 0.0 }
 0x2fa   : > { %v3148_v30 = vadd.f32 %v3147_v49, %v2965_v44  ;;  %v6250_v18 = vpop.f32.mrf.mxu1 }
 0x2fb   : > { %v6213_v61 = vpop.f32.mrf.mxu0  ;;  %v3468_v14 = vadd.f32 %v6250_v18, %v3156_v38  ;;  %v3540_v11 = vsel %vm2415_vm10, %v7817_v16, 0.0  ;;  %v7824_v10 = vadd.f32 %v7806_v53, %v3463_v42 }
 0x2fc   : > { %v3159_v4 = vadd.f32 %v6213_v61, %v6175_v57  ;;  %v3351_v39 = vpop.f32.mrf.mxu1  ;;  %3532 = vadd.xlane.f32.xlu1 %v3531_v23  ;;  %3541 = vadd.xlane.f32.xlu0 %v3540_v11 }
 0x2fd   : > { %v3150_v24 = vpop.f32.mrf.mxu0  ;;  %v3466_v8 = vadd.f32 %v3351_v39, %v3148_v30  ;;  %v7828_v15 = vadd.f32 %v7806_v53, %v3468_v14  ;;  %v3534_v57 = vsel %vm2415_vm10, %v7824_v10, 0.0 }
 0x2fe   : > { %v3151_v43 = vadd.f32 %v3150_v24, %v7753_v47  ;;  %v6251_v44 = vpop.f32.mrf.mxu1 }
 0x2ff   : > { %v6216_v63 = vpop.f32.mrf.mxu0  ;;  %v3469_v25 = vadd.f32 %v6251_v44, %v3159_v4  ;;  %v3549_v31 = vsel %vm2415_vm10, %v7828_v15, 0.0  ;;  %v7836_v52 = vadd.f32 %v7806_v53, %v3466_v8 }
 0x300   : > { %v3172_v41 = vadd.f32 %v6216_v63, %v7755_v20  ;;  %v3354_v3 = vpop.f32.mrf.mxu1  ;;  %3535 = vadd.xlane.f32.xlu0 %v3534_v57  ;;  %3550 = vadd.xlane.f32.xlu1 %v3549_v31 }
 0x301   : > { %v3163_v47 = vpop.f32.mrf.mxu0  ;;  %v3467_v33 = vadd.f32 %v3354_v3, %v3151_v43  ;;  %v7840_v28 = vadd.f32 %v7806_v53, %v3469_v25  ;;  %v3543_v20 = vsel %vm2415_vm10, %v7836_v52, 0.0 }
 0x302   : > { %v3164_v36 = vadd.f32 %v3163_v47, %v7757_v17  ;;  %v6254_v2 = vpop.f32.mrf.mxu1 }
 0x303   : > { %8874 = vst [vmem:[#allocation11_spill] sm:$0xff] %v7840_v28  ;;  %v6217_v54 = vpop.f32.mrf.mxu0  ;;  %v3472_v5 = vadd.f32 %v6254_v2, %v3172_v41  ;;  %v3552_v12 = vsel %vm2415_vm10, %v7840_v28, 0.0  ;;  %v7848_v26 = vadd.f32 %v7806_v53, %v3467_v33 }
 0x304   : > { %v3175_v1 = vadd.f32 %v6217_v54, %v7759_v51  ;;  %v3367_v38 = vpop.f32.mrf.mxu1  ;;  %3544 = vadd.xlane.f32.xlu1 %v3543_v20  ;;  %3553 = vadd.xlane.f32.xlu0 %v3552_v12 }
 0x305   : > { %v3166_v17 = vpop.f32.mrf.mxu0  ;;  %v3470_v13 = vadd.f32 %v3367_v38, %v3164_v36  ;;  %v7852_v49 = vadd.f32 %v7806_v53, %v3472_v5  ;;  %v3546_v18 = vsel %vm2415_vm10, %v7848_v26, 0.0 }
 0x306   : > { %v3167_v22 = vadd.f32 %v3166_v17, %v7761_v59  ;;  %v6255_v42 = vpop.f32.mrf.mxu1 }
 0x307   : > { %8875 = vst [vmem:[#allocation12_spill] sm:$0xff] %v7852_v49  ;;  %v7854_v30 = vpop.f32.mrf.mxu0  ;;  %v3473_v51 = vadd.f32 %v6255_v42, %v3175_v1  ;;  %v3561_v61 = vsel %vm2415_vm10, %v7852_v49, 0.0  ;;  %v7861_v23 = vadd.f32 %v7806_v53, %v3470_v13 }
 0x308   : > { %v3370_v14 = vpop.f32.mrf.mxu1  ;;  %3547 = vadd.xlane.f32.xlu0 %v3546_v18  ;;  %3562 = vadd.xlane.f32.xlu1 %v3561_v61 }
 0x309   : > { %8876 = vst [vmem:[#allocation13_spill] sm:$0xff] %v7861_v23  ;;  %v3179_v59 = vpop.f32.mrf.mxu0  ;;  %v3471_v4 = vadd.f32 %v3370_v14, %v3167_v22  ;;  %v7865_v39 = vadd.f32 %v7806_v53, %v3473_v51  ;;  %v3555_v43 = vsel %vm2415_vm10, %v7861_v23, 0.0 }
 0x30a   : > { %v3180_v11 = vadd.f32 %v3179_v59, %v7765_v9  ;;  %v7867_v24 = vpop.f32.mrf.mxu1 }
 0x30b   : > { %8877 = vst [vmem:[#allocation14_spill] sm:$0xff] %v7865_v39  ;;  %v7869_v8 = vpop.f32.mrf.mxu0  ;;  %v3564_v44 = vsel %vm2415_vm10, %v7865_v39, 0.0  ;;  %v7876_v63 = vadd.f32 %v7806_v53, %v3471_v4 }
 0x30c   : > { %v3383_v57 = vpop.f32.mrf.mxu1  ;;  %3556 = vadd.xlane.f32.xlu1 %v3555_v43  ;;  %3565 = vadd.xlane.f32.xlu0 %v3564_v44 }
 0x30d   : > { %8878 = vst [vmem:[#allocation15_spill] sm:$0xff] %v7876_v63  ;;  %v3182_v9 = vpop.f32.mrf.mxu0  ;;  %v3474_v25 = vadd.f32 %v3383_v57, %v3180_v11  ;;  %v3558_v33 = vsel %vm2415_vm10, %v7876_v63, 0.0 }
 0x30e   : > { %v3183_v41 = vadd.f32 %v3182_v9, %v7769_v27  ;;  %v7879_v31 = vpop.f32.mrf.mxu1 }
 0x30f   : > { %v6224_v3 = vpop.f32.mrf.mxu0  ;;  %v7885_v36 = vadd.f32 %v7806_v53, %v3474_v25 }
 0x310   : > { %v3204_v47 = vadd.f32 %v6224_v3, %v7771_v60  ;;  %v3386_v2 = vpop.f32.mrf.mxu1  ;;  %3559 = vadd.xlane.f32.xlu0 %v3558_v33 }
 0x311   : > { %8879 = vst [vmem:[#allocation16_spill] sm:$0xff] %v7885_v36  ;;  %v3195_v54 = vpop.f32.mrf.mxu0  ;;  %v3475_v20 = vadd.f32 %v3386_v2, %v3183_v41  ;;  %v3567_v27 = vsel %vm2415_vm10, %v7885_v36, 0.0 }
 0x312   : > { %v3196_v5 = vadd.f32 %v3195_v54, %v7773_v37  ;;  %v6262_v1 = vpop.f32.mrf.mxu1  ;;  %3568 = vadd.xlane.f32.xlu1 %v3567_v27 }
 0x313   : > { %v6225_v12 = vpop.f32.mrf.mxu0  ;;  %v3480_v38 = vadd.f32 %v6262_v1, %v3204_v47  ;;  %v7891_v60 = vadd.f32 %v7806_v53, %v3475_v20 }
 0x314   : > { %v3399_v17 = vpop.f32.mrf.mxu1  ;;  %v3207_v13 = vadd.f32 %v6225_v12, %v7775_v48 }
 0x315   : > { %8880 = vst [vmem:[#allocation17_spill] sm:$0xff] %v7891_v60  ;;  %v3198_v22 = vpop.f32.mrf.mxu0  ;;  %v3478_v42 = vadd.f32 %v3399_v17, %v3196_v5  ;;  %v3570_v37 = vsel %vm2415_vm10, %v7891_v60, 0.0  ;;  %v7898_v18 = vadd.f32 %v7806_v53, %v3480_v38  ;;  %v8180_v60 = vld [vmem:[%s8805_s4 + $0x4] ss:$0 sm:$0xff] }
 0x316   : > { %v3199_v51 = vadd.f32 %v3198_v22, %v7777_v58  ;;  %v6263_v61 = vpop.f32.mrf.mxu1  ;;  %3571 = vadd.xlane.f32.xlu0 %v3570_v37 }
 0x317   : > { %v6228_v14 = vpop.f32.mrf.mxu0  ;;  %v3481_v4 = vadd.f32 %v6263_v61, %v3207_v13  ;;  %v7902_v48 = vadd.f32 %v7806_v53, %v3478_v42  ;;  %v3585_v57 = vsel %vm2415_vm10, %v7898_v18, 0.0 }
 0x318   : > { %v3220_v59 = vadd.f32 %v6228_v14, %v7779_v0  ;;  %v3402_v11 = vpop.f32.mrf.mxu1 }
 0x319   : > { %v3211_v43 = vpop.f32.mrf.mxu0  ;;  %v3479_v44 = vadd.f32 %v3402_v11, %v3199_v51  ;;  %v3579_v2 = vsel %vm2415_vm10, %v7902_v48, 0.0  ;;  %v7914_v54 = vadd.f32 %v7806_v53, %v3481_v4 }
 0x31a   : > { %v3212_v58 = vadd.f32 %v3211_v43, %v7781_v29  ;;  %v6266_v9 = vpop.f32.mrf.mxu1  ;;  %3586 = vadd.xlane.f32.xlu0 %v3585_v57 }
 0x31b   : > { %v6229_v25 = vpop.f32.mrf.mxu0  ;;  %v3484_v41 = vadd.f32 %v6266_v9, %v3220_v59  ;;  %v7909_v0 = vadd.f32 %v7806_v53, %v3479_v44  ;;  %v3588_v22 = vsel %vm2415_vm10, %v7914_v54, 0.0 }
 0x31c   : > { %v3223_v3 = vadd.f32 %v6229_v25, %v7783_v45  ;;  %v3415_v47 = vpop.f32.mrf.mxu1 }
 0x31d   : > { %v3214_v33 = vpop.f32.mrf.mxu0  ;;  %v3482_v29 = vadd.f32 %v3415_v47, %v3212_v58  ;;  %v3582_v5 = vsel %vm2415_vm10, %v7909_v0, 0.0  ;;  %v7920_v27 = vadd.f32 %v7806_v53, %v3484_v41 }
 0x31e   : > { %v3215_v20 = vadd.f32 %v3214_v33, %v7785_v35  ;;  %v6267_v45 = vpop.f32.mrf.mxu1  ;;  %3580 = vadd.xlane.f32.xlu0 %v3579_v2  ;;  %3583 = vadd.xlane.f32.xlu1 %v3582_v5 }
 0x31f   : > { %v6232_v1 = vpop.f32.mrf.mxu0  ;;  %v3485_v12 = vadd.f32 %v6267_v45, %v3223_v3  ;;  %v7926_v35 = vadd.f32 %v7806_v53, %v3482_v29  ;;  %v3597_v37 = vsel %vm2415_vm10, %v7920_v27, 0.0 }
 0x320   : > { %v3236_v38 = vadd.f32 %v6232_v1, %v7787_v19  ;;  %v3418_v17 = vpop.f32.mrf.mxu1 }
 0x321   : > { %v3227_v13 = vpop.f32.mrf.mxu0  ;;  %v3483_v42 = vadd.f32 %v3418_v17, %v3215_v20  ;;  %v7932_v61 = vadd.f32 %v7806_v53, %v3485_v12  ;;  %v3591_v44 = vsel %vm2415_vm10, %v7926_v35, 0.0 }
 0x322   : > { %v3228_v51 = vadd.f32 %v3227_v13, %v7789_v50  ;;  %v6270_v14 = vpop.f32.mrf.mxu1  ;;  %3589 = vadd.xlane.f32.xlu0 %v3588_v22  ;;  %3598 = vadd.xlane.f32.xlu1 %v3597_v37  ;;  %v3188_v13 = vadd.f32 %v7854_v30, %v7763_v62 }
 0x323   : > { %8881 = vst [vmem:[#allocation18_spill] sm:$0xff] %v7932_v61  ;;  %v6233_v19 = vpop.f32.mrf.mxu0  ;;  %v3488_v59 = vadd.f32 %v6270_v14, %v3236_v38  ;;  %v7938_v50 = vadd.f32 %v7806_v53, %v3483_v42  ;;  %v3600_v9 = vsel %vm2415_vm10, %v7932_v61, 0.0 }
 0x324   : > { %v3239_v4 = vadd.f32 %v6233_v19, %v7791_v6  ;;  %v3431_v11 = vpop.f32.mrf.mxu1  ;;  %v3476_v30 = vadd.f32 %v7867_v24, %v3188_v13 }
 0x325   : > { %v3230_v43 = vpop.f32.mrf.mxu0  ;;  %v3486_v58 = vadd.f32 %v3431_v11, %v3228_v51  ;;  %v7944_v25 = vadd.f32 %v7806_v53, %v3488_v59  ;;  %v3594_v29 = vsel %vm2415_vm10, %v7938_v50, 0.0 }
 0x326   : > { %v3231_v57 = vadd.f32 %v3230_v43, %v7793_v46  ;;  %v6271_v41 = vpop.f32.mrf.mxu1  ;;  %3592 = vadd.xlane.f32.xlu1 %v3591_v44  ;;  %3601 = vadd.xlane.f32.xlu0 %v3600_v9 }
 0x327   : > { %8882 = vst [vmem:[#allocation19_spill] sm:$0xff] %v7944_v25  ;;  %v6236_v6 = vpop.f32.mrf.mxu0  ;;  %v3489_v3 = vadd.f32 %v6271_v41, %v3239_v4  ;;  %v7950_v46 = vadd.f32 %v7806_v53, %v3486_v58  ;;  %v3609_v45 = vsel %vm2415_vm10, %v7944_v25, 0.0  ;;  %v3191_v4 = vadd.f32 %v7869_v8, %v7767_v34 }
 0x328   : > { %v3252_v47 = vadd.f32 %v6236_v6, %v7795_v7  ;;  %v3434_v33 = vpop.f32.mrf.mxu1  ;;  %v7994_v41 = vadd.f32 %v7806_v53, %v3476_v30 }
 0x329   : > { %v3243_v2 = vpop.f32.mrf.mxu0  ;;  %v3487_v20 = vadd.f32 %v3434_v33, %v3231_v57  ;;  %v7956_v1 = vadd.f32 %v7806_v53, %v3489_v3  ;;  %v3477_v34 = vadd.f32 %v7879_v31, %v3191_v4 }
 0x32a   : > { %v3244_v5 = vadd.f32 %v3243_v2, %v7797_v21  ;;  %v6274_v12 = vpop.f32.mrf.mxu1  ;;  %3595 = vadd.xlane.f32.xlu0 %v3594_v29  ;;  %3610 = vadd.xlane.f32.xlu1 %v3609_v45  ;;  %v3603_v21 = vsel %vm2415_vm10, %v7950_v46, 0.0  ;;  %8886 = vst [vmem:[#allocation23_spill] sm:$0xff] %v7994_v41  ;;  %v3573_v6 = vsel %vm2415_vm10, %v7994_v41, 0.0 }
 0x32b   : > { %8883 = vst [vmem:[#allocation20_spill] sm:$0xff] %v7956_v1  ;;  %v6237_v7 = vpop.f32.mrf.mxu0  ;;  %v3492_v38 = vadd.f32 %v6274_v12, %v3252_v47  ;;  %v7964_v51 = vadd.f32 %v7806_v53, %v3487_v20  ;;  %v3612_v19 = vsel %vm2415_vm10, %v7956_v1, 0.0  ;;  %v8001_v47 = vadd.f32 %v7806_v53, %v3477_v34 }
 0x32c   : > { %v3255_v17 = vadd.f32 %v6237_v7, %v7799_v56  ;;  %v3447_v22 = vpop.f32.mrf.mxu1 }
 0x32d   : > { %v3246_v42 = vpop.f32.mrf.mxu0  ;;  %v3490_v37 = vadd.f32 %v3447_v22, %v3244_v5  ;;  %v7970_v59 = vadd.f32 %v7806_v53, %v3492_v38  ;;  %v3606_v43 = vsel %vm2415_vm10, %v7964_v51, 0.0  ;;  %8887 = vst [vmem:[#allocation24_spill] sm:$0xff] %v8001_v47  ;;  %v3576_v31 = vsel %vm2415_vm10, %v8001_v47, 0.0 }
 0x32e   : > { %v3247_v14 = vadd.f32 %v3246_v42, %v7801_v55  ;;  %v6275_v56 = vpop.f32.mrf.mxu1  ;;  %3604 = vadd.xlane.f32.xlu1 %v3603_v21  ;;  %3613 = vadd.xlane.f32.xlu0 %v3612_v19  ;;  %v3659_v19 = vlaneseq }
 0x32f   : > { %8884 = vst [vmem:[#allocation21_spill] sm:$0xff] %v7970_v59  ;;  %v3493_v62 = vadd.f32 %v6275_v56, %v3255_v17  ;;  %v3621_v44 = vsel %vm2415_vm10, %v7970_v59, 0.0  ;;  %v7980_v58 = vadd.f32 %v7806_v53, %v3490_v37 }
 0x330   : > { %v3450_v11 = vpop.f32.mrf.mxu1  ;;  %v3660_v30 = vand.u32 127, %v3659_v19 }
 0x331   : > { %v3491_v55 = vadd.f32 %v3450_v11, %v3247_v14  ;;  %v7983_v57 = vadd.f32 %v7806_v53, %v3493_v62  ;;  %v3615_v8 = vsel %vm2415_vm10, %v7980_v58, 0.0 }
 0x332   : > { %3607 = vadd.xlane.f32.xlu0 %v3606_v43  ;;  %3622 = vadd.xlane.f32.xlu1 %v3621_v44  ;;  %v3665_v43 = vadd.s32 4294967288, %v3660_v30 }
 0x333   : > { %8885 = vst [vmem:[#allocation22_spill] sm:$0xff] %v7983_v57  ;;  %v7986_v24 = vadd.f32 %v7806_v53, %v3491_v55  ;;  %v3624_v9 = vsel %vm2415_vm10, %v7983_v57, 0.0  ;;  %v8025_v55 = vshrl.u32 %v3659_v19, 7 }
 0x335   : > { %v3618_v3 = vsel %vm2415_vm10, %v7986_v24, 0.0  ;;  %8888 = vst [vmem:[#allocation25_spill] sm:$0xff] %v8025_v55 }
 0x336   : > { %3616 = vadd.xlane.f32.xlu1 %v3615_v8  ;;  %3625 = vadd.xlane.f32.xlu0 %v3624_v9  ;;  %v8030_v8 = vsub.s32 %v3665_v43, %v8025_v55  ;;  %v8033_v9 = vsub.s32 %v3660_v30, %v8025_v55 }
 0x33a   : > { %3574 = vadd.xlane.f32.xlu1 %v3573_v6  ;;  %3619 = vadd.xlane.f32.xlu0 %v3618_v3 }
 0x33e   : > { %3577 = vadd.xlane.f32.xlu0 %v3576_v31 }
 0x381   : > { %v8005_v33 = vpop.xlane.xlu1 %3538 }
 0x385   : > { %v8007_v2 = vpop.xlane.xlu0 %3541  ;;  %v3533_v29 = vpop.xlane.xlu1 %3532 }
 0x389   : > { %v3536_v20 = vpop.xlane.xlu0 %3535  ;;  %v8009_v5 = vpop.xlane.xlu1 %3550 }
 0x38a   : > { %v3669_v43 = vrot.slane %v3536_v20, %v8030_v8 }
 0x38d   : > { %v8011_v45 = vpop.xlane.xlu0 %3553  ;;  %v3545_v7 = vpop.xlane.xlu1 %3544 }
 0x391   : > { %v3548_v12 = vpop.xlane.xlu0 %3547  ;;  %v8015_v38 = vpop.xlane.xlu1 %3562 }
 0x392   : > { %v3688_v41 = vrot.slane %v3548_v12, %v8030_v8  ;;  %v3684_v12 = vrot.slane %v3545_v7, %v8033_v9 }
 0x395   : > { %v8013_v53 = vpop.xlane.xlu0 %3565  ;;  %v8019_v13 = vpop.xlane.xlu1 %3556 }
 0x399   : > { %v8017_v17 = vpop.xlane.xlu0 %3559 }
 0x39b   : > { %v8023_v42 = vpop.xlane.xlu1 %3568 }
 0x39f   : > { %v8021_v22 = vpop.xlane.xlu0 %3571 }
 0x3a3   : > { %v3587_v21 = vpop.xlane.xlu0 %3586 }
 0x3a4   : > { %v3747_v59 = vrot.slane %v3587_v21, %v8033_v9  ;;  %v3664_v21 = vrot.slane %v3533_v29, %v8033_v9  ;;  %v3706_v29 = vrot.slane %v8017_v17, %v8030_v8  ;;  %v3702_v17 = vrot.slane %v8019_v13, %v8033_v9 }
 0x3a5   : > { %v3724_v13 = vrot.slane %v8021_v22, %v8030_v8  ;;  %v3720_v22 = vrot.slane %v8023_v42, %v8033_v9 }
 0x3a7   : > { %v3581_v37 = vpop.xlane.xlu0 %3580  ;;  %v3584_v14 = vpop.xlane.xlu1 %3583 }
 0x3a8   : > { %v3738_v19 = vrot.slane %v3581_v37, %v8033_v9  ;;  %v3742_v47 = vrot.slane %v3584_v14, %v8030_v8  ;;  %v3679_v37 = vrot.slane %v8007_v2, %v8030_v8 }
 0x3aa   : > { %v3743_v25 = vsel %vm3670_vm14, %v3742_v47, %v3738_v19  ;;  %v3697_v19 = vrot.slane %v8011_v45, %v8030_v8 }
 0x3ab   : > { %v3590_v56 = vpop.xlane.xlu0 %3589  ;;  %v3599_v62 = vpop.xlane.xlu1 %3598 }
 0x3ac   : > { %v3751_v6 = vrot.slane %v3590_v56, %v8030_v8 }
 0x3ae   : > { %v3752_v56 = vsel %vm3670_vm14, %v3751_v6, %v3747_v59  ;;  %v3671_v6 = vsel %vm3670_vm14, %v3669_v43, %v3664_v21  ;;  %v3693_v43 = vrot.slane %v8009_v5, %v8033_v9  ;;  %v3707_v21 = vsel %vm3670_vm14, %v3706_v29, %v3702_v17 }
 0x3af   : > { %v3593_v4 = vpop.xlane.xlu1 %3592  ;;  %v3602_v11 = vpop.xlane.xlu0 %3601  ;;  %v3821_v2 = vsel %vm3807_vm15, %v3752_v56, %v3743_v25  ;;  %v3715_v5 = vrot.slane %v8013_v53, %v8030_v8 }
 0x3b0   : > { %v3756_v30 = vrot.slane %v3593_v4, %v8033_v9  ;;  %v3675_v4 = vrot.slane %v8005_v33, %v8033_v9  ;;  %v3769_v59 = vrot.slane %v3602_v11, %v8030_v8  ;;  %v3765_v33 = vrot.slane %v3599_v62, %v8033_v9 }
 0x3b2   : > { %v3680_v11 = vsel %vm3670_vm14, %v3679_v37, %v3675_v4  ;;  %v3698_v4 = vsel %vm3670_vm14, %v3697_v19, %v3693_v43 }
 0x3b3   : > { %v3596_v44 = vpop.xlane.xlu0 %3595  ;;  %v8027_v34 = vpop.xlane.xlu1 %3610 }
 0x3b4   : > { %v3760_v57 = vrot.slane %v3596_v44, %v8030_v8  ;;  %v3783_v37 = vrot.slane %v8027_v34, %v8033_v9 }
 0x3b6   : > { %v3761_v14 = vsel %vm3670_vm14, %v3760_v57, %v3756_v30  ;;  %v3689_v30 = vsel %vm3670_vm14, %v3688_v41, %v3684_v12  ;;  %v3770_v41 = vsel %vm3670_vm14, %v3769_v59, %v3765_v33 }
 0x3b7   : > { %v3605_v3 = vpop.xlane.xlu1 %3604  ;;  %v3614_v31 = vpop.xlane.xlu0 %3613  ;;  %v3822_v7 = vsel %vm3809_vm2, %v3761_v14, %v3821_v2 }
 0x3b8   : > { %v3774_v57 = vrot.slane %v3605_v3, %v8033_v9  ;;  %v3808_v3 = vsel %vm3807_vm15, %v3680_v11, %v3671_v6  ;;  %v3787_v62 = vrot.slane %v3614_v31, %v8030_v8  ;;  %v3823_v45 = vsel %vm3811_vm3, %v3770_v41, %v3822_v7 }
 0x3b9   : > { %v3810_v56 = vsel %vm3809_vm2, %v3689_v30, %v3808_v3  ;;  %v3725_v7 = vsel %vm3670_vm14, %v3724_v13, %v3720_v22  ;;  %v3838_v13 = vld [vmem:[%s8806_s5] sm:$0xff]  ;;  %v6507_v22 = vld [vmem:[%s6783_s22 + $0x30] sm:$0xff]  }
 0x3ba   : > { %v3812_v6 = vsel %vm3811_vm3, %v3698_v4, %v3810_v56  ;;  %v3788_v34 = vsel %vm3670_vm14, %v3787_v62, %v3783_v37  ;;  %v6626_v56 = vmov 0.0   ;;  %v3914_v37 = vld [vmem:[%s8808_s7] sm:$0xff] }
 0x3bb   : > { %v3608_v44 = vpop.xlane.xlu0 %3607  ;;  %v3623_v1 = vpop.xlane.xlu1 %3622  ;;  %v3814_v30 = vsel %vm3813_vm4, %v3707_v21, %v3812_v6  ;;  %6276 = vmatprep.subr.mxu0 %v6626_v56  ;;  %6280 = vmatprep.mubr.msk.f32.mxu0 %vm6627_vm8, %v6626_v56  ;;  %v6506_v6 = vld [vmem:[%s6783_s22 + $0x28] sm:$0xff]  }
 0x3bc   : > { %v3778_v20 = vrot.slane %v3608_v44, %v8030_v8  ;;  %v3801_v29 = vrot.slane %v3623_v1, %v8033_v9  ;;  %6285 = vmatprep.mubr.msk.f32.mxu1 %vm3918_vm9, %v3914_v37 }
 0x3be   : > { %v3779_v25 = vsel %vm3670_vm14, %v3778_v20, %v3774_v57  ;;  %v3711_v57 = vrot.slane %v8015_v38, %v8033_v9 }
 0x3bf   : > { %v3617_v44 = vpop.xlane.xlu1 %3616  ;;  %v3626_v47 = vpop.xlane.xlu0 %3625  ;;  %v3824_v14 = vsel %vm3813_vm4, %v3779_v25, %v3823_v45 }
 0x3c0   : > { %v3805_v31 = vrot.slane %v3626_v47, %v8030_v8  ;;  %v3792_v12 = vrot.slane %v3617_v44, %v8033_v9  ;;  %v3825_v33 = vsel %vm3815_vm5, %v3788_v34, %v3824_v14  ;;  %v3716_v11 = vsel %vm3670_vm14, %v3715_v5, %v3711_v57  ;;  %v6500_v14 = vld [vmem:[%s8803_s2 + $0x8] ss:$0 sps:$4 sm:$0xff]   ;;  %v6508_v34 = vld [vmem:[%s6783_s22 + $0x38] sm:$0xff]  }
 0x3c1   : > { %v3816_v25 = vsel %vm3815_vm5, %v3716_v11, %v3814_v30  ;;  %v4450_v4 = vsel %vm562_vm0, %v6500_v14, 0  ;;  %v6503_v5 = vld [vmem:[%s6783_s22 + $0x10] sm:$0xff]   ;;  %v6512_v30 = vld [vmem:[%s6783_s22 + $0x58] sm:$0xff]  }
 0x3c2   : > { %v3806_v47 = vsel %vm3670_vm14, %v3805_v31, %v3801_v29  ;;  %v3818_v41 = vsel %vm3817_vm6, %v3725_v7, %v3816_v25  ;;  %v6501_v31 = vld [vmem:[%s8803_s2] sm:$0xff]   ;;  %v6509_v29 = vld [vmem:[%s6783_s22 + $0x40] sm:$0xff]   ;;  %v6511_v57 = vld [vmem:[%s6783_s22 + $0x50] sm:$0xff]  }
 0x3c3   : > { %v3620_v20 = vpop.xlane.xlu0 %3619  ;;  %v3575_v2 = vpop.xlane.xlu1 %3574  ;;  %v6515_v7 = vld [vmem:[%s6783_s22 + $0x70] sm:$0xff]  }
 0x3c4   : > { %v3796_v59 = vrot.slane %v3620_v20, %v8030_v8  ;;  %v3729_v1 = vrot.slane %v3575_v2, %v8033_v9  ;;  %v6502_v20 = vld [vmem:[%s6783_s22 + $0x8] sm:$0xff]   ;;  %v3917_v25 = vld [vmem:[%s8809_s8 + $0x8] sm:$0xff] }
 0x3c5   : > { %v6510_v2 = vld [vmem:[%s6783_s22 + $0x48] sm:$0xff]  }
 0x3c6   : > { %v3797_v53 = vsel %vm3670_vm14, %v3796_v59, %v3792_v12  ;;  %v6504_v12 = vld [vmem:[%s6783_s22 + $0x18] sm:$0xff]   ;;  %v6505_v59 = vld [vmem:[%s6783_s22 + $0x20] sm:$0xff]  }
 0x3c7   : > { %v3578_v44 = vpop.xlane.xlu0 %3577  ;;  %v3826_v42 = vsel %vm3817_vm6, %v3797_v53, %v3825_v33  ;;  %v6513_v53 = vld [vmem:[%s6783_s22 + $0x60] sm:$0xff]   ;;  %v6514_v33 = vld [vmem:[%s6783_s22 + $0x68] sm:$0xff]  }
 0x3c8   : > { %v3733_v19 = vrot.slane %v3578_v44, %v8030_v8  ;;  %v3827_v38 = vsel %vm3819_vm7, %v3806_v47, %v3826_v42  ;;  %v6516_v44 = vld [vmem:[%s6783_s22 + $0x78] sm:$0xff]   ;;  %v6517_v47 = vld [vmem:[%s6783_s22 + $0x80] sm:$0xff]   ;;  %s5383_s22 = sshll.u32 %s350_s18, 4  ;;  %s8749_s22 = int_to_ptr.vmem [resolvable:$true] %s5383_s22 }
 0x3c9   : > { %v3833_v17 = vsel %vm2415_vm10, %v3827_v38, 0.0  ;;  %v3839_v42 = vld [vmem:[%s8807_s6] sm:$0xff] }
 0x3ca   : > { %3834 = vadd.xlane.f32.xlu1 %v3833_v17  ;;  %v3734_v3 = vsel %vm3670_vm14, %v3733_v19, %v3729_v1  ;;  %v3915_v17 = vld [vmem:[%s8808_s7 + $0x8] sm:$0xff]  ;;  %vm5348_vm14 = vcmask 916480  }
 0x3cb   : > { %v3820_v62 = vsel %vm3819_vm7, %v3734_v3, %v3818_v41  ;;  %v3916_v41 = vld [vmem:[%s8809_s8] sm:$0xff] }
 0x3cc   : > { %v3830_v43 = vsel %vm2415_vm10, %v3820_v62, 0.0 }
 0x3cd   : > { %3831 = vadd.xlane.f32.xlu0 %v3830_v43 }
 0x453   : > { %v3835_v8 = vpop.xlane.xlu1 %3834 }
 0x454   : > { %v3837_v9 = vmul.f32 0.00390625, %v3835_v8 }
 0x456   : > { %6277 = vmatpush3.msra.mxu0 %v3837_v9  ;;  %v3832_v21 = vpop.xlane.xlu0 %3831 }
 0x457   : > { %v3836_v45 = vmul.f32 0.00390625, %v3832_v21  ;;  %6278 = vmatprep.subr.mxu0 %v6626_v56 }
 0x459   : > { %6279 = vmatpush3.msra.mxu0 %v3836_v45 }
 0x45a   : > { %6281 = vmatmul.mubr.msk.f32.vlgmr.msra.gmra.mxu0 %vm2415_vm10, %v3838_v13  ;;  %6332 = vmatprep.subr.msk.bf16.mxu0 %vm562_vm0, %v6500_v14  ;;  %vm5339_vm0 = vcmask 523264  }
 0x45b   : > { %6292 = vmatprep.mubr.msk.bf16.mxu0 %vm513_vm1, %v6502_v20  ;;  %6289 = vmatpush3.bf16.msra.mxu0 %v4450_v4  ;;  %v6628_v20 = vmov 1966171168  }
 0x45c   : > { %6290 = vmatprep.subr.bf16.mxu0 %v6501_v31  ;;  %v4016_v4 = vunpack.c.l.s4 %v6628_v20 }
 0x45f   : > { %6291 = vmatpush3.bf16.msra.mxu0 %v6501_v31 }
 0x462   : > { %6293 = vmatmul.mubr.msk.bf16.vlgmr.msra.gmra.mxu0 %vm513_vm1, %v6503_v5  ;;  %v4017_v5 = vunpack.c.0.s8 %v4016_v4 }
 0x463   : > { %6296 = vmatprep.mubr.msk.bf16.mxu0 %vm513_vm1, %v6504_v12 }
 0x464   : > { %v4020_v12 = vsub.s32 %v4017_v5, %v8025_v55 }
 0x46a   : > { %6297 = vmatmul.mubr.msk.bf16.gmra.mxu0 %vm513_vm1, %v6505_v59 }
 0x46b   : > { %6300 = vmatprep.mubr.msk.bf16.mxu0 %vm513_vm1, %v6506_v6 }
 0x472   : > { %6301 = vmatmul.mubr.msk.bf16.gmra.mxu0 %vm513_vm1, %v6507_v22  ;;  %v4114_v22 = vsub.s32 0, %v8025_v55 }
 0x473   : > { %6304 = vmatprep.mubr.msk.bf16.mxu0 %vm513_vm1, %v6508_v34 }
 0x47a   : > { %6305 = vmatmul.mubr.msk.bf16.gmra.mxu0 %vm513_vm1, %v6509_v29 }
 0x47b   : > { %6308 = vmatprep.mubr.msk.bf16.mxu0 %vm513_vm1, %v6510_v2 }
 0x482   : > { %6309 = vmatmul.mubr.msk.bf16.gmra.mxu0 %vm513_vm1, %v6511_v57 }
 0x483   : > { %6312 = vmatprep.mubr.msk.bf16.mxu0 %vm513_vm1, %v6512_v30 }
 0x48a   : > { %6313 = vmatmul.mubr.msk.bf16.gmra.mxu0 %vm513_vm1, %v6513_v53 }
 0x48b   : > { %6316 = vmatprep.mubr.msk.bf16.mxu0 %vm513_vm1, %v6514_v33 }
 0x492   : > { %6317 = vmatmul.mubr.msk.bf16.gmra.mxu0 %vm513_vm1, %v6515_v7 }
 0x493   : > { %6320 = vmatprep.mubr.msk.bf16.mxu0 %vm513_vm1, %v6516_v44 }
 0x49a   : > { %6321 = vmatmul.mubr.msk.bf16.gmra.mxu0 %vm513_vm1, %v6517_v47  ;;  %vm5342_vm1 = vcmask 654336  }
 0x51a   : > { %v3909_v11 = vpop.f32.mrf.mxu0 }
 0x51b   : > { %v3910_v1 = vadd.f32 %v3909_v11, %v3839_v42 }
 0x51c   : > { %v6282_v19 = vpop.f32.mrf.mxu0 }
 0x51d   : > { %v3913_v38 = vmax.f32 %v3910_v1, 0.0 }
 0x51f   : > { %6283 = vmatprep.subr.mxu1 %v3913_v38 }
 0x520   : > { %6284 = vmatpush3.msra.mxu1 %v3913_v38 }
 0x521   : > { %6286 = vmatmul.mubr.msk.f32.vlgmr.msra.gmra.mxu1 %vm3918_vm9, %v3915_v17 }
 0x5e1   : > { %v6287_v3 = vpop.f32.mrf.mxu1 }
 0x5e2   : > { %v3997_v62 = vadd.f32 %v6287_v3, %v3917_v25 }
 0x5e3   : > { %v3991_v43 = vpop.f32.mrf.mxu1 }
 0x5e4   : > { %v4001_v56 = vsub.f32 0.0, %v3997_v62  ;;  %v3992_v8 = vadd.f32 %v3991_v43, %v3916_v41 }
 0x5e6   : > { %v4004_v9 = vmul.f32 1.442695, %v4001_v56  ;;  %v4000_v21 = vsub.f32 0.0, %v3992_v8 }
 0x5e8   : > { %6518 = vpow2.f32 %v4004_v9  ;;  %v4002_v45 = vmul.f32 1.442695, %v4000_v21 }
 0x5ea   : > { %6520 = vpow2.f32 %v4002_v45 }
 0x5f5   : > { %v6519_v13 = vpop.eup %6518 }
 0x5f6   : > { %v4007_v37 = vadd.f32 1.0, %v6519_v13 }
 0x5f7   : > { %v6521_v14 = vpop.eup %6520 }
 0x5f8   : > { %6522 = vrcp.f32 %v4007_v37  ;;  %v4006_v31 = vadd.f32 1.0, %v6521_v14 }
 0x5fa   : > { %6524 = vrcp.f32 %v4006_v31 }
 0x605   : > { %v6523_v59 = vpop.eup %6522 }
 0x606   : > { %v4070_v6 = vrot.slane %v6523_v59, %v4020_v12  ;;  %v4063_v34 = vcombine.high %v6523_v59, %v6523_v59  ;;  %v6294_v59 = vpop.f32.mrf.mxu0 }
 0x607   : > { %v6525_v29 = vpop.eup %6524 }
 0x608   : > { %v4086_v2 = vrot.slane %v4070_v6, %v4020_v12  ;;  %v4021_v57 = vrot.slane %v6525_v29, %v4020_v12  ;;  %v4077_v30 = vrot.slane %v4063_v34, %v4020_v12  ;;  %v4078_v44 = vcombine.high %v4070_v6, %v4070_v6 }
 0x609   : > { %v4014_v38 = vcombine.high %v6525_v29, %v6525_v29  ;;  %v4486_v29 = vpop.f32.mrf.mxu0 }
 0x60a   : > { %v4147_v53 = vrot.slane %v4086_v2, %v4114_v22  ;;  %v4108_v33 = vcombine.high %v4086_v2, %v4086_v2  ;;  %v4037_v7 = vrot.slane %v4021_v57, %v4020_v12  ;;  %v4093_v42 = vrot.slane %v4077_v30, %v4020_v12 }
 0x60b   : > { %v4029_v11 = vcombine.high %v4021_v57, %v4021_v57  ;;  %v4100_v19 = vrot.slane %v4078_v44, %v4020_v12  ;;  %v4028_v62 = vrot.slane %v4014_v38, %v4020_v12  ;;  %v4079_v45 = vcombine.high %v4077_v30, %v4077_v30  ;;  %v6295_v30 = vpop.f32.mrf.mxu0 }
 0x60c   : > { %4209 = vperm.xlu1 %6398, %v4147_v53   ;;  %v4155_v47 = vrot.slane %v4108_v33, %v4114_v22  ;;  %v4115_v1 = vrot.slane %v4037_v7, %v4114_v22  ;;  %v4163_v17 = vrot.slane %v4093_v42, %v4114_v22  ;;  %v4059_v41 = vcombine.high %v4037_v7, %v4037_v7 }
 0x60d   : > { %v4051_v25 = vrot.slane %v4029_v11, %v4020_v12  ;;  %v4151_v3 = vrot.slane %v4100_v19, %v4114_v22  ;;  %v4109_v56 = vcombine.high %v4093_v42, %v4093_v42  ;;  %v4044_v9 = vrot.slane %v4028_v62, %v4020_v12  ;;  %v4489_v7 = vpop.f32.mrf.mxu0 }
 0x60e   : > { %4217 = vperm.xlu0 %6399, %v4155_v47   ;;  %v4123_v8 = vrot.slane %v4059_v41, %v4114_v22  ;;  %v4110_v37 = vcombine.high %v4100_v19, %v4100_v19  ;;  %v4107_v31 = vrot.slane %v4079_v45, %v4020_v12  ;;  %v4030_v4 = vcombine.high %v4028_v62, %v4028_v62 }
 0x60f   : > { %v4119_v43 = vrot.slane %v4051_v25, %v4114_v22  ;;  %v4171_v21 = vrot.slane %v4109_v56, %v4114_v22  ;;  %v4131_v13 = vrot.slane %v4044_v9, %v4114_v22  ;;  %v4061_v20 = vcombine.high %v4051_v25, %v4051_v25  ;;  %v6298_v42 = vpop.f32.mrf.mxu0 }
 0x610   : > { %4177 = vperm.xlu1 %6398, %v4115_v1   ;;  %v4159_v14 = vrot.slane %v4110_v37, %v4114_v22  ;;  %v4167_v5 = vrot.slane %v4107_v31, %v4114_v22  ;;  %v4058_v34 = vrot.slane %v4030_v4, %v4020_v12  ;;  %v4060_v2 = vcombine.high %v4044_v9, %v4044_v9 }
 0x611   : > { %v4127_v6 = vrot.slane %v4061_v20, %v4114_v22  ;;  %v4111_v47 = vcombine.high %v4107_v31, %v4107_v31  ;;  %v4502_v1 = vpop.f32.mrf.mxu0  ;;  %v4490_v63 = vadd.f32 %v8180_v60, %v4489_v7  ;;  %v8197_v23 = vadd.f32 %v6298_v42, %v8180_v60 }
 0x612   : > { %4225 = vperm.xlu0 %6399, %v4163_v17   ;;  %v4135_v57 = vrot.slane %v4058_v34, %v4114_v22  ;;  %v4139_v53 = vrot.slane %v4060_v2, %v4114_v22  ;;  %v4062_v33 = vcombine.high %v4058_v34, %v4058_v34  ;;  %v6629_v34 = vmov 1983009808  }
 0x613   : > { %v4175_v11 = vrot.slane %v4111_v47, %v4114_v22  ;;  %v6299_v19 = vpop.f32.mrf.mxu0  ;;  %v4680_v2 = vunpack.c.l.s4 %v6629_v34  ;;  %v8187_v34 = vadd.f32 %v6294_v59, %v8180_v60  ;;  %v8200_v49 = vadd.f32 %v8180_v60, %v4502_v1 }
 0x614   : > { %4213 = vperm.xlu1 %6398, %v4151_v3   ;;  %v4143_v44 = vrot.slane %v4062_v33, %v4114_v22  ;;  %v6630_v33 = vmov 1934713408  }
 0x615   : > { %v4505_v38 = vpop.f32.mrf.mxu0  ;;  %v4681_v47 = vunpack.c.0.s8 %v4680_v2  ;;  %v8191_v2 = vadd.f32 %v6295_v30, %v8180_v60 }
 0x616   : > { %4181 = vperm.xlu0 %6399, %v4119_v43   ;;  %v8206_v59 = vadd.f32 %v8180_v60, %v4505_v38 }
 0x617   : > { %v6302_v12 = vpop.f32.mrf.mxu0  ;;  %v8184_v28 = vsub.s32 %v4681_v47, %v8025_v55  ;;  %v8203_v47 = vadd.f32 %v6299_v19, %v8180_v60 }
 0x618   : > { %4185 = vperm.xlu1 %6398, %v4123_v8  }
 0x619   : > { %v4518_v17 = vpop.f32.mrf.mxu0  ;;  %8890 = vst [vmem:[#allocation27_spill] sm:$0xff] %v8184_v28 }
 0x61a   : > { %4233 = vperm.xlu0 %6399, %v4171_v21   ;;  %v8212_v30 = vadd.f32 %v8180_v60, %v4518_v17 }
 0x61b   : > { %v6303_v25 = vpop.f32.mrf.mxu0 }
 0x61c   : > { %4193 = vperm.xlu1 %6398, %v4131_v13   ;;  %v8215_v7 = vadd.f32 %v6303_v25, %v8180_v60 }
 0x61d   : > { %v4521_v3 = vpop.f32.mrf.mxu0 }
 0x61e   : > { %8891 = vst [vmem:[#allocation28_spill] sm:$0xff] %v8215_v7  ;;  %v8218_v1 = vadd.f32 %v8180_v60, %v4521_v3 }
 0x61f   : > { %v6306_v41 = vpop.f32.mrf.mxu0 }
 0x620   : > { %4221 = vperm.xlu1 %6398, %v4159_v14   ;;  %v8221_v19 = vadd.f32 %v6306_v41, %v8180_v60 }
 0x621   : > { %v4534_v62 = vpop.f32.mrf.mxu0 }
 0x623   : > { %v6307_v43 = vpop.f32.mrf.mxu0 }
 0x624   : > { %4229 = vperm.xlu1 %6398, %v4167_v5   ;;  %v8229_v17 = vadd.f32 %v6307_v43, %v8180_v60 }
 0x625   : > { %v4537_v56 = vpop.f32.mrf.mxu0 }
 0x626   : > { %8892 = vst [vmem:[#allocation29_spill] sm:$0xff] %v8229_v17  ;;  %v8236_v3 = vadd.f32 %v8180_v60, %v4537_v56 }
 0x627   : > { %v6310_v8 = vpop.f32.mrf.mxu0 }
 0x628   : > { %4189 = vperm.xlu1 %6398, %v4127_v6   ;;  %v4559_v41 = vadd.f32 %v6310_v8, %v8180_v60 }
 0x629   : > { %v4550_v9 = vpop.f32.mrf.mxu0 }
 0x62b   : > { %v6311_v21 = vpop.f32.mrf.mxu0 }
 0x62c   : > { %4197 = vperm.xlu1 %6398, %v4135_v57  }
 0x62d   : > { %v4553_v45 = vpop.f32.mrf.mxu0 }
 0x62e   : > { %v4554_v43 = vadd.f32 %v8180_v60, %v4553_v45 }
 0x62f   : > { %v6314_v13 = vpop.f32.mrf.mxu0 }
 0x630   : > { %4201 = vperm.xlu1 %6398, %v4139_v53   ;;  %v8244_v17 = vadd.f32 %v6314_v13, %v8180_v60 }
 0x631   : > { %v4566_v37 = vpop.f32.mrf.mxu0 }
 0x632   : > { %v4567_v38 = vadd.f32 %v8180_v60, %v4566_v37  ;;  %v4551_v37 = vadd.f32 %v8180_v60, %v4550_v9 }
 0x633   : > { %v6315_v14 = vpop.f32.mrf.mxu0 }
 0x634   : > { %4205 = vperm.xlu1 %6398, %v4143_v44   ;;  %v8175_v44 = vunpack.c.l.s4 %v6630_v33  ;;  %v4487_v33 = vadd.f32 %v8180_v60, %v4486_v29  ;;  %v8209_v29 = vadd.f32 %v6302_v12, %v8180_v60  ;;  %v8226_v12 = vadd.f32 %v8180_v60, %v4534_v62 }
 0x635   : > { %v4569_v22 = vpop.f32.mrf.mxu0  ;;  %v4562_v62 = vadd.f32 %v6311_v21, %v8180_v60 }
 0x636   : > { %8889 = vst [vmem:[#allocation26_spill] sm:$0xff] %v8175_v44  ;;  %v4570_v25 = vadd.f32 %v8180_v60, %v4569_v22 }
 0x637   : > { %v6318_v31 = vpop.f32.mrf.mxu0 }
 0x638   : > { %4237 = vperm.xlu1 %6398, %v4175_v11   ;;  %v8251_v56 = vadd.f32 %v6318_v31, %v8180_v60 }
 0x639   : > { %v4582_v4 = vpop.f32.mrf.mxu0 }
 0x63b   : > { %v6319_v6 = vpop.f32.mrf.mxu0 }
 0x63c   : > { %v8260_v45 = vadd.f32 %v6319_v6, %v8180_v60 }
 0x63d   : > { %v4585_v53 = vpop.f32.mrf.mxu0 }
 0x63f   : > { %v6322_v36 = vpop.f32.mrf.mxu0 }
 0x641   : > { %v4598_v44 = vpop.f32.mrf.mxu0 }
 0x643   : > { %v6323_v22 = vpop.f32.mrf.mxu0 }
 0x687   : > { %v4210_v20 = vpop.permute.xlu1 %4209 }
 0x689   : > { %v4218_v11 = vpop.permute.xlu0 %4217 }
 0x68a   : > { %v4260_v55 = vmul.f32 %v4218_v11, %v7926_v35  ;;  %v4261_v28 = vmul.f32 %v4218_v11, %v7938_v50  ;;  %v4256_v35 = vmul.f32 %v4210_v20, %v7902_v48  ;;  %v4257_v50 = vmul.f32 %v4210_v20, %v7909_v0 }
 0x68b   : > { %v4178_v5 = vpop.permute.xlu1 %4177  ;;  %v8248_v11 = vadd.f32 %v6315_v14, %v8180_v60  ;;  %v4583_v48 = vadd.f32 %v8180_v60, %v4582_v4  ;;  %v4586_v0 = vadd.f32 %v8180_v60, %v4585_v53 }
 0x68c   : > { %v8253_v8 = vadd.f32 %v4567_v38, %v4260_v55  ;;  %v8256_v9 = vadd.f32 %v4570_v25, %v4261_v28  ;;  %v4240_v21 = vmul.f32 %v4178_v5, %v7814_v40  ;;  %v8265_v14 = vadd.f32 %v4551_v37, %v4256_v35  ;;  %v4601_v38 = vpop.f32.mrf.mxu0 }
 0x68d   : > { %v4226_v42 = vpop.permute.xlu0 %4225  ;;  %v4241_v31 = vmul.f32 %v4178_v5, %v7824_v10  ;;  %v8269_v55 = vadd.f32 %v6322_v36, %v8180_v60  ;;  %v4599_v28 = vadd.f32 %v8180_v60, %v4598_v44  ;;  %v8272_v4 = vadd.f32 %v4554_v43, %v4257_v50 }
 0x68e   : > { %8893 = vst [vmem:[#allocation30_spill] sm:$0xff] %v8256_v9  ;;  %v4264_v40 = vmul.f32 %v4226_v42, %v7950_v46  ;;  %v4265_v6 = vmul.f32 %v4226_v42, %v7964_v51  ;;  %v8834_v25 = vmax.f32 %v8253_v8, 0.0  ;;  %v8832_v44 = vmax.f32 %v8256_v9, 0.0 }
 0x68f   : > { %v8173_v57 = vpop.permute.xlu1 %4213  ;;  %8894 = vst [vmem:[#allocation31_spill] sm:$0xff] %v8272_v4  ;;  %v8284_v37 = vadd.f32 %v4487_v33, %v4240_v21  ;;  %v8289_v35 = vadd.f32 %v4490_v63, %v4241_v31  ;;  %v8292_v43 = vadd.f32 %v6323_v22, %v8180_v60 }
 0x690   : > { %v4258_v53 = vmul.f32 %v8173_v57, %v7898_v18  ;;  %v4259_v10 = vmul.f32 %v8173_v57, %v7914_v54  ;;  %v8833_v18 = vmax.f32 %v8265_v14, 0.0  ;;  %v8298_v54 = vadd.f32 %v4586_v0, %v4265_v6 }
 0x691   : > { %v4182_v13 = vpop.permute.xlu0 %4181  ;;  %v8856_v50 = vmax.f32 %v8284_v37, 0.0 }
 0x692   : > { %v4242_v46 = vmul.f32 %v4182_v13, %v7809_v32  ;;  %v4243_v51 = vmul.f32 %v4182_v13, %v7817_v16  ;;  %v8300_v57 = vadd.f32 %v4559_v41, %v4258_v53  ;;  %v8306_v16 = vcombine.low %v8833_v18, %v8834_v25  ;;  %v8900_v25 = vld [vmem:[#allocation12_spill] sm:$0xff] }
 0x693   : > { %v4186_v39 = vpop.permute.xlu1 %4185  ;;  %v8308_v63 = vadd.f32 %v4562_v62, %v4259_v10  ;;  %v8897_v10 = vld [vmem:[#allocation15_spill] sm:$0xff]  ;;  %v8901_v13 = vld [vmem:[#allocation16_spill] sm:$0xff] }
 0x694   : > { %v4244_v36 = vmul.f32 %v4186_v39, %v7836_v52  ;;  %v4245_v5 = vmul.f32 %v4186_v39, %v7848_v26  ;;  %v4602_v52 = vadd.f32 %v8180_v60, %v4601_v38  ;;  %v8831_v26 = vmax.f32 %v8272_v4, 0.0 }
 0x695   : > { %v8296_v39 = vadd.f32 %v4583_v48, %v4264_v40  ;;  %v4234_v32 = vpop.permute.xlu0 %4233  ;;  %8895 = vst [vmem:[#allocation32_spill] sm:$0xff] %v8308_v63  ;;  %v8324_v22 = vadd.f32 %v8187_v34, %v4242_v46  ;;  %v8327_v62 = vadd.f32 %v8191_v2, %v4243_v51  ;;  %v8837_v40 = vmax.f32 %v8300_v57, 0.0 }
 0x696   : > { %v8311_v33 = vadd.f32 %v8200_v49, %v4244_v36  ;;  %v8314_v60 = vadd.f32 %v8206_v59, %v4245_v5  ;;  %v8320_v41 = vcombine.low %v8831_v26, %v8832_v44  ;;  %v8835_v49 = vmax.f32 %v8289_v35, 0.0  ;;  %v8898_v5 = vld [vmem:[#allocation18_spill] sm:$0xff]  ;;  %v8899_v26 = vld [vmem:[#allocation11_spill] sm:$0xff] }
 0x697   : > { %v8193_v61 = vpop.permute.xlu1 %4193  ;;  %v4268_v59 = vmul.f32 %v4234_v32, %v7980_v58  ;;  %v4269_v21 = vmul.f32 %v4234_v32, %v7986_v24  ;;  %v8841_v2 = vmax.f32 %v8308_v63, 0.0  ;;  %v8896_v58 = vld [vmem:[#allocation13_spill] sm:$0xff] }
 0x698   : > { %v8859_v6 = vmax.f32 %v8311_v33, 0.0  ;;  %v8836_v53 = vmax.f32 %v8314_v60, 0.0  ;;  %v4248_v24 = vmul.f32 %v8193_v61, %v8896_v58  ;;  %v4249_v36 = vmul.f32 %v8193_v61, %v8897_v10  ;;  %v8902_v10 = vld [vmem:[#allocation17_spill] sm:$0xff] }
 0x699   : > { %v8349_v51 = vadd.f32 %v4599_v28, %v4268_v59  ;;  %v8351_v32 = vadd.f32 %v4602_v52, %v4269_v21  ;;  %v8903_v28 = vld [vmem:[#allocation14_spill] sm:$0xff] }
 0x69b   : > { %v8233_v7 = vpop.permute.xlu1 %4221 }
 0x69c   : > { %v4262_v34 = vmul.f32 %v8233_v7, %v7920_v27  ;;  %v4263_v46 = vmul.f32 %v8233_v7, %v8898_v5  ;;  %v4677_v7 = vcombine.low %v8856_v50, %v8859_v6  ;;  %v8906_v5 = vld [vmem:[#allocation28_spill] sm:$0xff] }
 0x69e   : > { %v8358_v58 = vadd.f32 %v8244_v17, %v4262_v34  ;;  %v8374_v17 = vadd.f32 %v8212_v30, %v4248_v24  ;;  %v8381_v52 = vadd.f32 %v8248_v11, %v4263_v46  ;;  %v8850_v11 = vmax.f32 %v8349_v51, 0.0 }
 0x69f   : > { %v8263_v20 = vpop.permute.xlu1 %4229  ;;  %v8853_v24 = vmax.f32 %v8351_v32, 0.0 }
 0x6a3   : > { %v4190_v42 = vpop.permute.xlu1 %4189 }
 0x6a4   : > { %v4246_v0 = vmul.f32 %v4190_v42, %v7828_v15  ;;  %v8846_v15 = vmax.f32 %v8324_v22, 0.0  ;;  %v4247_v44 = vmul.f32 %v4190_v42, %v8899_v26  ;;  %v8378_v42 = vadd.f32 %v8218_v1, %v4249_v36  ;;  %v8904_v26 = vld [vmem:[#allocation19_spill] sm:$0xff] }
 0x6a5   : > { %v4266_v59 = vmul.f32 %v8263_v20, %v8904_v26  ;;  %v8838_v36 = vmax.f32 %v8358_v58, 0.0 }
 0x6a6   : > { %v8355_v18 = vadd.f32 %v8197_v23, %v4246_v0  ;;  %v8371_v23 = vcombine.low %v8835_v49, %v8836_v53  ;;  %v8391_v30 = vadd.f32 %v8203_v47, %v4247_v44 }
 0x6a7   : > { %v4198_v48 = vpop.permute.xlu1 %4197 }
 0x6a8   : > { %v4250_v31 = vmul.f32 %v4198_v48, %v8900_v25  ;;  %v4251_v25 = vmul.f32 %v4198_v48, %v8903_v28  ;;  %v8849_v48 = vmax.f32 %v8355_v18, 0.0  ;;  %v8413_v28 = vadd.f32 %v8251_v56, %v4266_v59  ;;  %v8910_v56 = vld [vmem:[#allocation21_spill] sm:$0xff] }
 0x6aa   : > { %v8404_v46 = vadd.f32 %v8906_v5, %v4251_v25  ;;  %v8845_v25 = vmax.f32 %v8391_v30, 0.0  ;;  %v4693_v26 = vcombine.low %v8846_v15, %v8849_v48  ;;  %v8909_v5 = vld [vmem:[#allocation29_spill] sm:$0xff] }
 0x6ab   : > { %v4202_v27 = vpop.permute.xlu1 %4201 }
 0x6ac   : > { %v4252_v61 = vmul.f32 %v4202_v27, %v8901_v13  ;;  %v4253_v38 = vmul.f32 %v4202_v27, %v8902_v10  ;;  %v8905_v13 = vld [vmem:[#allocation20_spill] sm:$0xff]  ;;  %v8842_v10 = vmax.f32 %v8381_v52, 0.0  ;;  %v8847_v53 = vmax.f32 %v8404_v46, 0.0 }
 0x6ad   : > { %v4267_v34 = vmul.f32 %v8263_v20, %v8905_v13  ;;  %v8907_v20 = vld [vmem:[#allocation23_spill] sm:$0xff]  ;;  %v8908_v27 = vld [vmem:[#allocation24_spill] sm:$0xff] }
 0x6ae   : > { %v8386_v21 = vadd.f32 %v8226_v12, %v4252_v61  ;;  %v8395_v1 = vadd.f32 %v8236_v3, %v4253_v38  ;;  %v8401_v12 = vadd.f32 %v8209_v29, %v4250_v31  ;;  %v8839_v3 = vmax.f32 %v8374_v17, 0.0 }
 0x6af   : > { %v4206_v0 = vpop.permute.xlu1 %4205  ;;  %v8843_v38 = vmax.f32 %v8378_v42, 0.0  ;;  %v8416_v31 = vadd.f32 %v8260_v45, %v4267_v34  ;;  %v4829_v34 = vcombine.low %v8837_v40, %v8838_v36  ;;  %v5101_v40 = vcombine.low %v8841_v2, %v8842_v10 }
 0x6b0   : > { %v8840_v47 = vmax.f32 %v8386_v21, 0.0  ;;  %v4254_v44 = vmul.f32 %v4206_v0, %v8907_v20  ;;  %v4255_v61 = vmul.f32 %v4206_v0, %v8908_v27  ;;  %v8844_v0 = vmax.f32 %v8395_v1, 0.0  ;;  %v8911_v27 = vld [vmem:[#allocation22_spill] sm:$0xff] }
 0x6b1   : > { %v8851_v49 = vmax.f32 %v8401_v12, 0.0  ;;  %v8854_v36 = vmax.f32 %v8413_v28, 0.0  ;;  %v8914_v10 = vmax.f32 %v8296_v39, 0.0 }
 0x6b2   : > { %v8425_v13 = vadd.f32 %v8221_v19, %v4254_v44  ;;  %v8428_v20 = vadd.f32 %v8909_v5, %v4255_v61  ;;  %v4709_v19 = vcombine.low %v8839_v3, %v8840_v47  ;;  %v8913_v3 = vmax.f32 %v8327_v62, 0.0 }
 0x6b3   : > { %v4238_v29 = vpop.permute.xlu1 %4237 }
 0x6b4   : > { %v4270_v59 = vmul.f32 %v4238_v29, %v8910_v56  ;;  %v4271_v45 = vmul.f32 %v4238_v29, %v8911_v27  ;;  %v8852_v44 = vmax.f32 %v8425_v13, 0.0  ;;  %v8848_v61 = vmax.f32 %v8428_v20, 0.0  ;;  %v8912_v56 = vld [vmem:[#allocation27_spill] sm:$0xff] }
 0x6b5   : > { %v4685_v27 = vrot.slane %v4677_v7, %v8912_v56  ;;  %v4965_v47 = vcombine.low %v8913_v3, %v8845_v25  ;;  %v8857_v3 = vmax.f32 %v8416_v31, 0.0 }
 0x6b6   : > { %v8445_v29 = vadd.f32 %v8269_v55, %v4270_v59  ;;  %v8448_v5 = vadd.f32 %v8292_v43, %v4271_v45  ;;  %v4701_v55 = vrot.slane %v4693_v26, %v8912_v56  ;;  %v4981_v43 = vcombine.low %v8843_v38, %v8844_v0 }
 0x6b7   : > { %v4725_v7 = vcombine.low %v8851_v49, %v8852_v44  ;;  %v4997_v59 = vcombine.low %v8847_v53, %v8848_v61  ;;  %v4837_v45 = vrot.slane %v4829_v34, %v8912_v56  ;;  %v4845_v38 = vcombine.low %v8914_v10, %v8850_v11  ;;  %v8916_v11 = vld [vmem:[#allocation25_spill] sm:$0xff]  ;;  %v8917_v49 = vld [vmem:[#allocation26_spill] sm:$0xff] }
 0x6b8   : > { %v8855_v26 = vmax.f32 %v8445_v29, 0.0  ;;  %v8858_v2 = vmax.f32 %v8448_v5, 0.0  ;;  %v4717_v0 = vrot.slane %v4709_v19, %v8912_v56  ;;  %v4821_v34 = vrot.slane %v8306_v16, %v8912_v56 }
 0x6b9   : > { %v4733_v25 = vrot.slane %v4725_v7, %v8912_v56  ;;  %v5005_v15 = vrot.slane %v4997_v59, %v8912_v56  ;;  %v8915_v53 = vmax.f32 %v8298_v54, 0.0  ;;  %v4741_v19 = vcombine.low %v4685_v27, %v4701_v55 }
 0x6ba   : > { %v4861_v48 = vcombine.low %v8854_v36, %v8855_v26  ;;  %v5133_v10 = vcombine.low %v8857_v3, %v8858_v2  ;;  %v4973_v7 = vrot.slane %v4965_v47, %v8912_v56  ;;  %v4989_v16 = vrot.slane %v4981_v43, %v8912_v56 }
 0x6bb   : > { %v5117_v61 = vcombine.low %v8915_v53, %v8853_v24  ;;  %v4773_v59 = vcombine.low %v4717_v0, %v4733_v25  ;;  %v8918_v44 = vunpack.c.0.s8 %v8917_v49  ;;  %v4957_v24 = vrot.slane %v8371_v23, %v8912_v56 }
 0x6bc   : > { %v4877_v36 = vcombine.low %v4821_v34, %v4837_v45  ;;  %v5109_v26 = vrot.slane %v5101_v40, %v8912_v56  ;;  %v4853_v50 = vrot.slane %v4845_v38, %v8912_v56  ;;  %v5045_v3 = vcombine.low %v4989_v16, %v5005_v15 }
 0x6bd   : > { %v8503_v53 = vsub.s32 %v8918_v44, %v8916_v11  ;;  %v4869_v2 = vrot.slane %v4861_v48, %v8912_v56  ;;  %v5141_v47 = vrot.slane %v5133_v10, %v8912_v56  ;;  %v5093_v43 = vrot.slane %v8320_v41, %v8912_v56 }
 0x6be   : > { %v5125_v49 = vrot.slane %v5117_v61, %v8912_v56  ;;  %v5013_v44 = vcombine.low %v4957_v24, %v4973_v7  ;;  %v4774_v48 = vcombine.high %v4717_v0, %v4733_v25  ;;  %v4878_v0 = vcombine.high %v4821_v34, %v4837_v45 }
 0x6bf   : > { %v8515_v11 = vrot.slane %v4773_v59, %v8503_v53  ;;  %v4909_v23 = vcombine.low %v4853_v50, %v4869_v2  ;;  %v8518_v6 = vrot.slane %v4741_v19, %v8503_v53  ;;  %v5149_v40 = vcombine.low %v5093_v43, %v5109_v26 }
 0x6c0   : > { %v5181_v38 = vcombine.low %v5125_v49, %v5141_v47  ;;  %v8521_v4 = vrot.slane %v4877_v36, %v8503_v53  ;;  %v8529_v61 = vrot.slane %v5045_v3, %v8503_v53  ;;  %v4742_v59 = vcombine.high %v4685_v27, %v4701_v55 }
 0x6c1   : > { %v4806_v10 = vcombine.high %v8518_v6, %v8515_v11  ;;  %v8526_v41 = vrot.slane %v4909_v23, %v8503_v53  ;;  %v4910_v9 = vcombine.high %v4853_v50, %v4869_v2  ;;  %v8535_v36 = vrot.slane %v5013_v44, %v8503_v53 }
 0x6c2   : > { %v8538_v25 = vrot.slane %v5181_v38, %v8503_v53  ;;  %v5046_v63 = vcombine.high %v4989_v16, %v5005_v15  ;;  %v8544_v50 = vrot.slane %v5149_v40, %v8503_v53  ;;  %v4788_v2 = vrot.slane %v4774_v48, %v8503_v53 }
 0x6c3   : > { %5223 = vrot.lane.b32.xlu0 %v4806_v10, %s6625_s28  ;;  %v4942_v19 = vcombine.high %v8521_v4, %v8526_v41  ;;  %v5078_v3 = vcombine.high %v8535_v36, %v8529_v61  ;;  %v5014_v27 = vcombine.high %v4957_v24, %v4973_v7  ;;  %v5182_v55 = vcombine.high %v5125_v49, %v5141_v47 }
 0x6c4   : > { %v5214_v44 = vcombine.high %v8544_v50, %v8538_v25  ;;  %v4756_v45 = vrot.slane %v4742_v59, %v8503_v53  ;;  %v4924_v15 = vrot.slane %v4910_v9, %v8503_v53  ;;  %v8919_v34 = vmax.f32 %v8253_v8, 0.0 }
 0x6c5   : > { %5225 = vrot.lane.b32.xlu1 %v4942_v19, %s6625_s28  ;;  %v8920_v16 = vmax.f32 %v8265_v14, 0.0  ;;  %v8921_v40 = vmax.f32 %v8311_v33, 0.0  ;;  %v8922_v38 = vmax.f32 %v8284_v37, 0.0  ;;  %v5150_v7 = vcombine.high %v5093_v43, %v5109_v26 }
 0x6c6   : > { %v8923_v47 = vmax.f32 %v8425_v13, 0.0  ;;  %v8924_v49 = vmax.f32 %v8401_v12, 0.0  ;;  %v4807_v10 = vcombine.low %v4756_v45, %v4788_v2  ;;  %v4892_v9 = vrot.slane %v4878_v0, %v8503_v53 }
 0x6c7   : > { %5279 = vrot.lane.b32.xlu0 %v5078_v3, %s6625_s28  ;;  %v4814_v23 = vcombine.high %v8920_v16, %v8919_v34  ;;  %v4678_v24 = vcombine.high %v8922_v38, %v8921_v40  ;;  %v5060_v8 = vrot.slane %v5046_v63, %v8503_v53  ;;  %v8925_v14 = vmax.f32 %v8355_v18, 0.0 }
 0x6c8   : > { %v4726_v48 = vcombine.high %v8924_v49, %v8923_v47  ;;  %v8926_v33 = vmax.f32 %v8324_v22, 0.0  ;;  %v5028_v37 = vrot.slane %v5014_v27, %v8503_v53  ;;  %v4805_v13 = vcombine.low %v8518_v6, %v8515_v11 }
 0x6c9   : > { %5281 = vrot.lane.b32.xlu1 %v5214_v44, %s6625_s28  ;;  %v4941_v12 = vcombine.low %v8521_v4, %v8526_v41  ;;  %v8927_v26 = vmax.f32 %v8386_v21, 0.0  ;;  %v8928_v43 = vmax.f32 %v8374_v17, 0.0  ;;  %v8929_v63 = vmax.f32 %v8445_v29, 0.0 }
 0x6ca   : > { %v4694_v59 = vcombine.high %v8926_v33, %v8925_v14  ;;  %v8930_v18 = vmax.f32 %v8413_v28, 0.0  ;;  %v4943_v22 = vcombine.low %v4892_v9, %v4924_v15  ;;  %v5196_v3 = vrot.slane %v5182_v55, %v8503_v53 }
 0x6cb   : > { %v4710_v19 = vcombine.high %v8928_v43, %v8927_v26  ;;  %5231 = vrot.lane.b32.xlu0 %v4807_v10, %s6624_s29  ;;  %v8931_v27 = vmax.f32 %v8349_v51, 0.0  ;;  %v8932_v44 = vmax.f32 %v8296_v39, 0.0  ;;  %v8933_v21 = vmax.f32 %v8358_v58, 0.0 }
 0x6cc   : > { %v4862_v0 = vcombine.high %v8930_v18, %v8929_v63  ;;  %v8934_v17 = vmax.f32 %v8300_v57, 0.0  ;;  %v5077_v29 = vcombine.low %v8535_v36, %v8529_v61  ;;  %v5213_v28 = vcombine.low %v8544_v50, %v8538_v25 }
 0x6cd   : > { %v4846_v34 = vcombine.high %v8932_v44, %v8931_v27  ;;  %v8599_v40 = vrot.slane %v4726_v48, %v8912_v56  ;;  %v8935_v55 = vmax.f32 %v8428_v20, 0.0  ;;  %v8936_v51 = vmax.f32 %v8404_v46, 0.0  ;;  %5233 = vrot.lane.b32.xlu1 %v4943_v22, %s6624_s29  ;;  %v8950_v44 = vld [vmem:[#allocation30_spill] sm:$0xff] }
 0x6ce   : > { %v4830_v16 = vcombine.high %v8934_v17, %v8933_v21  ;;  %v5079_v58 = vcombine.low %v5028_v37, %v5060_v8  ;;  %v5164_v57 = vrot.slane %v5150_v7, %v8503_v53  ;;  %v8937_v38 = vmax.f32 %v8314_v60, 0.0 }
 0x6cf   : > { %v4998_v39 = vcombine.high %v8936_v51, %v8935_v55  ;;  %v8938_v47 = vmax.f32 %v8289_v35, 0.0  ;;  %v8612_v10 = vrot.slane %v4694_v59, %v8912_v56  ;;  %v8939_v48 = vmax.f32 %v8391_v30, 0.0 }
 0x6d0   : > { %v8940_v20 = vmax.f32 %v8327_v62, 0.0  ;;  %v8941_v46 = vmax.f32 %v8395_v1, 0.0  ;;  %v8942_v33 = vmax.f32 %v8378_v42, 0.0  ;;  %v8623_v7 = vrot.slane %v4710_v19, %v8912_v56  ;;  %5287 = vrot.lane.b32.xlu0 %v5079_v58, %s6624_s29 }
 0x6d1   : > { %v4950_v49 = vcombine.high %v8938_v47, %v8937_v38  ;;  %v8626_v60 = vrot.slane %v4862_v0, %v8912_v56  ;;  %v8943_v35 = vmax.f32 %v8448_v5, 0.0  ;;  %v8944_v59 = vmax.f32 %v8416_v31, 0.0  ;;  %v8948_v5 = vld [vmem:[#allocation32_spill] sm:$0xff] }
 0x6d2   : > { %v4966_v14 = vcombine.high %v8940_v20, %v8939_v48  ;;  %v4982_v26 = vcombine.high %v8942_v33, %v8941_v46  ;;  %v5215_v62 = vcombine.low %v5164_v57, %v5196_v3  ;;  %v8634_v30 = vrot.slane %v4678_v24, %v8912_v56 }
 0x6d3   : > { %v5134_v43 = vcombine.high %v8944_v59, %v8943_v35  ;;  %v8637_v42 = vrot.slane %v4846_v34, %v8912_v56  ;;  %v8945_v1 = vmax.f32 %v8351_v32, 0.0  ;;  %v8946_v19 = vmax.f32 %v8298_v54, 0.0  ;;  %v8952_v34 = vld [vmem:[#allocation31_spill] sm:$0xff] }
 0x6d4   : > { %v8947_v18 = vmax.f32 %v8381_v52, 0.0  ;;  %v8949_v0 = vmax.f32 %v8948_v5, 0.0  ;;  %v8648_v22 = vrot.slane %v4830_v16, %v8912_v56  ;;  %v4789_v24 = vcombine.low %v8623_v7, %v8599_v40  ;;  %5289 = vrot.lane.b32.xlu1 %v5215_v62, %s6624_s29  ;;  %s6631_s29 = smov 48  }
 0x6d5   : > { %v5118_v63 = vcombine.high %v8946_v19, %v8945_v1  ;;  %v8653_v27 = vrot.slane %v4998_v39, %v8912_v56  ;;  %v4808_v32 = vcombine.high %v4756_v45, %v4788_v2  ;;  %v8657_v54 = vrot.slane %v4814_v23, %v8912_v56 }
 0x6d6   : > { %v5102_v31 = vcombine.high %v8949_v0, %v8947_v18  ;;  %v8951_v52 = vmax.f32 %v8950_v44, 0.0  ;;  %v8953_v21 = vmax.f32 %v8952_v34, 0.0  ;;  %v4757_v16 = vcombine.low %v8634_v30, %v8612_v10 }
 0x6d7   : > { %v8666_v55 = vrot.slane %v4966_v14, %v8912_v56  ;;  %v4996_v51 = vrot.slane %v4982_v26, %v8912_v56  ;;  %v4925_v39 = vcombine.low %v8637_v42, %v8626_v60  ;;  %v8672_v2 = vrot.slane %v5134_v43, %v8912_v56  ;;  %5239 = vrot.lane.b32.xlu0 %v4808_v32, %s6631_s29 }
 0x6d8   : > { %v5086_v17 = vcombine.high %v8953_v21, %v8951_v52  ;;  %v4944_v45 = vcombine.high %v4892_v9, %v4924_v15  ;;  %v4964_v23 = vrot.slane %v4950_v49, %v8912_v56  ;;  %v5132_v58 = vrot.slane %v5118_v63, %v8912_v56 }
 0x6d9   : > { %v5116_v38 = vrot.slane %v5102_v31, %v8912_v56  ;;  %v4893_v47 = vcombine.low %v8657_v54, %v8648_v22  ;;  %v5061_v48 = vcombine.low %v4996_v51, %v8653_v27  ;;  %v5080_v20 = vcombine.high %v5028_v37, %v5060_v8 }
 0x6da   : > { %5241 = vrot.lane.b32.xlu1 %v4944_v45, %s6631_s29  ;;  %v4797_v14 = vrot.slane %v4789_v24, %v8503_v53  ;;  %v5100_v46 = vrot.slane %v5086_v17, %v8912_v56  ;;  %v5029_v33 = vcombine.low %v4964_v23, %v8666_v55  ;;  %v5197_v15 = vcombine.low %v5132_v58, %v8672_v2 }
 0x6db   : > { %5295 = vrot.lane.b32.xlu0 %v5080_v20, %s6631_s29  ;;  %v5216_v9 = vcombine.high %v5164_v57, %v5196_v3  ;;  %v4765_v49 = vrot.slane %v4757_v16, %v8503_v53  ;;  %v4933_v26 = vrot.slane %v4925_v39, %v8503_v53  ;;  %v4901_v43 = vrot.slane %v4893_v47, %v8503_v53 }
 0x6dc   : > { %v5165_v35 = vcombine.low %v5100_v46, %v5116_v38  ;;  %v5069_v8 = vrot.slane %v5061_v48, %v8503_v53  ;;  %v5037_v37 = vrot.slane %v5029_v33, %v8503_v53  ;;  %v5205_v62 = vrot.slane %v5197_v15, %v8503_v53 }
 0x6dd   : > { %v4809_v59 = vcombine.low %v4765_v49, %v4797_v14  ;;  %v4945_v56 = vcombine.low %v4901_v43, %v4933_v26  ;;  %v4790_v19 = vcombine.high %v8623_v7, %v8599_v40  ;;  %v4810_v63 = vcombine.high %v4765_v49, %v4797_v14 }
 0x6de   : > { %5297 = vrot.lane.b32.xlu1 %v5216_v9, %s6631_s29  ;;  %v5081_v3 = vcombine.low %v5037_v37, %v5069_v8  ;;  %v5173_v57 = vrot.slane %v5165_v35, %v8503_v53  ;;  %v4758_v18 = vcombine.high %v8634_v30, %v8612_v10  ;;  %v4926_v5 = vcombine.high %v8637_v42, %v8626_v60  ;;  %s6554_s29 = scalar_lea.vmem %s8749_s22, 512 }
 0x6df   : > { %5247 = vrot.lane.b32.xlu0 %v4809_v59, %s6632_s16  ;;  %v4946_v0 = vcombine.high %v4901_v43, %v4933_v26  ;;  %v4894_v31 = vcombine.high %v8657_v54, %v8648_v22  ;;  %v5062_v24 = vcombine.high %v4996_v51, %v8653_v27  ;;  %v5082_v32 = vcombine.high %v5037_v37, %v5069_v8  ;;  %p6555_p11 = scmp.ne.s32.totalorder %s8749_s22, %s6554_s29 }
 0x6e0   : > { %v5217_v1 = vcombine.low %v5173_v57, %v5205_v62  ;;  %v4804_v40 = vrot.slane %v4790_v19, %v8503_v53  ;;  %v5030_v7 = vcombine.high %v4964_v23, %v8666_v55  ;;  %v5198_v44 = vcombine.high %v5132_v58, %v8672_v2 }
 0x6e1   : > { %v5218_v10 = vcombine.high %v5173_v57, %v5205_v62  ;;  %v4772_v60 = vrot.slane %v4758_v18, %v8503_v53  ;;  %v4940_v30 = vrot.slane %v4926_v5, %v8503_v53  ;;  %v5166_v42 = vcombine.high %v5100_v46, %v5116_v38  ;;  %p6556_p13 = pnand %p6555_p11, %p8954_p12 }
 0x6e2   : > { %5249 = vrot.lane.b32.xlu1 %v4945_v56, %s6632_s16  ;;  %v4908_v22 = vrot.slane %v4894_v31, %v8503_v53  ;;  %v5076_v27 = vrot.slane %v5062_v24, %v8503_v53  ;;  %v5044_v34 = vrot.slane %v5030_v7, %v8503_v53  ;;  %v5212_v21 = vrot.slane %v5198_v44, %v8503_v53 }
 0x6e3   : > { %5303 = vrot.lane.b32.xlu0 %v5081_v3, %s6632_s16  ;;  %v4811_v52 = vcombine.low %v4772_v60, %v4804_v40  ;;  %v5180_v16 = vrot.slane %v5166_v42, %v8503_v53  ;;  %v4812_v51 = vcombine.high %v4772_v60, %v4804_v40  ;;  %p6557_p4 = pneg %p6556_p13 }
 0x6e4   : > { %v4947_v54 = vcombine.low %v4908_v22, %v4940_v30  ;;  %v5083_v17 = vcombine.low %v5044_v34, %v5076_v27  ;;  %v4948_v39 = vcombine.high %v4908_v22, %v4940_v30  ;;  %v5084_v2 = vcombine.high %v5044_v34, %v5076_v27 }
 0x6e5   : > { %v5219_v55 = vcombine.low %v5180_v16, %v5212_v21  ;;  %v5220_v45 = vcombine.high %v5180_v16, %v5212_v21 }
 0x6e6   : > { %5305 = vrot.lane.b32.xlu1 %v5217_v1, %s6632_s16  ;;  %s6636_s16 = smov [#allocation6]  }
 0x6e7   : > { %5255 = vrot.lane.b32.xlu0 %v4810_v63, %s6633_s19 }
 0x6ea   : > { %5257 = vrot.lane.b32.xlu1 %v4946_v0, %s6633_s19 }
 0x6eb   : > { %5311 = vrot.lane.b32.xlu0 %v5082_v32, %s6633_s19 }
 0x6ee   : > { %5313 = vrot.lane.b32.xlu1 %v5218_v10, %s6633_s19  ;;  %s6558_s19 = sshll.u32 %s6636_s16, 4  ;;  %s6559_s19 = int_to_ptr.vmem [resolvable:$false] %s6558_s19 }
 0x6ef   : > { %5263 = vrot.lane.b32.xlu0 %v4811_v52, %s6634_s24  ;;  %p6561_p5 = scmp.lt.s32.totalorder %s8749_s22, %s6559_s19 }
 0x6f2   : > { %5265 = vrot.lane.b32.xlu1 %v4947_v54, %s6634_s24 }
 0x6f3   : > { %5319 = vrot.lane.b32.xlu0 %v5083_v17, %s6634_s24 }
 0x6f6   : > { %5321 = vrot.lane.b32.xlu1 %v5219_v55, %s6634_s24  ;;  %s6560_s24 = scalar_lea.vmem %s6559_s19, 1024 }
 0x6f7   : > { %5271 = vrot.lane.b32.xlu0 %v4812_v51, %s6635_s23  ;;  %p6562_p7 = scmp.lt.s32.totalorder %s6560_s24, %s6554_s29 }
 0x6f9   : > { %p6563_p8 = por %p6562_p7, %p6561_p5 }
 0x6fa   : > { %5273 = vrot.lane.b32.xlu1 %v4948_v39, %s6635_s23 }
 0x6fb   : > { %5327 = vrot.lane.b32.xlu0 %v5084_v2, %s6635_s23  ;;  %p6564_p10 = pnand %p6563_p8, %p6557_p4 }
 0x6fe   : > { %5329 = vrot.lane.b32.xlu1 %v5220_v45, %s6635_s23 }
 0x735   : > { %v5224_v23 = vpop.permute.xlu0 %5223 }
 0x736   : > { %v5333_v57 = vsel %vm2415_vm10, %v4805_v13, %v5224_v23 }
 0x737   : > { %v5226_v58 = vpop.permute.xlu1 %5225 }
 0x738   : > { %v5334_v63 = vsel %vm2415_vm10, %v4941_v12, %v5226_v58 }
 0x739   : > { %v5280_v38 = vpop.permute.xlu0 %5279 }
 0x73a   : > { %v5351_v13 = vsel %vm2415_vm10, %v5077_v29, %v5280_v38 }
 0x73b   : > { %v5282_v47 = vpop.permute.xlu1 %5281 }
 0x73c   : > { %v5352_v32 = vsel %vm2415_vm10, %v5213_v28, %v5282_v47 }
 0x73d   : > { %v5232_v48 = vpop.permute.xlu0 %5231 }
 0x73e   : > { %v5335_v1 = vsel %vm2506_vm11, %v5333_v57, %v5232_v48 }
 0x73f   : > { %v5234_v20 = vpop.permute.xlu1 %5233 }
 0x740   : > { %v5336_v5 = vsel %vm2506_vm11, %v5334_v63, %v5234_v20 }
 0x742   : > { %v5288_v14 = vpop.permute.xlu0 %5287 }
 0x743   : > { %v5353_v41 = vsel %vm2506_vm11, %v5351_v13, %v5288_v14 }
 0x746   : > { %v5290_v53 = vpop.permute.xlu1 %5289 }
 0x747   : > { %v5354_v40 = vsel %vm2506_vm11, %v5352_v32, %v5290_v53 }
 0x749   : > { %v5240_v46 = vpop.permute.xlu0 %5239 }
 0x74a   : > { %v5337_v18 = vsel %vm2866_vm13, %v5335_v1, %v5240_v46 }
 0x74c   : > { %v5242_v33 = vpop.permute.xlu1 %5241 }
 0x74d   : > { %v5296_v15 = vpop.permute.xlu0 %5295  ;;  %v5338_v0 = vsel %vm2866_vm13, %v5336_v5, %v5242_v33 }
 0x74e   : > { %v5355_v61 = vsel %vm2866_vm13, %v5353_v41, %v5296_v15 }
 0x750   : > { %v5298_v9 = vpop.permute.xlu1 %5297 }
 0x751   : > { %v5248_v49 = vpop.permute.xlu0 %5247  ;;  %v5356_v25 = vsel %vm2866_vm13, %v5354_v40, %v5298_v9 }
 0x752   : > { %v5340_v6 = vsel %vm5339_vm0, %v5337_v18, %v5248_v49 }
 0x754   : > { %v5250_v26 = vpop.permute.xlu1 %5249 }
 0x755   : > { %v5304_v35 = vpop.permute.xlu0 %5303  ;;  %v5341_v12 = vsel %vm5339_vm0, %v5338_v0, %v5250_v26 }
 0x756   : > { %v5357_v7 = vsel %vm5339_vm0, %v5355_v61, %v5304_v35 }
 0x758   : > { %v5306_v59 = vpop.permute.xlu1 %5305 }
 0x759   : > { %v5256_v43 = vpop.permute.xlu0 %5255  ;;  %v5358_v60 = vsel %vm5339_vm0, %v5356_v25, %v5306_v59 }
 0x75a   : > { %v5343_v4 = vsel %vm5342_vm1, %v5340_v6, %v5256_v43 }
 0x75c   : > { %v5258_v8 = vpop.permute.xlu1 %5257 }
 0x75d   : > { %v5312_v56 = vpop.permute.xlu0 %5311  ;;  %v5344_v36 = vsel %vm5342_vm1, %v5341_v12, %v5258_v8 }
 0x75e   : > { %v5359_v50 = vsel %vm5342_vm1, %v5357_v7, %v5312_v56 }
 0x760   : > { %v5314_v37 = vpop.permute.xlu1 %5313 }
 0x761   : > { %v5264_v62 = vpop.permute.xlu0 %5263  ;;  %v5360_v52 = vsel %vm5342_vm1, %v5358_v60, %v5314_v37 }
 0x762   : > { %v5346_v31 = vsel %vm5345_vm12, %v5343_v4, %v5264_v62 }
 0x764   : > { %v5266_v3 = vpop.permute.xlu1 %5265 }
 0x765   : > { %v5320_v19 = vpop.permute.xlu0 %5319  ;;  %v5347_v44 = vsel %vm5345_vm12, %v5344_v36, %v5266_v3 }
 0x766   : > { %v5361_v30 = vsel %vm5345_vm12, %v5359_v50, %v5320_v19 }
 0x768   : > { %v5322_v11 = vpop.permute.xlu1 %5321 }
 0x769   : > { %v5272_v24 = vpop.permute.xlu0 %5271  ;;  %v5362_v27 = vsel %vm5345_vm12, %v5360_v52, %v5322_v11 }
 0x76a   : > { %v5349_v29 = vsel %vm5348_vm14, %v5346_v31, %v5272_v24 }
 0x76b   : > { %5365 = vst [vmem:[%s350_s18] sm:$0xff] %v5349_v29 }
 0x76c   : > { %v5274_v10 = vpop.permute.xlu1 %5273 }
 0x76d   : > { %v5350_v28 = vsel %vm5348_vm14, %v5347_v44, %v5274_v10  ;;  %v5328_v42 = vpop.permute.xlu0 %5327 }
 0x76e   : > { %5367 = vst [vmem:[%s350_s18 + $0x10] sm:$0xff] %v5350_v28  ;;  %v5363_v22 = vsel %vm5348_vm14, %v5361_v30, %v5328_v42 }
 0x76f   : > { %5366 = vst [vmem:[%s350_s18 + $0x8] sm:$0xff] %v5363_v22 }
 0x770   : > { %v5330_v54 = vpop.permute.xlu1 %5329 }
 0x771   : > { %v5364_v34 = vsel %vm5348_vm14, %v5362_v27, %v5330_v54 }
 0x772   : > { %5368 = vst [vmem:[%s350_s18 + $0x18] sm:$0xff] %v5364_v34 }
 0x773   : > { %6567 = shalt.err (!%p6564_p10)
}
 0x774   : > { %s6568_s23 = scalar_lea.hbm %s8756_s27, 512  ;;  %s6572_s25 = scalar_lea.hbm %s8810_s9, 1024 }
 0x775   : > { %p6569_p0 = scmp.ne.s32.totalorder %s8756_s27, %s6568_s23  ;;  %p6573_p1 = scmp.lt.s32.totalorder %s8756_s27, %s8810_s9 }
 0x776   : > { %p6574_p3 = scmp.lt.s32.totalorder %s6572_s25, %s6568_s23 }
 0x777   : > { %p6570_p2 = pnand %p6569_p0, %p8954_p12 }
 0x778   : > { %p6575_p6 = por %p6574_p3, %p6573_p1 }
 0x779   : > { %p6571_p9 = pneg %p6570_p2 }
 0x77b   : > { %p6576_p11 = pnand %p6575_p6, %p6571_p9 }
 0x77d   : > { %6579 = shalt.err (!%p6576_p11)
}
 0x77e   : > { %s6637_s29 = smov 256  }
 0x77f   : > { %6338 = dma.vmem_to_hbm [thread:$0]  (%p8954_p12), %s8749_s22, 512, %s8756_s27, %s5370_s14, %s6637_s29, %s6637_s29, %s6625_s28  }
 0x780 PF: > { %s5398_s16 = sand.u32 1, %s6606_s30   ;;  %p8955_p13 = scmp.ne.s32.totalorder %s8867_s21, 0 }
 0x781   : > { %p8956_p4 = scmp.ge.s32.totalorder %s6618_s12, 2  ;;  %s5399_s19 = scalar_lea.sflag [#allocation5], %s5398_s16 }
 0x783   : > { %p6345_p5 = pnand %p8956_p4, %p8955_p13 }
 0x785   : > { %p6346_p7 = pneg %p6345_p5 }
 0x787   : > { %6601 = dma.done.wait (%p6346_p7), %s5399_s19, 512  }
 0x788   : > { %6603 = vsyncadd (%p6346_p7), %s5399_s19, 4294966784  ;;  %s8957_s20 = sld [smem:[#allocation9_spill]]  ;;  %p22_p8 = scmp.ge.s32.totalorder %s6713_s15, 4  }
 0x789   : > { %s8958_s11 = sld [smem:[#allocation10_spill]]  ;;  %s8959_s30 = smov %s6610_s10 }
 0x78a   : > { %s8961_s12 = smov %s6713_s15  ;;  %24 = sbr.rel (!%p22_p8) target bundleno = 5 (0x5), region = 109 }
 0x78e   : > { %s8960_s10 = smov %s8957_s20 }
 0x78f   :  { %5404 = vsyncpa [#allocation4], 1 }
 0x790   :  { %5406 = vsyncpa [#allocation4 + $0x1], 1 }
 0x791   :  { %5407 = vsyncpa [#allocation5], 1 }
 0x792   :  { %5409 = vsyncpa [#allocation5 + $0x1], 1 }

</bundles_post_ra>
